<compile_context>
chip_gen: v7x
topology: tpu7x:2x2x1
jax: 0.10.0
libtpu: 0.0.40
codegen_flags: <defaults>
</compile_context>

<pallas_src>
import functools

import jax
import jax.numpy as jnp
from jax import lax
from jax.experimental import pallas as pl
from jax.experimental.pallas import tpu as pltpu

C_IN = 2048     # input channels (fixed by SpatialAttention(2048, ...))
C_ATT = 128     # attention / local feature dim
C_HEAD = 128    # head output dim
EPS = 1e-12     # F.normalize clamp eps


def _softplus(x):
    # nn.Softplus(beta=1, threshold=20); outer where already selects x for x > 20.
    return jnp.where(x > 20.0, x, jnp.log1p(jnp.exp(x)))


# ---------------------------------------------------------------------------
# Single fused kernel.
#   grid = (N, num_pixel_tiles); the pixel axis is a reduction ("arbitrary"),
#   VMEM scratch accumulators hold the running pixel sums, and the finalize step
#   (last pixel tile) applies bias / NormLinearNorm and writes both outputs.
#   Layout inside the kernel: channels on sublanes, pixels on lanes (native NCHW).
# ---------------------------------------------------------------------------
def _combiner_kernel(x_ref, w1t_ref, b1_ref, w2_ref, b2_ref,
                     wht_ref, bh_ref, wnlt_ref, bnl_ref,
                     f1_ref, f2_ref,
                     att_acc, head_acc,
                     *, inv_hw, tp, hw, need_mask):
    p = pl.program_id(1)

    @pl.when(p == 0)
    def _init():
        att_acc[...] = jnp.zeros_like(att_acc)
        head_acc[...] = jnp.zeros_like(head_acc)

    x = x_ref[0]                                  # (C, TP) f32, channels x pixels
    xb = x.astype(jnp.bfloat16)                   # MXU operands in bf16, f32 accumulation

    # 1x1 conv 2048 -> 128 : (128, C) @ (C, TP) -> (128, TP)   (NN MXU matmul)
    feat = jnp.dot(w1t_ref[...], xb, preferred_element_type=jnp.float32) + b1_ref[...]

    # L2-normalize over channels (sublane axis); rsqrt goes to the EUP.
    inv_n = lax.rsqrt(jnp.maximum(jnp.sum(feat * feat, axis=0, keepdims=True), EPS * EPS))
    feat_n = feat * inv_n                                                  # (128, TP)

    # attention score: softplus -> 1x1 conv (128 -> 1) -> softplus
    act = _softplus(feat)
    score = jnp.sum(act * w2_ref[...], axis=0, keepdims=True) + b2_ref[0]  # (1, TP)
    score = _softplus(score)

    attended = feat_n * score                                              # (128, TP)

    # head branch folded in: Linear(2048->128) per pixel, averaged in the finalize.
    head_t = jnp.dot(wht_ref[...], xb, preferred_element_type=jnp.float32)  # (128, TP)

    if need_mask:  # static Python flag: only traced for ragged H*W
        col = lax.broadcasted_iota(jnp.int32, (1, tp), 1) + p * tp
        valid = col < hw
        attended = jnp.where(valid, attended, 0.0)
        head_t = jnp.where(valid, head_t, 0.0)

    att_acc[...] += jnp.sum(attended, axis=1, keepdims=True)               # (128, 1)
    head_acc[...] += jnp.sum(head_t, axis=1, keepdims=True)                # (128, 1)

    @pl.when(p == pl.num_programs(1) - 1)
    def _finalize():
        # features1 = Linear(GAP(x)) = mean_p(Linear(x_p)) + bias
        f1_ref[0] = head_acc[...] * inv_hw + bh_ref[...]

        # features2 = L2norm( Linear( L2norm( mean_p(attended) ) ) )
        att_mean = att_acc[...] * inv_hw                                   # (128, 1)
        inv1 = lax.rsqrt(jnp.maximum(
            jnp.sum(att_mean * att_mean, axis=0, keepdims=True), EPS * EPS))
        z = att_mean * inv1
        y = jnp.dot(wnlt_ref[...], z, preferred_element_type=jnp.float32) + bnl_ref[...]
        inv2 = lax.rsqrt(jnp.maximum(jnp.sum(y * y, axis=0, keepdims=True), EPS * EPS))
        f2_ref[0] = y * inv2


def _pick_tile_pixels(hw, target):
    """Largest legal pixel-tile: full extent if small, else a multiple of 128 <= target."""
    if hw <= target:
        return hw                                   # single full-extent tile (always legal)
    return max(128, (target // 128) * 128)          # lane-aligned tile; ragged tail is masked


# ---------------------------------------------------------------------------
# Wrapper (train-mode forward).  x_nchw: (N, 2048, H, W) -> (features1, features2)
# ---------------------------------------------------------------------------
def combiner_forward(x_nchw, params, *, target_tile_pixels=512):
    N, C, H, W = x_nchw.shape
    assert C == C_IN
    hw = H * W
    tp = _pick_tile_pixels(hw, target_tile_pixels)
    grid = (N, pl.cdiv(hw, tp))

    # NCHW -> (N, C, H*W): a pure reshape, no data movement (no HBM transpose of x).
    x = x_nchw.reshape(N, C, hw)

    # Pre-transposed (out_dim, in_dim) weights; MXU operands in bf16 (tiny one-time cost).
    w1t = params["w1"].T.astype(jnp.bfloat16)        # (128, 2048)
    wht = params["w_head"].T.astype(jnp.bfloat16)    # (128, 2048)
    wnlt = params["w_nl"].T                          # (128, 128) f32
    b1 = params["b1"].reshape(C_ATT, 1)
    w2 = params["w2"].reshape(C_ATT, 1)
    b2 = params["b2"].reshape(1)                     # scalar -> SMEM
    bh = params["b_head"].reshape(C_HEAD, 1)
    bnl = params["b_nl"].reshape(C_ATT, 1)

    f1, f2 = pl.pallas_call(
        functools.partial(_combiner_kernel, inv_hw=1.0 / hw, tp=tp, hw=hw,
                          need_mask=(hw % tp != 0)),
        grid=grid,
        in_specs=[
            pl.BlockSpec((1, C, tp), lambda n, p: (n, 0, p)),        # x pixel slab (NCHW)
            pl.BlockSpec((C_ATT, C), lambda n, p: (0, 0)),           # conv1 weight^T (bf16)
            pl.BlockSpec((C_ATT, 1), lambda n, p: (0, 0)),           # conv1 bias (col)
            pl.BlockSpec((C_ATT, 1), lambda n, p: (0, 0)),           # conv2 weight (128->1)
            pl.BlockSpec(memory_space=pltpu.MemorySpace.SMEM),       # conv2 bias (scalar)
            pl.BlockSpec((C_HEAD, C), lambda n, p: (0, 0)),          # head weight^T (bf16)
            pl.BlockSpec((C_HEAD, 1), lambda n, p: (0, 0)),          # head bias (col)
            pl.BlockSpec((C_ATT, C_ATT), lambda n, p: (0, 0)),       # NormLinearNorm weight^T
            pl.BlockSpec((C_ATT, 1), lambda n, p: (0, 0)),           # NormLinearNorm bias
        ],
        out_specs=[
            pl.BlockSpec((1, C_HEAD, 1), lambda n, p: (n, 0, 0)),    # features1 (column)
            pl.BlockSpec((1, C_ATT, 1), lambda n, p: (n, 0, 0)),     # features2 (column)
        ],
        out_shape=(
            jax.ShapeDtypeStruct((N, C_HEAD, 1), jnp.float32),
            jax.ShapeDtypeStruct((N, C_ATT, 1), jnp.float32),
        ),
        scratch_shapes=[
            pltpu.VMEM((C_ATT, 1), jnp.float32),    # attention-branch pixel sum
            pltpu.VMEM((C_HEAD, 1), jnp.float32),   # head-branch pixel sum
        ],
        compiler_params=pltpu.CompilerParams(
            dimension_semantics=("parallel", "arbitrary")),
    )(x, w1t, b1, w2, b2, wht, bh, wnlt, bnl)

    # TODO(synk): on v7x with very small N, splitting the pixel reduction across the two
    #             TensorCores (partial accumulators + combine) would improve occupancy.
    return f1[..., 0], f2[..., 0]


# ---------------------------------------------------------------------------
# Plain-JAX reference of the same math (full f32), for a sanity check.
# ---------------------------------------------------------------------------
def _reference_forward(x_nchw, params):
    N, C, H, W = x_nchw.shape
    x = x_nchw.reshape(N, C, H * W)                                        # (N, C, P)
    feat = jnp.einsum("ncp,ck->npk", x, params["w1"]) + params["b1"]       # (N, P, 128)
    feat_n = feat / jnp.maximum(
        jnp.sqrt(jnp.sum(feat * feat, -1, keepdims=True)), EPS)
    score = _softplus(jnp.sum(_softplus(feat) * params["w2"], -1, keepdims=True)
                      + params["b2"][0, 0])
    att_pooled = jnp.mean(feat_n * score, axis=1)                          # (N, 128)
    gap = jnp.mean(x, axis=2)                                              # (N, 2048)
    f1 = gap @ params["w_head"] + params["b_head"]
    z = att_pooled / jnp.maximum(
        jnp.sqrt(jnp.sum(att_pooled ** 2, -1, keepdims=True)), EPS)
    y = z @ params["w_nl"] + params["b_nl"]
    f2 = y / jnp.maximum(jnp.sqrt(jnp.sum(y * y, -1, keepdims=True)), EPS)
    return f1, f2


def init_params(key):
    ks = jax.random.split(key, 6)
    s = 0.02
    return {
        "w1":     s * jax.random.normal(ks[0], (C_IN, C_ATT), jnp.float32),
        "b1":     s * jax.random.normal(ks[1], (1, C_ATT), jnp.float32),
        "w2":     s * jax.random.normal(ks[2], (1, C_ATT), jnp.float32),
        "b2":     jnp.zeros((1, 1), jnp.float32),
        "w_head": s * jax.random.normal(ks[3], (C_IN, C_HEAD), jnp.float32),
        "b_head": s * jax.random.normal(ks[4], (1, C_HEAD), jnp.float32),
        "w_nl":   s * jax.random.normal(ks[5], (C_ATT, C_ATT), jnp.float32),
        "b_nl":   jnp.zeros((1, C_ATT), jnp.float32),
    }


if __name__ == "__main__":
    key = jax.random.PRNGKey(0)
    k_x, k_p = jax.random.split(key)

    # small but shape-consistent input: N=2, C=2048 (required by the module), 8x8 spatial
    x = jax.random.normal(k_x, (2, C_IN, 8, 8), jnp.float32)
    params = init_params(k_p)

    f1, f2 = jax.jit(combiner_forward)(x, params)
    jax.block_until_ready((f1, f2))

    r1, r2 = _reference_forward(x, params)
    assert f1.shape == (2, C_HEAD) and f2.shape == (2, C_ATT)
    # bf16 matmul operands (f32 accumulation) vs full-f32 reference -> slightly looser tol
    assert jnp.allclose(f1, r1, rtol=3e-2, atol=3e-2), float(jnp.max(jnp.abs(f1 - r1)))
    assert jnp.allclose(f2, r2, rtol=3e-2, atol=3e-2), float(jnp.max(jnp.abs(f2 - r2)))

    print("KERNEL_OK")
</pallas_src>

<mosaic_0001>
module attributes {stable_mosaic.version = 11 : i64} {
  func.func @_combiner_kernel(%arg0: i32, %arg1: i32, %arg2: memref<1x2048x64xf32, #tpu.memory_space<vmem>>, %arg3: memref<128x2048xbf16, #tpu.memory_space<vmem>>, %arg4: memref<128x1xf32, #tpu.memory_space<vmem>>, %arg5: memref<128x1xf32, #tpu.memory_space<vmem>>, %arg6: memref<1xf32, #tpu.memory_space<smem>>, %arg7: memref<128x2048xbf16, #tpu.memory_space<vmem>>, %arg8: memref<128x1xf32, #tpu.memory_space<vmem>>, %arg9: memref<128x128xf32, #tpu.memory_space<vmem>>, %arg10: memref<128x1xf32, #tpu.memory_space<vmem>>, %arg11: memref<1x128x1xf32, #tpu.memory_space<vmem>>, %arg12: memref<1x128x1xf32, #tpu.memory_space<vmem>>, %arg13: memref<128x1xf32, #tpu.memory_space<vmem>>, %arg14: memref<128x1xf32, #tpu.memory_space<vmem>>) attributes {dimension_semantics = [#tpu.dimension_semantics<parallel>, #tpu.dimension_semantics<arbitrary>], iteration_bounds = array<i64: 2, 1>, scalar_prefetch = 0 : i64, scratch_operands = 2 : i64, tpu.core_type = #tpu.core_type<tc>, window_params = [{transform_indices = @transform_0, window_bounds = array<i64: 1, 2048, 64>}, {pipeline_mode = #tpu.pipeline_mode<synchronous>, transform_indices = @transform_1, window_bounds = array<i64: 128, 2048>}, {pipeline_mode = #tpu.pipeline_mode<synchronous>, transform_indices = @transform_2, window_bounds = array<i64: 128, 1>}, {pipeline_mode = #tpu.pipeline_mode<synchronous>, transform_indices = @transform_3, window_bounds = array<i64: 128, 1>}, {transform_indices = @transform_4, window_bounds = array<i64: 1>}, {pipeline_mode = #tpu.pipeline_mode<synchronous>, transform_indices = @transform_5, window_bounds = array<i64: 128, 2048>}, {pipeline_mode = #tpu.pipeline_mode<synchronous>, transform_indices = @transform_6, window_bounds = array<i64: 128, 1>}, {pipeline_mode = #tpu.pipeline_mode<synchronous>, transform_indices = @transform_7, window_bounds = array<i64: 128, 128>}, {pipeline_mode = #tpu.pipeline_mode<synchronous>, transform_indices = @transform_8, window_bounds = array<i64: 128, 1>}, {transform_indices = @transform_9, window_bounds = array<i64: 1, 128, 1>}, {transform_indices = @transform_10, window_bounds = array<i64: 1, 128, 1>}]} {
    %c0_i32 = arith.constant 0 : i32
    %0 = arith.cmpi eq, %arg1, %c0_i32 : i32
    %1 = arith.extui %0 : i1 to i32
    %c0_i32_0 = arith.constant 0 : i32
    %2 = arith.cmpi ne, %1, %c0_i32_0 : i32
    scf.if %2 {
      %cst_30 = arith.constant 0.000000e+00 : f32
      %54 = vector.broadcast %cst_30 : f32 to vector<128x1xf32>
      %c0_31 = arith.constant 0 : index
      %c0_32 = arith.constant 0 : index
      %55 = vector.load %arg13[%c0_31, %c0_32] : memref<128x1xf32, #tpu.memory_space<vmem>>, vector<128x1xf32>
      tpu.vector_store %arg13[%c0_31, %c0_32], %54 {strides = array<i32>} : memref<128x1xf32, #tpu.memory_space<vmem>>, vector<128x1xf32>,
      %cst_33 = arith.constant 0.000000e+00 : f32
      %56 = vector.broadcast %cst_33 : f32 to vector<128x1xf32>
      %c0_34 = arith.constant 0 : index
      %c0_35 = arith.constant 0 : index
      %57 = vector.load %arg14[%c0_34, %c0_35] : memref<128x1xf32, #tpu.memory_space<vmem>>, vector<128x1xf32>
      tpu.vector_store %arg14[%c0_34, %c0_35], %56 {strides = array<i32>} : memref<128x1xf32, #tpu.memory_space<vmem>>, vector<128x1xf32>,
    } else {
    }
    %c0 = arith.constant 0 : index
    %c0_1 = arith.constant 0 : index
    %c0_2 = arith.constant 0 : index
    %3 = vector.load %arg2[%c0, %c0_1, %c0_2] : memref<1x2048x64xf32, #tpu.memory_space<vmem>>, vector<1x2048x64xf32>
    %4 = vector.shape_cast %3 : vector<1x2048x64xf32> to vector<2048x64xf32>
    %5 = arith.truncf %4 : vector<2048x64xf32> to vector<2048x64xbf16>
    %c0_3 = arith.constant 0 : index
    %c0_4 = arith.constant 0 : index
    %6 = vector.load %arg3[%c0_3, %c0_4] : memref<128x2048xbf16, #tpu.memory_space<vmem>>, vector<128x2048xbf16>
    %cst = arith.constant dense<0.000000e+00> : vector<128x64xf32>
    %7 = tpu.matmul %6, %5, %cst {dimension_numbers = #tpu.dot_dimension_numbers<[1], [0], [0], [1], [0, 0, 1, 1], [], []>} : vector<128x2048xbf16>, vector<2048x64xbf16>, vector<128x64xf32> -> vector<128x64xf32>
    %c0_5 = arith.constant 0 : index
    %c0_6 = arith.constant 0 : index
    %8 = vector.load %arg4[%c0_5, %c0_6] : memref<128x1xf32, #tpu.memory_space<vmem>>, vector<128x1xf32>
    %9 = vector.broadcast %8 : vector<128x1xf32> to vector<128x64xf32>
    %10 = arith.addf %7, %9 : vector<128x64xf32>
    %11 = arith.mulf %10, %10 : vector<128x64xf32>
    %cst_7 = arith.constant dense<0.000000e+00> : vector<64xf32>
    %12 = vector.multi_reduction <add>, %11, %cst_7 [0] : vector<128x64xf32> to vector<64xf32>
    %13 = vector.shape_cast %12 : vector<64xf32> to vector<1x64xf32>
    %cst_8 = arith.constant 1.000000e-24 : f32
    %14 = vector.broadcast %cst_8 : f32 to vector<1x64xf32>
    %15 = arith.maximumf %13, %14 : vector<1x64xf32>
    %16 = math.rsqrt %15 : vector<1x64xf32>
    %17 = vector.broadcast %16 : vector<1x64xf32> to vector<128x64xf32>
    %18 = arith.mulf %10, %17 : vector<128x64xf32>
    %cst_9 = arith.constant 2.000000e+01 : f32
    %19 = vector.broadcast %cst_9 : f32 to vector<128x64xf32>
    %20 = arith.cmpf ogt, %10, %19 : vector<128x64xf32>
    %21 = math.exp %10 : vector<128x64xf32>
    %22 = math.log1p %21 : vector<128x64xf32>
    %23 = arith.select %20, %10, %22 : vector<128x64xi1>, vector<128x64xf32>
    %c0_10 = arith.constant 0 : index
    %c0_11 = arith.constant 0 : index
    %24 = vector.load %arg5[%c0_10, %c0_11] : memref<128x1xf32, #tpu.memory_space<vmem>>, vector<128x1xf32>
    %25 = vector.broadcast %24 : vector<128x1xf32> to vector<128x64xf32>
    %26 = arith.mulf %23, %25 : vector<128x64xf32>
    %cst_12 = arith.constant dense<0.000000e+00> : vector<64xf32>
    %27 = vector.multi_reduction <add>, %26, %cst_12 [0] : vector<128x64xf32> to vector<64xf32>
    %28 = vector.shape_cast %27 : vector<64xf32> to vector<1x64xf32>
    %c0_13 = arith.constant 0 : index
    %29 = memref.load %arg6[%c0_13] : memref<1xf32, #tpu.memory_space<smem>>
    %30 = vector.broadcast %29 : f32 to vector<1x64xf32>
    %31 = arith.addf %28, %30 : vector<1x64xf32>
    %cst_14 = arith.constant 2.000000e+01 : f32
    %32 = vector.broadcast %cst_14 : f32 to vector<1x64xf32>
    %33 = arith.cmpf ogt, %31, %32 : vector<1x64xf32>
    %34 = math.exp %31 : vector<1x64xf32>
    %35 = math.log1p %34 : vector<1x64xf32>
    %36 = arith.select %33, %31, %35 : vector<1x64xi1>, vector<1x64xf32>
    %37 = vector.broadcast %36 : vector<1x64xf32> to vector<128x64xf32>
    %38 = arith.mulf %18, %37 : vector<128x64xf32>
    %c0_15 = arith.constant 0 : index
    %c0_16 = arith.constant 0 : index
    %39 = vector.load %arg7[%c0_15, %c0_16] : memref<128x2048xbf16, #tpu.memory_space<vmem>>, vector<128x2048xbf16>
    %cst_17 = arith.constant dense<0.000000e+00> : vector<128x64xf32>
    %40 = tpu.matmul %39, %5, %cst_17 {dimension_numbers = #tpu.dot_dimension_numbers<[1], [0], [0], [1], [0, 0, 1, 1], [], []>} : vector<128x2048xbf16>, vector<2048x64xbf16>, vector<128x64xf32> -> vector<128x64xf32>
    %c0_18 = arith.constant 0 : index
    %c0_19 = arith.constant 0 : index
    %41 = vector.load %arg13[%c0_18, %c0_19] : memref<128x1xf32, #tpu.memory_space<vmem>>, vector<128x1xf32>
    %cst_20 = arith.constant dense<0.000000e+00> : vector<128xf32>
    %42 = vector.multi_reduction <add>, %38, %cst_20 [1] : vector<128x64xf32> to vector<128xf32>
    %43 = vector.shape_cast %42 : vector<128xf32> to vector<128x1xf32>
    %44 = arith.addf %41, %43 : vector<128x1xf32>
    %c0_21 = arith.constant 0 : index
    %c0_22 = arith.constant 0 : index
    %45 = vector.load %arg13[%c0_21, %c0_22] : memref<128x1xf32, #tpu.memory_space<vmem>>, vector<128x1xf32>
    tpu.vector_store %arg13[%c0_21, %c0_22], %44 {strides = array<i32>} : memref<128x1xf32, #tpu.memory_space<vmem>>, vector<128x1xf32>,
    %c0_23 = arith.constant 0 : index
    %c0_24 = arith.constant 0 : index
    %46 = vector.load %arg14[%c0_23, %c0_24] : memref<128x1xf32, #tpu.memory_space<vmem>>, vector<128x1xf32>
    %cst_25 = arith.constant dense<0.000000e+00> : vector<128xf32>
    %47 = vector.multi_reduction <add>, %40, %cst_25 [1] : vector<128x64xf32> to vector<128xf32>
    %48 = vector.shape_cast %47 : vector<128xf32> to vector<128x1xf32>
    %49 = arith.addf %46, %48 : vector<128x1xf32>
    %c0_26 = arith.constant 0 : index
    %c0_27 = arith.constant 0 : index
    %50 = vector.load %arg14[%c0_26, %c0_27] : memref<128x1xf32, #tpu.memory_space<vmem>>, vector<128x1xf32>
    tpu.vector_store %arg14[%c0_26, %c0_27], %49 {strides = array<i32>} : memref<128x1xf32, #tpu.memory_space<vmem>>, vector<128x1xf32>,
    %c0_i32_28 = arith.constant 0 : i32
    %51 = arith.cmpi eq, %arg1, %c0_i32_28 : i32
    %52 = arith.extui %51 : i1 to i32
    %c0_i32_29 = arith.constant 0 : i32
    %53 = arith.cmpi ne, %52, %c0_i32_29 : i32
    scf.if %53 {
      %c0_30 = arith.constant 0 : index
      %c0_31 = arith.constant 0 : index
      %54 = vector.load %arg14[%c0_30, %c0_31] : memref<128x1xf32, #tpu.memory_space<vmem>>, vector<128x1xf32>
      %cst_32 = arith.constant 1.562500e-02 : f32
      %55 = vector.broadcast %cst_32 : f32 to vector<128x1xf32>
      %56 = arith.mulf %54, %55 : vector<128x1xf32>
      %c0_33 = arith.constant 0 : index
      %c0_34 = arith.constant 0 : index
      %57 = vector.load %arg8[%c0_33, %c0_34] : memref<128x1xf32, #tpu.memory_space<vmem>>, vector<128x1xf32>
      %58 = arith.addf %56, %57 : vector<128x1xf32>
      %c0_35 = arith.constant 0 : index
      %c0_36 = arith.constant 0 : index
      %c0_37 = arith.constant 0 : index
      %59 = vector.load %arg11[%c0_35, %c0_36, %c0_37] : memref<1x128x1xf32, #tpu.memory_space<vmem>>, vector<1x128x1xf32>
      %60 = vector.shape_cast %59 : vector<1x128x1xf32> to vector<128x1xf32>
      %61 = vector.shape_cast %58 : vector<128x1xf32> to vector<1x128x1xf32>
      tpu.vector_store %arg11[%c0_35, %c0_36, %c0_37], %61 {strides = array<i32>} : memref<1x128x1xf32, #tpu.memory_space<vmem>>, vector<1x128x1xf32>,
      %c0_38 = arith.constant 0 : index
      %c0_39 = arith.constant 0 : index
      %62 = vector.load %arg13[%c0_38, %c0_39] : memref<128x1xf32, #tpu.memory_space<vmem>>, vector<128x1xf32>
      %cst_40 = arith.constant 1.562500e-02 : f32
      %63 = vector.broadcast %cst_40 : f32 to vector<128x1xf32>
      %64 = arith.mulf %62, %63 : vector<128x1xf32>
      %65 = arith.mulf %64, %64 : vector<128x1xf32>
      %cst_41 = arith.constant dense<0.000000e+00> : vector<1xf32>
      %66 = vector.multi_reduction <add>, %65, %cst_41 [0] : vector<128x1xf32> to vector<1xf32>
      %67 = vector.shape_cast %66 : vector<1xf32> to vector<1x1xf32>
      %cst_42 = arith.constant 1.000000e-24 : f32
      %68 = vector.broadcast %cst_42 : f32 to vector<1x1xf32>
      %69 = arith.maximumf %67, %68 : vector<1x1xf32>
      %70 = math.rsqrt %69 : vector<1x1xf32>
      %71 = vector.broadcast %70 : vector<1x1xf32> to vector<128x1xf32>
      %72 = arith.mulf %64, %71 : vector<128x1xf32>
      %c0_43 = arith.constant 0 : index
      %c0_44 = arith.constant 0 : index
      %73 = vector.load %arg9[%c0_43, %c0_44] : memref<128x128xf32, #tpu.memory_space<vmem>>, vector<128x128xf32>
      %cst_45 = arith.constant dense<0.000000e+00> : vector<128x1xf32>
      %74 = tpu.matmul %73, %72, %cst_45 {dimension_numbers = #tpu.dot_dimension_numbers<[1], [0], [0], [1], [0, 0, 1, 1], [], []>} : vector<128x128xf32>, vector<128x1xf32>, vector<128x1xf32> -> vector<128x1xf32>
      %c0_46 = arith.constant 0 : index
      %c0_47 = arith.constant 0 : index
      %75 = vector.load %arg10[%c0_46, %c0_47] : memref<128x1xf32, #tpu.memory_space<vmem>>, vector<128x1xf32>
      %76 = arith.addf %74, %75 : vector<128x1xf32>
      %77 = arith.mulf %76, %76 : vector<128x1xf32>
      %cst_48 = arith.constant dense<0.000000e+00> : vector<1xf32>
      %78 = vector.multi_reduction <add>, %77, %cst_48 [0] : vector<128x1xf32> to vector<1xf32>
      %79 = vector.shape_cast %78 : vector<1xf32> to vector<1x1xf32>
      %cst_49 = arith.constant 1.000000e-24 : f32
      %80 = vector.broadcast %cst_49 : f32 to vector<1x1xf32>
      %81 = arith.maximumf %79, %80 : vector<1x1xf32>
      %82 = math.rsqrt %81 : vector<1x1xf32>
      %83 = vector.broadcast %82 : vector<1x1xf32> to vector<128x1xf32>
      %84 = arith.mulf %76, %83 : vector<128x1xf32>
      %c0_50 = arith.constant 0 : index
      %c0_51 = arith.constant 0 : index
      %c0_52 = arith.constant 0 : index
      %85 = vector.load %arg12[%c0_50, %c0_51, %c0_52] : memref<1x128x1xf32, #tpu.memory_space<vmem>>, vector<1x128x1xf32>
      %86 = vector.shape_cast %85 : vector<1x128x1xf32> to vector<128x1xf32>
      %87 = vector.shape_cast %84 : vector<128x1xf32> to vector<1x128x1xf32>
      tpu.vector_store %arg12[%c0_50, %c0_51, %c0_52], %87 {strides = array<i32>} : memref<1x128x1xf32, #tpu.memory_space<vmem>>, vector<1x128x1xf32>,
    } else {
    }
    return
  }
  func.func @transform_0(%arg0: i32, %arg1: i32) -> (i32, i32, i32) {
    %c0_i32 = arith.constant 0 : i32
    %c0_i32_0 = arith.constant 0 : i32
    return %arg0, %c0_i32, %arg1 : i32, i32, i32
  }
  func.func @transform_1(%arg0: i32, %arg1: i32) -> (i32, i32) {
    %c0_i32 = arith.constant 0 : i32
    %c0_i32_0 = arith.constant 0 : i32
    %c0_i32_1 = arith.constant 0 : i32
    return %c0_i32, %c0_i32_0 : i32, i32
  }
  func.func @transform_2(%arg0: i32, %arg1: i32) -> (i32, i32) {
    %c0_i32 = arith.constant 0 : i32
    %c0_i32_0 = arith.constant 0 : i32
    %c0_i32_1 = arith.constant 0 : i32
    return %c0_i32, %c0_i32_0 : i32, i32
  }
  func.func @transform_3(%arg0: i32, %arg1: i32) -> (i32, i32) {
    %c0_i32 = arith.constant 0 : i32
    %c0_i32_0 = arith.constant 0 : i32
    %c0_i32_1 = arith.constant 0 : i32
    return %c0_i32, %c0_i32_0 : i32, i32
  }
  func.func @transform_4(%arg0: i32, %arg1: i32) -> i32 {
    %c0_i32 = arith.constant 0 : i32
    %c0_i32_0 = arith.constant 0 : i32
    return %c0_i32 : i32
  }
  func.func @transform_5(%arg0: i32, %arg1: i32) -> (i32, i32) {
    %c0_i32 = arith.constant 0 : i32
    %c0_i32_0 = arith.constant 0 : i32
    %c0_i32_1 = arith.constant 0 : i32
    return %c0_i32, %c0_i32_0 : i32, i32
  }
  func.func @transform_6(%arg0: i32, %arg1: i32) -> (i32, i32) {
    %c0_i32 = arith.constant 0 : i32
    %c0_i32_0 = arith.constant 0 : i32
    %c0_i32_1 = arith.constant 0 : i32
    return %c0_i32, %c0_i32_0 : i32, i32
  }
  func.func @transform_7(%arg0: i32, %arg1: i32) -> (i32, i32) {
    %c0_i32 = arith.constant 0 : i32
    %c0_i32_0 = arith.constant 0 : i32
    %c0_i32_1 = arith.constant 0 : i32
    return %c0_i32, %c0_i32_0 : i32, i32
  }
  func.func @transform_8(%arg0: i32, %arg1: i32) -> (i32, i32) {
    %c0_i32 = arith.constant 0 : i32
    %c0_i32_0 = arith.constant 0 : i32
    %c0_i32_1 = arith.constant 0 : i32
    return %c0_i32, %c0_i32_0 : i32, i32
  }
  func.func @transform_9(%arg0: i32, %arg1: i32) -> (i32, i32, i32) {
    %c0_i32 = arith.constant 0 : i32
    %c0_i32_0 = arith.constant 0 : i32
    %c0_i32_1 = arith.constant 0 : i32
    return %arg0, %c0_i32, %c0_i32_0 : i32, i32, i32
  }
  func.func @transform_10(%arg0: i32, %arg1: i32) -> (i32, i32, i32) {
    %c0_i32 = arith.constant 0 : i32
    %c0_i32_0 = arith.constant 0 : i32
    %c0_i32_1 = arith.constant 0 : i32
    return %arg0, %c0_i32, %c0_i32_0 : i32, i32, i32
  }
}

</mosaic_0001>

<bundles_post_ra>
// kernel: combiner_forward.1
= control target key start
LH: loop header
LB: loop body
LE: loop exit
PB: predicated region body
PF: predicated region fallthrough
CT: control target
= control target key end

     0   :  { %s6827_s15 = smov 0   ;;  %s6829_s16 = smov 0   ;;  %s10451_s0 = inlined_call_operand.vmem [shape: f32[2,2048,64], index: 0, kind: input, shape index: {}]   ;;  %s10452_s1 = inlined_call_operand.vmem [shape: bf16[128,2048], index: 1, kind: input, shape index: {}]   ;;  %s10453_s2 = inlined_call_operand.vmem [shape: f32[128,1], index: 2, kind: input, shape index: {}]   ;;  %s10454_s3 = inlined_call_operand.vmem [shape: f32[128,1], index: 3, kind: input, shape index: {}]   ;;  %s10455_s4 = inlined_call_operand.<no memory space> [shape: f32[1], index: 4, kind: input, shape index: {}]   ;;  %s10456_s5 = inlined_call_operand.vmem [shape: bf16[128,2048], index: 5, kind: input, shape index: {}]   ;;  %s10457_s6 = inlined_call_operand.vmem [shape: f32[128,1], index: 6, kind: input, shape index: {}]   ;;  %s10458_s7 = inlined_call_operand.vmem [shape: f32[128,128], index: 7, kind: input, shape index: {}]   ;;  %s10459_s8 = inlined_call_operand.vmem [shape: f32[128,1], index: 8, kind: input, shape index: {}]   ;;  %s10460_s9 = inlined_call_operand.vmem [shape: f32[2,128,1], index: 9, kind: output, shape index: {0}]   ;;  %s10461_s10 = inlined_call_operand.vmem [shape: f32[2,128,1], index: 10, kind: output, shape index: {1}]  }
   0x1   :  { %16 = sst [smem:[#allocation4]] %s10455_s4  ;;  %s6831_s17 = smov 0  }
   0x2 LB: > { %s34_s4 = sadd.s32 1, %s6761_s16  ;;  %p5213_p0 = scmp.ge.s32.totalorder %s6765_s17, 1  ;;  %s6765_s17 = sphi %s6831_s17, %s22_s17   ;;  %s6761_s16 = sphi %s6829_s16, %s10882_s16   ;;  %s6757_s15 = sphi %s6827_s15, %s10881_s15  }
   0x3   : > { %p36_p1 = scmp.ge.s32.totalorder %s34_s4, 2  ;;  %p333_p2 = scmp.lt.s32.totalorder %s6765_s17, 3 }
   0x5   : > { %s10884_s4 = smov (%p36_p1, %s34_s4), 0  ;;  %p334_p3 = pnand %p5213_p0, %p333_p2 }
   0x7   : > { %337 = sbr.rel (%p334_p3) target bundleno = 1182 (0x49e), region = 56 }
   0xe   : > { %p379_p4 = scmp.lt.s32.totalorder %s6757_s15, 1  ;;  %v6848_v0 = vld [vmem:[%s10452_s1] sm:$0xff]  ;;  %v6858_v2 = vld [vmem:[%s10452_s1 + $0x8] sm:$0xff]  ;;  %v6767_v5 = vmov 0   ;;  %vm2475_vm0 = vcmask 523264   ;;  %s2888_s12 = sld [smem:[#allocation4]] }
   0xf   : > { %v6853_v1 = vld [vmem:[%s10452_s1 + $0x40] sm:$0xff]  ;;  %v6865_v4 = vld [vmem:[%s10452_s1 + $0x48] sm:$0xff]  ;;  %6667 = vset.pattern.permute.xlu0 %v6767_v5  ;;  %6668 = vset.pattern.permute.xlu1 %v6767_v5 }
  0x10   : > { %v5221_v3 = vcombine.high %v6848_v0, %v6853_v1  ;;  %s10886_s15 = smov (!%p379_p4, %s6757_s15), 1  ;;  %v5223_v6 = vcombine.high %v6858_v2, %v6865_v4 }
  0x11   : > { %s5478_s26 = sshll.u32 %s10886_s15, 11  ;;  %s5479_s20 = sshll.u32 %s10886_s15, 7 }
  0x12   : > { %1715 = vmatprep.mubr.bf16.mxu0 %v5221_v3  ;;  %1812 = vmatprep.mubr.bf16.mxu1 %v5223_v6  ;;  %s6875_s29 = scalar_lea.vmem %s10451_s0, %s5478_s26  ;;  %s10160_s25 = scalar_lea.vmem %s10460_s9, %s5479_s20 }
  0x13   : > { %v451_v7 = vld [vmem:[%s6875_s29 + $0x80] sm:$0xff]  ;;  %v452_v8 = vld [vmem:[%s6875_s29 + $0x88] sm:$0xff]  ;;  %v453_v18 = vld [vmem:[%s6875_s29 + $0x90] sm:$0xff]  ;;  %s10399_s26 = scalar_lea.vmem %s10461_s10, %s5479_s20 }
  0x14   : > { %v483_v9 = vld [vmem:[%s6875_s29 + $0x180] sm:$0xff]  ;;  %v6880_v10 = vpack.c.bf16 %v452_v8, %v451_v7  ;;  %v484_v11 = vld [vmem:[%s6875_s29 + $0x188] sm:$0xff]  ;;  %v454_v20 = vld [vmem:[%s6875_s29 + $0x98] sm:$0xff] }
  0x15   : > { %v435_v12 = vld [vmem:[%s6875_s29] sm:$0xff]  ;;  %v436_v13 = vld [vmem:[%s6875_s29 + $0x8] sm:$0xff]  ;;  %v6885_v14 = vpack.c.bf16 %v484_v11, %v483_v9  ;;  %v485_v21 = vld [vmem:[%s6875_s29 + $0x190] sm:$0xff]  ;;  %v6900_v23 = vpack.c.bf16 %v454_v20, %v453_v18 }
  0x16   : > { %v6887_v15 = vpack.c.bf16 %v436_v13, %v435_v12  ;;  %v467_v16 = vld [vmem:[%s6875_s29 + $0x100] sm:$0xff]  ;;  %v468_v17 = vld [vmem:[%s6875_s29 + $0x108] sm:$0xff]  ;;  %5481 = vmatprep.subr.bf16.mxu0 %v6880_v10  ;;  %v486_v22 = vld [vmem:[%s6875_s29 + $0x198] sm:$0xff] }
  0x17   : > { %v6893_v19 = vpack.c.bf16 %v468_v17, %v467_v16  ;;  %5545 = vmatprep.subr.bf16.mxu1 %v6885_v14  ;;  %v6902_v24 = vpack.c.bf16 %v486_v22, %v485_v21  ;;  %v437_v25 = vld [vmem:[%s6875_s29 + $0x10] sm:$0xff]  ;;  %v438_v26 = vld [vmem:[%s6875_s29 + $0x18] sm:$0xff]  ;;  %v455_v30 = vld [vmem:[%s6875_s29 + $0xa0] sm:$0xff] }
  0x18   : > { %5482 = vmatpush3.bf16.msra.mxu0 %v6887_v15  ;;  %v469_v27 = vld [vmem:[%s6875_s29 + $0x110] sm:$0xff]  ;;  %v6908_v28 = vpack.c.bf16 %v438_v26, %v437_v25  ;;  %v470_v29 = vld [vmem:[%s6875_s29 + $0x118] sm:$0xff]  ;;  %v456_v31 = vld [vmem:[%s6875_s29 + $0xa8] sm:$0xff] }
  0x19   : > { %5546 = vmatpush3.bf16.msra.mxu1 %v6893_v19  ;;  %5483 = vmatprep.subr.bf16.mxu0 %v6900_v23  ;;  %v6915_v32 = vpack.c.bf16 %v470_v29, %v469_v27  ;;  %v6917_v33 = vpack.c.bf16 %v456_v31, %v455_v30  ;;  %v487_v34 = vld [vmem:[%s6875_s29 + $0x1a0] sm:$0xff]  ;;  %v488_v35 = vld [vmem:[%s6875_s29 + $0x1a8] sm:$0xff]  ;;  %v457_v42 = vld [vmem:[%s6875_s29 + $0xb0] sm:$0xff] }
  0x1a   : > { %5547 = vmatprep.subr.bf16.mxu1 %v6902_v24  ;;  %v439_v36 = vld [vmem:[%s6875_s29 + $0x20] sm:$0xff]  ;;  %v6922_v37 = vpack.c.bf16 %v488_v35, %v487_v34  ;;  %v440_v38 = vld [vmem:[%s6875_s29 + $0x28] sm:$0xff]  ;;  %v458_v43 = vld [vmem:[%s6875_s29 + $0xb8] sm:$0xff] }
  0x1b   : > { %v471_v39 = vld [vmem:[%s6875_s29 + $0x120] sm:$0xff]  ;;  %v472_v40 = vld [vmem:[%s6875_s29 + $0x128] sm:$0xff]  ;;  %v6928_v41 = vpack.c.bf16 %v440_v38, %v439_v36  ;;  %v489_v44 = vld [vmem:[%s6875_s29 + $0x1b0] sm:$0xff]  ;;  %v6937_v46 = vpack.c.bf16 %v458_v43, %v457_v42 }
  0x1c   : > { %5484 = vmatpush3.bf16.msra.mxu0 %v6908_v28  ;;  %v6935_v45 = vpack.c.bf16 %v472_v40, %v471_v39  ;;  %v490_v47 = vld [vmem:[%s6875_s29 + $0x1b8] sm:$0xff]  ;;  %v441_v48 = vld [vmem:[%s6875_s29 + $0x30] sm:$0xff]  ;;  %v459_v53 = vld [vmem:[%s6875_s29 + $0xc0] sm:$0xff] }
  0x1d   : > { %5548 = vmatpush3.bf16.msra.mxu1 %v6915_v32  ;;  %5485 = vmatprep.subr.bf16.mxu0 %v6917_v33  ;;  %v442_v49 = vld [vmem:[%s6875_s29 + $0x38] sm:$0xff]  ;;  %v6943_v50 = vpack.c.bf16 %v490_v47, %v489_v44  ;;  %v473_v51 = vld [vmem:[%s6875_s29 + $0x130] sm:$0xff]  ;;  %v460_v54 = vld [vmem:[%s6875_s29 + $0xc8] sm:$0xff] }
  0x1e   : > { %5549 = vmatprep.subr.bf16.mxu1 %v6922_v37  ;;  %v474_v52 = vld [vmem:[%s6875_s29 + $0x138] sm:$0xff]  ;;  %v491_v55 = vld [vmem:[%s6875_s29 + $0x1c0] sm:$0xff]  ;;  %v492_v56 = vld [vmem:[%s6875_s29 + $0x1c8] sm:$0xff]  ;;  %v6952_v57 = vpack.c.bf16 %v442_v49, %v441_v48  ;;  %v6958_v59 = vpack.c.bf16 %v460_v54, %v459_v53 }
  0x1f   : > { %v6956_v58 = vpack.c.bf16 %v474_v52, %v473_v51  ;;  %v443_v60 = vld [vmem:[%s6875_s29 + $0x40] sm:$0xff]  ;;  %v444_v61 = vld [vmem:[%s6875_s29 + $0x48] sm:$0xff]  ;;  %v6964_v63 = vpack.c.bf16 %v492_v56, %v491_v55  ;;  %v461_v5 = vld [vmem:[%s6875_s29 + $0xd0] sm:$0xff] }
  0x20   : > { %5486 = vmatpush3.bf16.msra.mxu0 %v6928_v41  ;;  %v475_v62 = vld [vmem:[%s6875_s29 + $0x140] sm:$0xff]  ;;  %v476_v3 = vld [vmem:[%s6875_s29 + $0x148] sm:$0xff]  ;;  %v462_v6 = vld [vmem:[%s6875_s29 + $0xd8] sm:$0xff]  ;;  %v6972_v9 = vpack.c.bf16 %v444_v61, %v443_v60 }
  0x21   : > { %5550 = vmatpush3.bf16.msra.mxu1 %v6935_v45  ;;  %5487 = vmatprep.subr.bf16.mxu0 %v6937_v46  ;;  %v493_v7 = vld [vmem:[%s6875_s29 + $0x1d0] sm:$0xff]  ;;  %v494_v8 = vld [vmem:[%s6875_s29 + $0x1d8] sm:$0xff]  ;;  %v6976_v11 = vpack.c.bf16 %v476_v3, %v475_v62  ;;  %v6978_v12 = vpack.c.bf16 %v462_v6, %v461_v5  ;;  %v463_v21 = vld [vmem:[%s6875_s29 + $0xe0] sm:$0xff] }
  0x22   : > { %5551 = vmatprep.subr.bf16.mxu1 %v6943_v50  ;;  %v445_v13 = vld [vmem:[%s6875_s29 + $0x50] sm:$0xff]  ;;  %v446_v16 = vld [vmem:[%s6875_s29 + $0x58] sm:$0xff]  ;;  %v6984_v18 = vpack.c.bf16 %v494_v8, %v493_v7  ;;  %v464_v22 = vld [vmem:[%s6875_s29 + $0xe8] sm:$0xff] }
  0x23   : > { %v477_v17 = vld [vmem:[%s6875_s29 + $0x150] sm:$0xff]  ;;  %v478_v20 = vld [vmem:[%s6875_s29 + $0x158] sm:$0xff]  ;;  %v495_v25 = vld [vmem:[%s6875_s29 + $0x1e0] sm:$0xff]  ;;  %v6992_v27 = vpack.c.bf16 %v446_v16, %v445_v13  ;;  %v6998_v30 = vpack.c.bf16 %v464_v22, %v463_v21  ;;  %v5220_v22 = vcombine.low %v6848_v0, %v6853_v1 }
  0x24   : > { %5488 = vmatpush3.bf16.msra.mxu0 %v6952_v57  ;;  %v496_v26 = vld [vmem:[%s6875_s29 + $0x1e8] sm:$0xff]  ;;  %v6996_v29 = vpack.c.bf16 %v478_v20, %v477_v17  ;;  %v447_v31 = vld [vmem:[%s6875_s29 + $0x60] sm:$0xff]  ;;  %v465_v39 = vld [vmem:[%s6875_s29 + $0xf0] sm:$0xff] }
  0x25   : > { %5552 = vmatpush3.bf16.msra.mxu1 %v6956_v58  ;;  %5489 = vmatprep.subr.bf16.mxu0 %v6958_v59  ;;  %v448_v34 = vld [vmem:[%s6875_s29 + $0x68] sm:$0xff]  ;;  %v479_v35 = vld [vmem:[%s6875_s29 + $0x160] sm:$0xff]  ;;  %v7004_v36 = vpack.c.bf16 %v496_v26, %v495_v25  ;;  %v466_v40 = vld [vmem:[%s6875_s29 + $0xf8] sm:$0xff] }
  0x26   : > { %5553 = vmatprep.subr.bf16.mxu1 %v6964_v63  ;;  %v480_v38 = vld [vmem:[%s6875_s29 + $0x168] sm:$0xff]  ;;  %v497_v42 = vld [vmem:[%s6875_s29 + $0x1f0] sm:$0xff]  ;;  %v498_v43 = vld [vmem:[%s6875_s29 + $0x1f8] sm:$0xff]  ;;  %v7012_v44 = vpack.c.bf16 %v448_v34, %v447_v31  ;;  %v7018_v48 = vpack.c.bf16 %v466_v40, %v465_v39  ;;  %v5222_v34 = vcombine.low %v6858_v2, %v6865_v4 }
  0x27   : > { %v7016_v47 = vpack.c.bf16 %v480_v38, %v479_v35  ;;  %v449_v49 = vld [vmem:[%s6875_s29 + $0x70] sm:$0xff]  ;;  %v450_v51 = vld [vmem:[%s6875_s29 + $0x78] sm:$0xff]  ;;  %v7024_v53 = vpack.c.bf16 %v498_v43, %v497_v42  ;;  %v515_v55 = vld [vmem:[%s6875_s29 + $0x280] sm:$0xff] }
  0x28   : > { %5490 = vmatpush3.bf16.msra.mxu0 %v6972_v9  ;;  %v481_v52 = vld [vmem:[%s6875_s29 + $0x170] sm:$0xff]  ;;  %v482_v54 = vld [vmem:[%s6875_s29 + $0x178] sm:$0xff]  ;;  %v516_v56 = vld [vmem:[%s6875_s29 + $0x288] sm:$0xff]  ;;  %v7032_v62 = vpack.c.bf16 %v450_v51, %v449_v49 }
  0x29   : > { %5554 = vmatpush3.bf16.msra.mxu1 %v6976_v11  ;;  %5491 = vmatprep.subr.bf16.mxu0 %v6978_v12  ;;  %v547_v60 = vld [vmem:[%s6875_s29 + $0x380] sm:$0xff]  ;;  %v548_v61 = vld [vmem:[%s6875_s29 + $0x388] sm:$0xff]  ;;  %v7041_v5 = vpack.c.bf16 %v482_v54, %v481_v52  ;;  %v7058_v13 = vpack.c.bf16 %v516_v56, %v515_v55  ;;  %v517_v26 = vld [vmem:[%s6875_s29 + $0x290] sm:$0xff] }
  0x2a   : > { %5555 = vmatprep.subr.bf16.mxu1 %v6984_v18  ;;  %v7037_v3 = vld [vmem:[%s10452_s1 + $0x80] sm:$0xff]  ;;  %v7051_v7 = vld [vmem:[%s10452_s1 + $0x88] sm:$0xff]  ;;  %v7061_v16 = vpack.c.bf16 %v548_v61, %v547_v60  ;;  %v518_v31 = vld [vmem:[%s6875_s29 + $0x298] sm:$0xff] }
  0x2b   : > { %v7046_v6 = vld [vmem:[%s10452_s1 + $0xc0] sm:$0xff]  ;;  %v7056_v8 = vld [vmem:[%s10452_s1 + $0xc8] sm:$0xff]  ;;  %v549_v38 = vld [vmem:[%s6875_s29 + $0x390] sm:$0xff]  ;;  %v7087_v4 = vpack.c.bf16 %v518_v31, %v517_v26 }
  0x2c   : > { %5492 = vmatpush3.bf16.msra.mxu0 %v6992_v27  ;;  %v499_v17 = vld [vmem:[%s6875_s29 + $0x200] sm:$0xff]  ;;  %v500_v20 = vld [vmem:[%s6875_s29 + $0x208] sm:$0xff]  ;;  %v5237_v35 = vcombine.high %v7037_v3, %v7046_v6  ;;  %v550_v39 = vld [vmem:[%s6875_s29 + $0x398] sm:$0xff]  ;;  %v5239_v0 = vcombine.high %v7051_v7, %v7056_v8 }
  0x2d   : > { %5556 = vmatpush3.bf16.msra.mxu1 %v6996_v29  ;;  %5493 = vmatprep.subr.bf16.mxu0 %v6998_v30  ;;  %v531_v21 = vld [vmem:[%s6875_s29 + $0x300] sm:$0xff]  ;;  %v532_v25 = vld [vmem:[%s6875_s29 + $0x308] sm:$0xff]  ;;  %v7082_v1 = vpack.c.bf16 %v500_v20, %v499_v17  ;;  %10589 = vst [vmem:[#allocation5_spill] sm:$0xff] %v7087_v4  ;;  %v501_v40 = vld [vmem:[%s6875_s29 + $0x210] sm:$0xff]  ;;  %v7092_v49 = vpack.c.bf16 %v550_v39, %v549_v38 }
  0x2e   : > { %5557 = vmatprep.subr.bf16.mxu1 %v7004_v36  ;;  %v7085_v2 = vpack.c.bf16 %v532_v25, %v531_v21  ;;  %v502_v42 = vld [vmem:[%s6875_s29 + $0x218] sm:$0xff]  ;;  %v533_v43 = vld [vmem:[%s6875_s29 + $0x310] sm:$0xff]  ;;  %v519_v52 = vld [vmem:[%s6875_s29 + $0x2a0] sm:$0xff] }
  0x2f   : > { %10590 = vst [vmem:[#allocation6_spill] sm:$0xff] %v7092_v49  ;;  %v534_v51 = vld [vmem:[%s6875_s29 + $0x318] sm:$0xff]  ;;  %v520_v54 = vld [vmem:[%s6875_s29 + $0x2a8] sm:$0xff]  ;;  %v7100_v55 = vld [vmem:[%s10452_s1 + $0x100] sm:$0xff]  ;;  %v7120_v21 = vpack.c.bf16 %v502_v42, %v501_v40  ;;  %v5238_v42 = vcombine.low %v7051_v7, %v7056_v8 }
  0x30   : > { %5494 = vmatpush3.bf16.msra.mxu0 %v7012_v44  ;;  %v551_v56 = vld [vmem:[%s6875_s29 + $0x3a0] sm:$0xff]  ;;  %v552_v60 = vld [vmem:[%s6875_s29 + $0x3a8] sm:$0xff]  ;;  %v7126_v25 = vpack.c.bf16 %v520_v54, %v519_v52  ;;  %v522_v40 = vld [vmem:[%s6875_s29 + $0x2b8] sm:$0xff] }
  0x31   : > { %5558 = vmatpush3.bf16.msra.mxu1 %v7016_v47  ;;  %5495 = vmatprep.subr.bf16.mxu0 %v7018_v48  ;;  %v7107_v61 = vld [vmem:[%s10452_s1 + $0x140] sm:$0xff]  ;;  %v7112_v17 = vld [vmem:[%s10452_s1 + $0x108] sm:$0xff]  ;;  %10591 = vst [vmem:[#allocation7_spill] sm:$0xff] %v7120_v21  ;;  %v7134_v38 = vpack.c.bf16 %v552_v60, %v551_v56  ;;  %v505_v54 = vld [vmem:[%s6875_s29 + $0x230] sm:$0xff] }
  0x32   : > { %5559 = vmatprep.subr.bf16.mxu1 %v7024_v53  ;;  %v7117_v20 = vld [vmem:[%s10452_s1 + $0x148] sm:$0xff]  ;;  %10593 = vst [vmem:[#allocation9_spill] sm:$0xff] %v7126_v25  ;;  %v503_v26 = vld [vmem:[%s6875_s29 + $0x220] sm:$0xff]  ;;  %v506_v56 = vld [vmem:[%s6875_s29 + $0x238] sm:$0xff] }
  0x33   : > { %v504_v31 = vld [vmem:[%s6875_s29 + $0x228] sm:$0xff]  ;;  %10594 = vst [vmem:[#allocation10_spill] sm:$0xff] %v7134_v38  ;;  %v537_v60 = vld [vmem:[%s6875_s29 + $0x330] sm:$0xff] }
  0x34   : > { %5496 = vmatpush3.bf16.msra.mxu0 %v7032_v62  ;;  %v536_v39 = vld [vmem:[%s6875_s29 + $0x328] sm:$0xff]  ;;  %v7148_v52 = vpack.c.bf16 %v504_v31, %v503_v26  ;;  %v538_v26 = vld [vmem:[%s6875_s29 + $0x338] sm:$0xff]  ;;  %v523_v31 = vld [vmem:[%s6875_s29 + $0x2c0] sm:$0xff] }
  0x35   : > { %5560 = vmatpush3.bf16.msra.mxu1 %v7041_v5  ;;  %5609 = vmatprep.subr.bf16.mxu0 %v7058_v13 }
  0x36   : > { %5673 = vmatprep.subr.bf16.mxu1 %v7061_v16  ;;  %10595 = vst [vmem:[#allocation11_spill] sm:$0xff] %v7148_v52 }
  0x37   : > { %1716 = vmatmul.mubr.bf16.vlgmr.msra.gmra.mrb[0].mxu0 %v5220_v22  ;;  %v7124_v22 = vpack.c.bf16 %v534_v51, %v533_v43  ;;  %v5253_v43 = vcombine.high %v7100_v55, %v7107_v61  ;;  %v553_v51 = vld [vmem:[%s6875_s29 + $0x3b0] sm:$0xff] }
  0x38   : > { %1813 = vmatmul.mubr.bf16.vlgmr.msra.gmra.mrb[0].mxu1 %v5222_v34  ;;  %1723 = vmatprep.mubr.bf16.mxu0 %v5237_v35  ;;  %v535_v34 = vld [vmem:[%s6875_s29 + $0x320] sm:$0xff]  ;;  %v5236_v35 = vcombine.low %v7037_v3, %v7046_v6  ;;  %v554_v3 = vld [vmem:[%s6875_s29 + $0x3b8] sm:$0xff]  ;;  %v5255_v6 = vcombine.high %v7112_v17, %v7117_v20 }
  0x39   : > { %1820 = vmatprep.mubr.bf16.mxu1 %v5239_v0  ;;  %5610 = vmatpush3.bf16.msra.mxu0 %v7082_v1  ;;  %10592 = vst [vmem:[#allocation8_spill] sm:$0xff] %v7124_v22  ;;  %v521_v0 = vld [vmem:[%s6875_s29 + $0x2b0] sm:$0xff]  ;;  %v7152_v7 = vpack.c.bf16 %v536_v39, %v535_v34  ;;  %v7168_v34 = vld [vmem:[%s10452_s1 + $0x180] sm:$0xff] }
  0x3a   : > { %5674 = vmatpush3.bf16.msra.mxu1 %v7085_v2  ;;  %5611 = vmatprep.subr.bf16.mxu0 %v7087_v4  ;;  %v7154_v8 = vpack.c.bf16 %v522_v40, %v521_v0  ;;  %v555_v39 = vld [vmem:[%s6875_s29 + $0x3c0] sm:$0xff]  ;;  %v556_v0 = vld [vmem:[%s6875_s29 + $0x3c8] sm:$0xff] }
  0x3b   : > { %5675 = vmatprep.subr.bf16.mxu1 %v7092_v49  ;;  %10596 = vst [vmem:[#allocation12_spill] sm:$0xff] %v7152_v7  ;;  %v7160_v49 = vpack.c.bf16 %v554_v3, %v553_v51  ;;  %v7180_v40 = vld [vmem:[%s10452_s1 + $0x188] sm:$0xff]  ;;  %v7192_v51 = vpack.c.bf16 %v538_v26, %v537_v60  ;;  %v557_v26 = vld [vmem:[%s6875_s29 + $0x3d0] sm:$0xff]  ;;  %v543_v4 = vld [vmem:[%s6875_s29 + $0x360] sm:$0xff] }
  0x3c   : > { %10597 = vst [vmem:[#allocation13_spill] sm:$0xff] %v7154_v8 }
  0x3d   : > { %5612 = vmatpush3.bf16.msra.mxu0 %v7120_v21  ;;  %10598 = vst [vmem:[#allocation14_spill] sm:$0xff] %v7160_v49  ;;  %v524_v21 = vld [vmem:[%s6875_s29 + $0x2c8] sm:$0xff]  ;;  %10600 = vst [vmem:[#allocation16_spill] sm:$0xff] %v7192_v51 }
  0x3e   : > { %5676 = vmatpush3.bf16.msra.mxu1 %v7124_v22  ;;  %5613 = vmatprep.subr.bf16.mxu0 %v7126_v25  ;;  %v7194_v3 = vpack.c.bf16 %v524_v21, %v523_v31  ;;  %v539_v25 = vld [vmem:[%s6875_s29 + $0x340] sm:$0xff]  ;;  %v5252_v22 = vcombine.low %v7100_v55, %v7107_v61  ;;  %v5254_v21 = vcombine.low %v7112_v17, %v7117_v20  ;;  %v558_v31 = vld [vmem:[%s6875_s29 + $0x3d8] sm:$0xff] }
  0x3f   : > { %1724 = vmatmul.mubr.bf16.gmra.mrb[4].mxu0 %v5236_v35  ;;  %5677 = vmatprep.subr.bf16.mxu1 %v7134_v38  ;;  %v7175_v35 = vld [vmem:[%s10452_s1 + $0x1c0] sm:$0xff]  ;;  %v508_v38 = vld [vmem:[%s6875_s29 + $0x248] sm:$0xff] }
  0x40   : > { %1821 = vmatmul.mubr.bf16.gmra.mrb[4].mxu1 %v5238_v42  ;;  %1731 = vmatprep.mubr.bf16.mxu0 %v5253_v43  ;;  %v7185_v42 = vld [vmem:[%s10452_s1 + $0x1c8] sm:$0xff]  ;;  %v7188_v43 = vpack.c.bf16 %v506_v56, %v505_v54  ;;  %10601 = vst [vmem:[#allocation17_spill] sm:$0xff] %v7194_v3  ;;  %v7202_v54 = vpack.c.bf16 %v556_v0, %v555_v39  ;;  %v509_v39 = vld [vmem:[%s6875_s29 + $0x250] sm:$0xff]  ;;  %v510_v0 = vld [vmem:[%s6875_s29 + $0x258] sm:$0xff] }
  0x41   : > { %1828 = vmatprep.mubr.bf16.mxu1 %v5255_v6  ;;  %5614 = vmatpush3.bf16.msra.mxu0 %v7148_v52  ;;  %v507_v6 = vld [vmem:[%s6875_s29 + $0x240] sm:$0xff]  ;;  %v540_v56 = vld [vmem:[%s6875_s29 + $0x348] sm:$0xff]  ;;  %v5269_v60 = vcombine.high %v7168_v34, %v7175_v35  ;;  %v5271_v55 = vcombine.high %v7180_v40, %v7185_v42 }
  0x42   : > { %10599 = vst [vmem:[#allocation15_spill] sm:$0xff] %v7188_v43  ;;  %5678 = vmatpush3.bf16.msra.mxu1 %v7152_v7  ;;  %5615 = vmatprep.subr.bf16.mxu0 %v7154_v8  ;;  %10602 = vst [vmem:[#allocation18_spill] sm:$0xff] %v7202_v54  ;;  %v525_v7 = vld [vmem:[%s6875_s29 + $0x2d0] sm:$0xff]  ;;  %v526_v8 = vld [vmem:[%s6875_s29 + $0x2d8] sm:$0xff]  ;;  %v7216_v61 = vpack.c.bf16 %v508_v38, %v507_v6  ;;  %v7220_v17 = vpack.c.bf16 %v540_v56, %v539_v25 }
  0x43   : > { %5679 = vmatprep.subr.bf16.mxu1 %v7160_v49  ;;  %v7222_v20 = vpack.c.bf16 %v526_v8, %v525_v7  ;;  %v541_v49 = vld [vmem:[%s6875_s29 + $0x350] sm:$0xff]  ;;  %v7235_v38 = vld [vmem:[%s10452_s1 + $0x240] sm:$0xff]  ;;  %v7238_v25 = vpack.c.bf16 %v558_v31, %v557_v26  ;;  %v542_v7 = vld [vmem:[%s6875_s29 + $0x358] sm:$0xff] }
  0x44   : > { %10603 = vst [vmem:[#allocation19_spill] sm:$0xff] %v7216_v61  ;;  %10604 = vst [vmem:[#allocation20_spill] sm:$0xff] %v7220_v17  ;;  %v527_v8 = vld [vmem:[%s6875_s29 + $0x2e0] sm:$0xff]  ;;  %v528_v6 = vld [vmem:[%s6875_s29 + $0x2e8] sm:$0xff] }
  0x45   : > { %5616 = vmatpush3.bf16.msra.mxu0 %v7188_v43  ;;  %10605 = vst [vmem:[#allocation21_spill] sm:$0xff] %v7222_v20  ;;  %v7230_v43 = vld [vmem:[%s10452_s1 + $0x200] sm:$0xff]  ;;  %10606 = vst [vmem:[#allocation22_spill] sm:$0xff] %v7238_v25  ;;  %v560_v56 = vld [vmem:[%s6875_s29 + $0x3e8] sm:$0xff] }
  0x46   : > { %5680 = vmatpush3.bf16.msra.mxu1 %v7192_v51  ;;  %5617 = vmatprep.subr.bf16.mxu0 %v7194_v3  ;;  %v947_v3 = vld [vmem:[%s10453_s2] sm:$0xff]  ;;  %v7251_v26 = vld [vmem:[%s10452_s1 + $0x208] sm:$0xff]  ;;  %v949_v31 = vld [vmem:[%s10453_s2 + $0x10] sm:$0xff] }
  0x47   : > { %1732 = vmatmul.mubr.bf16.gmra.mrb[8].mxu0 %v5252_v22  ;;  %5681 = vmatprep.subr.bf16.mxu1 %v7202_v54  ;;  %v559_v22 = vld [vmem:[%s6875_s29 + $0x3e0] sm:$0xff]  ;;  %v7268_v54 = vpack.c.bf16 %v528_v6, %v527_v8  ;;  %v512_v52 = vld [vmem:[%s6875_s29 + $0x268] sm:$0xff]  ;;  %v561_v8 = vld [vmem:[%s6875_s29 + $0x3f0] sm:$0xff] }
  0x48   : > { %1829 = vmatmul.mubr.bf16.gmra.mrb[8].mxu1 %v5254_v21  ;;  %1739 = vmatprep.mubr.bf16.mxu0 %v5269_v60  ;;  %v7256_v21 = vld [vmem:[%s10452_s1 + $0x248] sm:$0xff]  ;;  %v7259_v60 = vpack.c.bf16 %v510_v0, %v509_v39  ;;  %v511_v51 = vld [vmem:[%s6875_s29 + $0x260] sm:$0xff]  ;;  %v5268_v39 = vcombine.low %v7168_v34, %v7175_v35  ;;  %v7276_v0 = vpack.c.bf16 %v560_v56, %v559_v22  ;;  %v562_v34 = vld [vmem:[%s6875_s29 + $0x3f8] sm:$0xff] }
  0x49   : > { %1836 = vmatprep.mubr.bf16.mxu1 %v5271_v55  ;;  %5618 = vmatpush3.bf16.msra.mxu0 %v7216_v61  ;;  %v7266_v55 = vpack.c.bf16 %v542_v7, %v541_v49  ;;  %10609 = vst [vmem:[#allocation25_spill] sm:$0xff] %v7268_v54  ;;  %v544_v61 = vld [vmem:[%s6875_s29 + $0x368] sm:$0xff]  ;;  %v5270_v49 = vcombine.low %v7180_v40, %v7185_v42  ;;  %v514_v22 = vld [vmem:[%s6875_s29 + $0x278] sm:$0xff]  ;;  %v545_v56 = vld [vmem:[%s6875_s29 + $0x370] sm:$0xff] }
  0x4a   : > { %10607 = vst [vmem:[#allocation23_spill] sm:$0xff] %v7259_v60  ;;  %5682 = vmatpush3.bf16.msra.mxu1 %v7220_v17  ;;  %5619 = vmatprep.subr.bf16.mxu0 %v7222_v20  ;;  %10610 = vst [vmem:[#allocation26_spill] sm:$0xff] %v7276_v0  ;;  %v529_v17 = vld [vmem:[%s6875_s29 + $0x2f0] sm:$0xff]  ;;  %v530_v20 = vld [vmem:[%s6875_s29 + $0x2f8] sm:$0xff]  ;;  %v5285_v7 = vcombine.high %v7230_v43, %v7235_v38  ;;  %v5287_v35 = vcombine.high %v7251_v26, %v7256_v21 }
  0x4b   : > { %10608 = vst [vmem:[#allocation24_spill] sm:$0xff] %v7266_v55  ;;  %5683 = vmatprep.subr.bf16.mxu1 %v7238_v25  ;;  %965 = vperm.xlu0 %6667, %v947_v3   ;;  %v7290_v6 = vpack.c.bf16 %v512_v52, %v511_v51  ;;  %v7294_v40 = vpack.c.bf16 %v544_v61, %v543_v4  ;;  %v513_v3 = vld [vmem:[%s6875_s29 + $0x270] sm:$0xff]  ;;  %v546_v52 = vld [vmem:[%s6875_s29 + $0x378] sm:$0xff]  ;;  %v579_v51 = vld [vmem:[%s6875_s29 + $0x480] sm:$0xff] }
  0x4c   : > { %975 = vperm.xlu1 %6668, %v949_v31   ;;  %v7296_v42 = vpack.c.bf16 %v530_v20, %v529_v17  ;;  %v7302_v31 = vpack.c.bf16 %v562_v34, %v561_v8  ;;  %v948_v4 = vld [vmem:[%s10453_s2 + $0x8] sm:$0xff]  ;;  %v611_v61 = vld [vmem:[%s6875_s29 + $0x580] sm:$0xff]  ;;  %v7319_v8 = vpack.c.bf16 %v514_v22, %v513_v3  ;;  %v5284_v22 = vcombine.low %v7230_v43, %v7235_v38 }
  0x4d   : > { %5620 = vmatpush3.bf16.msra.mxu0 %v7259_v60  ;;  %10611 = vst [vmem:[#allocation27_spill] sm:$0xff] %v7290_v6  ;;  %10612 = vst [vmem:[#allocation28_spill] sm:$0xff] %v7294_v40  ;;  %v580_v60 = vld [vmem:[%s6875_s29 + $0x488] sm:$0xff]  ;;  %v899_v20 = vld [vmem:[%s10452_s1 + $0x280] sm:$0xff] }
  0x4e   : > { %5684 = vmatpush3.bf16.msra.mxu1 %v7266_v55  ;;  %5621 = vmatprep.subr.bf16.mxu0 %v7268_v54  ;;  %10613 = vst [vmem:[#allocation29_spill] sm:$0xff] %v7296_v42  ;;  %10614 = vst [vmem:[#allocation30_spill] sm:$0xff] %v7302_v31  ;;  %v612_v17 = vld [vmem:[%s6875_s29 + $0x588] sm:$0xff]  ;;  %v7334_v3 = vpack.c.bf16 %v580_v60, %v579_v51  ;;  %v951_v43 = vld [vmem:[%s10453_s2 + $0x20] sm:$0xff] }
  0x4f   : > { %1740 = vmatmul.mubr.bf16.gmra.mrb[12].mxu0 %v5268_v39  ;;  %5685 = vmatprep.subr.bf16.mxu1 %v7276_v0  ;;  %v907_v39 = vld [vmem:[%s10452_s1 + $0x2c0] sm:$0xff]  ;;  %10615 = vst [vmem:[#allocation31_spill] sm:$0xff] %v7319_v8  ;;  %v908_v34 = vld [vmem:[%s10452_s1 + $0x2c8] sm:$0xff]  ;;  %v5286_v0 = vcombine.low %v7251_v26, %v7256_v21 }
  0x50   : > { %1837 = vmatmul.mubr.bf16.gmra.mrb[12].mxu1 %v5270_v49  ;;  %1747 = vmatprep.mubr.bf16.mxu0 %v5285_v7  ;;  %v950_v49 = vld [vmem:[%s10453_s2 + $0x18] sm:$0xff]  ;;  %v900_v7 = vld [vmem:[%s10452_s1 + $0x288] sm:$0xff]  ;;  %10617 = vst [vmem:[#allocation33_spill] sm:$0xff] %v7334_v3  ;;  %v5301_v54 = vcombine.high %v899_v20, %v907_v39  ;;  %v915_v26 = vld [vmem:[%s10452_s1 + $0x300] sm:$0xff] }
  0x51   : > { %1844 = vmatprep.mubr.bf16.mxu1 %v5287_v35  ;;  %5622 = vmatpush3.bf16.msra.mxu0 %v7290_v6  ;;  %v7332_v35 = vpack.c.bf16 %v546_v52, %v545_v56  ;;  %v7339_v6 = vpack.c.bf16 %v612_v17, %v611_v61  ;;  %v952_v38 = vld [vmem:[%s10453_s2 + $0x28] sm:$0xff]  ;;  %v923_v21 = vld [vmem:[%s10452_s1 + $0x340] sm:$0xff]  ;;  %v5302_v52 = vcombine.low %v900_v7, %v908_v34 }
  0x52   : > { %5686 = vmatpush3.bf16.msra.mxu1 %v7294_v40  ;;  %5623 = vmatprep.subr.bf16.mxu0 %v7296_v42  ;;  %v5303_v40 = vcombine.high %v900_v7, %v908_v34  ;;  %v916_v60 = vld [vmem:[%s10452_s1 + $0x308] sm:$0xff]  ;;  %v5317_v51 = vcombine.high %v915_v26, %v923_v21  ;;  %v955_v61 = vld [vmem:[%s10453_s2 + $0x40] sm:$0xff]  ;;  %v5316_v34 = vcombine.low %v915_v26, %v923_v21  ;;  %v821_v21 = vld [vmem:[%s10452_s1 + $0x10] sm:$0xff] }
  0x53   : > { %10616 = vst [vmem:[#allocation32_spill] sm:$0xff] %v7332_v35  ;;  %5687 = vmatprep.subr.bf16.mxu1 %v7302_v31  ;;  %970 = vperm.xlu0 %6667, %v948_v4   ;;  %10618 = vst [vmem:[#allocation34_spill] sm:$0xff] %v7339_v6  ;;  %v924_v56 = vld [vmem:[%s10452_s1 + $0x348] sm:$0xff]  ;;  %v931_v17 = vld [vmem:[%s10452_s1 + $0x380] sm:$0xff] }
  0x54   : > { %980 = vperm.xlu1 %6668, %v950_v49   ;;  %v5319_v4 = vcombine.high %v916_v60, %v924_v56  ;;  %v940_v49 = vld [vmem:[%s10452_s1 + $0x3c8] sm:$0xff]  ;;  %v959_v26 = vld [vmem:[%s10453_s2 + $0x60] sm:$0xff] }
  0x55   : > { %5624 = vmatpush3.bf16.msra.mxu0 %v7319_v8  ;;  %v956_v7 = vld [vmem:[%s10453_s2 + $0x48] sm:$0xff]  ;;  %v597_v8 = vld [vmem:[%s6875_s29 + $0x510] sm:$0xff]  ;;  %v583_v31 = vld [vmem:[%s6875_s29 + $0x4a0] sm:$0xff] }
  0x56   : > { %5688 = vmatpush3.bf16.msra.mxu1 %v7332_v35  ;;  %5737 = vmatprep.subr.bf16.mxu0 %v7334_v3  ;;  %v565_v3 = vld [vmem:[%s6875_s29 + $0x410] sm:$0xff]  ;;  %v566_v35 = vld [vmem:[%s6875_s29 + $0x418] sm:$0xff]  ;;  %v584_v42 = vld [vmem:[%s6875_s29 + $0x4a8] sm:$0xff] }
  0x57   : > { %1748 = vmatmul.mubr.bf16.gmra.mrb[16].mxu0 %v5284_v22  ;;  %5801 = vmatprep.subr.bf16.mxu1 %v7339_v6  ;;  %v5318_v22 = vcombine.low %v916_v60, %v924_v56  ;;  %v829_v60 = vld [vmem:[%s10452_s1 + $0x50] sm:$0xff]  ;;  %v822_v56 = vld [vmem:[%s10452_s1 + $0x18] sm:$0xff]  ;;  %v676_v25 = vld [vmem:[%s6875_s29 + $0x788] sm:$0xff] }
  0x58   : > { %1845 = vmatmul.mubr.bf16.gmra.mrb[16].mxu1 %v5286_v0  ;;  %1755 = vmatprep.mubr.bf16.mxu0 %v5301_v54  ;;  %v953_v54 = vld [vmem:[%s10453_s2 + $0x30] sm:$0xff]  ;;  %v5300_v0 = vcombine.low %v899_v20, %v907_v39  ;;  %v939_v20 = vld [vmem:[%s10452_s1 + $0x3c0] sm:$0xff]  ;;  %v932_v39 = vld [vmem:[%s10452_s1 + $0x388] sm:$0xff] }
  0x59   : > { %1852 = vmatprep.mubr.bf16.mxu1 %v5303_v40  ;;  %985 = vperm.xlu0 %6667, %v951_v43   ;;  %v954_v40 = vld [vmem:[%s10453_s2 + $0x38] sm:$0xff]  ;;  %v5333_v43 = vcombine.high %v931_v17, %v939_v20 }
  0x5a   : > { %990 = vperm.xlu1 %6668, %v952_v38   ;;  %v5335_v38 = vcombine.high %v932_v39, %v940_v49 }
  0x5d   : > { %995 = vperm.xlu0 %6667, %v953_v54   ;;  %v957_v54 = vld [vmem:[%s10453_s2 + $0x50] sm:$0xff] }
  0x5e   : > { %1000 = vperm.xlu1 %6668, %v954_v40   ;;  %v830_v40 = vld [vmem:[%s10452_s1 + $0x58] sm:$0xff] }
  0x5f   : > { %1756 = vmatmul.mubr.bf16.gmra.mrb[20].mxu0 %v5300_v0  ;;  %v958_v0 = vld [vmem:[%s10453_s2 + $0x58] sm:$0xff] }
  0x60   : > { %1853 = vmatmul.mubr.bf16.gmra.mrb[20].mxu1 %v5302_v52  ;;  %1763 = vmatprep.mubr.bf16.mxu0 %v5317_v51  ;;  %v960_v52 = vld [vmem:[%s10453_s2 + $0x68] sm:$0xff]  ;;  %v5332_v51 = vcombine.low %v931_v17, %v939_v20  ;;  %v7422_v17 = vld [vmem:[%s10452_s1 + $0x90] sm:$0xff] }
  0x61   : > { %1860 = vmatprep.mubr.bf16.mxu1 %v5319_v4  ;;  %1005 = vperm.xlu0 %6667, %v955_v61   ;;  %v5334_v4 = vcombine.low %v932_v39, %v940_v49  ;;  %v5225_v61 = vcombine.high %v821_v21, %v829_v60  ;;  %v7427_v20 = vld [vmem:[%s10452_s1 + $0xd0] sm:$0xff]  ;;  %v7432_v39 = vld [vmem:[%s10452_s1 + $0x98] sm:$0xff] }
  0x62   : > { %1010 = vperm.xlu1 %6668, %v956_v7   ;;  %v961_v7 = vld [vmem:[%s10453_s2 + $0x70] sm:$0xff]  ;;  %v7437_v49 = vld [vmem:[%s10452_s1 + $0xd8] sm:$0xff]  ;;  %v5240_v55 = vcombine.low %v7422_v17, %v7427_v20 }
  0x65   : > { %1015 = vperm.xlu0 %6667, %v957_v54   ;;  %v595_v54 = vld [vmem:[%s6875_s29 + $0x500] sm:$0xff] }
  0x66   : > { %1020 = vperm.xlu1 %6668, %v958_v0   ;;  %v5224_v0 = vcombine.low %v821_v21, %v829_v60 }
  0x67   : > { %1764 = vmatmul.mubr.bf16.gmra.mrb[24].mxu0 %v5316_v34  ;;  %v5227_v34 = vcombine.high %v822_v56, %v830_v40 }
  0x68   : > { %1861 = vmatmul.mubr.bf16.gmra.mrb[24].mxu1 %v5318_v22  ;;  %1771 = vmatprep.mubr.bf16.mxu0 %v5333_v43  ;;  %v962_v22 = vld [vmem:[%s10453_s2 + $0x78] sm:$0xff]  ;;  %v563_v43 = vld [vmem:[%s6875_s29 + $0x400] sm:$0xff] }
  0x69   : > { %1868 = vmatprep.mubr.bf16.mxu1 %v5335_v38  ;;  %1025 = vperm.xlu0 %6667, %v959_v26   ;;  %v564_v38 = vld [vmem:[%s6875_s29 + $0x408] sm:$0xff] }
  0x6a   : > { %1030 = vperm.xlu1 %6668, %v960_v52   ;;  %v596_v26 = vld [vmem:[%s6875_s29 + $0x508] sm:$0xff]  ;;  %v581_v52 = vld [vmem:[%s6875_s29 + $0x490] sm:$0xff]  ;;  %v7451_v6 = vpack.c.bf16 %v564_v38, %v563_v43  ;;  %v615_v38 = vld [vmem:[%s6875_s29 + $0x5a0] sm:$0xff] }
  0x6b   : > { %v7453_v21 = vpack.c.bf16 %v596_v26, %v595_v54  ;;  %v7468_v43 = vld [vmem:[%s10452_s1 + $0x110] sm:$0xff]  ;;  %v616_v54 = vld [vmem:[%s6875_s29 + $0x5a8] sm:$0xff]  ;;  %v7480_v26 = vld [vmem:[%s10452_s1 + $0x118] sm:$0xff] }
  0x6c   : > { %10619 = vst [vmem:[#allocation35_spill] sm:$0xff] %v7451_v6 }
  0x6d   : > { %1035 = vperm.xlu0 %6667, %v961_v7   ;;  %v613_v7 = vld [vmem:[%s6875_s29 + $0x590] sm:$0xff]  ;;  %10620 = vst [vmem:[#allocation36_spill] sm:$0xff] %v7453_v21 }
  0x6e   : > { %1040 = vperm.xlu1 %6668, %v962_v22   ;;  %v5243_v22 = vcombine.high %v7432_v39, %v7437_v49 }
  0x6f   : > { %1772 = vmatmul.mubr.bf16.gmra.mrb[28].mxu0 %v5332_v51  ;;  %v582_v51 = vld [vmem:[%s6875_s29 + $0x498] sm:$0xff] }
  0x70   : > { %1869 = vmatmul.mubr.bf16.gmra.mrb[28].mxu1 %v5334_v4  ;;  %1909 = vmatprep.mubr.bf16.mxu0 %v5225_v61  ;;  %v5226_v4 = vcombine.low %v822_v56, %v830_v40  ;;  %v5241_v61 = vcombine.high %v7422_v17, %v7427_v20  ;;  %v7455_v60 = vpack.c.bf16 %v582_v51, %v581_v52  ;;  %v598_v40 = vld [vmem:[%s6875_s29 + $0x518] sm:$0xff] }
  0x71   : > { %2006 = vmatprep.mubr.bf16.mxu1 %v5227_v34  ;;  %v614_v34 = vld [vmem:[%s6875_s29 + $0x598] sm:$0xff]  ;;  %v7488_v51 = vpack.c.bf16 %v566_v35, %v565_v3  ;;  %v7502_v35 = vpack.c.bf16 %v616_v54, %v615_v38  ;;  %v600_v3 = vld [vmem:[%s6875_s29 + $0x528] sm:$0xff]  ;;  %v569_v38 = vld [vmem:[%s6875_s29 + $0x430] sm:$0xff] }
  0x72   : > { %10621 = vst [vmem:[#allocation37_spill] sm:$0xff] %v7455_v60  ;;  %v7460_v56 = vpack.c.bf16 %v614_v34, %v613_v7  ;;  %v7485_v52 = vld [vmem:[%s10452_s1 + $0x158] sm:$0xff]  ;;  %v567_v7 = vld [vmem:[%s6875_s29 + $0x420] sm:$0xff]  ;;  %v568_v34 = vld [vmem:[%s6875_s29 + $0x428] sm:$0xff] }
  0x73   : > { %10623 = vst [vmem:[#allocation39_spill] sm:$0xff] %v7488_v51  ;;  %10626 = vst [vmem:[#allocation42_spill] sm:$0xff] %v7502_v35  ;;  %v618_v17 = vld [vmem:[%s6875_s29 + $0x5b8] sm:$0xff]  ;;  %v5259_v20 = vcombine.high %v7480_v26, %v7485_v52 }
  0x74   : > { %10622 = vst [vmem:[#allocation38_spill] sm:$0xff] %v7460_v56  ;;  %v570_v54 = vld [vmem:[%s6875_s29 + $0x438] sm:$0xff] }
  0x77   : > { %1910 = vmatmul.mubr.bf16.vlgmr.msra.gmra.mrb[32].mxu0 %v5224_v0  ;;  %v7475_v0 = vld [vmem:[%s10452_s1 + $0x150] sm:$0xff] }
  0x78   : > { %2007 = vmatmul.mubr.bf16.vlgmr.msra.gmra.mrb[32].mxu1 %v5226_v4  ;;  %1917 = vmatprep.mubr.bf16.mxu0 %v5241_v61  ;;  %v7492_v4 = vpack.c.bf16 %v598_v40, %v597_v8  ;;  %v7494_v61 = vpack.c.bf16 %v584_v42, %v583_v31  ;;  %v5242_v42 = vcombine.low %v7432_v39, %v7437_v49  ;;  %v617_v8 = vld [vmem:[%s6875_s29 + $0x5b0] sm:$0xff] }
  0x79   : > { %2014 = vmatprep.mubr.bf16.mxu1 %v5243_v22  ;;  %5738 = vmatpush3.bf16.msra.mxu0 %v7451_v6  ;;  %v599_v22 = vld [vmem:[%s6875_s29 + $0x520] sm:$0xff]  ;;  %v5257_v31 = vcombine.high %v7468_v43, %v7475_v0  ;;  %v7516_v40 = vpack.c.bf16 %v568_v34, %v567_v7  ;;  %v7528_v6 = vpack.c.bf16 %v618_v17, %v617_v8  ;;  %v602_v7 = vld [vmem:[%s6875_s29 + $0x538] sm:$0xff] }
  0x7a   : > { %5802 = vmatpush3.bf16.msra.mxu1 %v7453_v21  ;;  %5739 = vmatprep.subr.bf16.mxu0 %v7455_v60  ;;  %10624 = vst [vmem:[#allocation40_spill] sm:$0xff] %v7492_v4  ;;  %10625 = vst [vmem:[#allocation41_spill] sm:$0xff] %v7494_v61  ;;  %v585_v21 = vld [vmem:[%s6875_s29 + $0x4b0] sm:$0xff]  ;;  %v586_v60 = vld [vmem:[%s6875_s29 + $0x4b8] sm:$0xff]  ;;  %v7520_v39 = vpack.c.bf16 %v600_v3, %v599_v22 }
  0x7b   : > { %5803 = vmatprep.subr.bf16.mxu1 %v7460_v56  ;;  %10627 = vst [vmem:[#allocation43_spill] sm:$0xff] %v7516_v40  ;;  %v7522_v49 = vpack.c.bf16 %v586_v60, %v585_v21  ;;  %v601_v56 = vld [vmem:[%s6875_s29 + $0x530] sm:$0xff]  ;;  %10630 = vst [vmem:[#allocation46_spill] sm:$0xff] %v7528_v6  ;;  %v587_v34 = vld [vmem:[%s6875_s29 + $0x4c0] sm:$0xff] }
  0x7c   : > { %10628 = vst [vmem:[#allocation44_spill] sm:$0xff] %v7520_v39  ;;  %v7536_v21 = vld [vmem:[%s10452_s1 + $0x190] sm:$0xff]  ;;  %v619_v60 = vld [vmem:[%s6875_s29 + $0x5c0] sm:$0xff]  ;;  %v620_v22 = vld [vmem:[%s6875_s29 + $0x5c8] sm:$0xff]  ;;  %v7560_v8 = vpack.c.bf16 %v602_v7, %v601_v56  ;;  %v5258_v56 = vcombine.low %v7480_v26, %v7485_v52 }
  0x7d   : > { %5740 = vmatpush3.bf16.msra.mxu0 %v7488_v51  ;;  %10629 = vst [vmem:[#allocation45_spill] sm:$0xff] %v7522_v49  ;;  %v588_v51 = vld [vmem:[%s6875_s29 + $0x4c8] sm:$0xff]  ;;  %v7548_v3 = vld [vmem:[%s10452_s1 + $0x198] sm:$0xff]  ;;  %v621_v7 = vld [vmem:[%s6875_s29 + $0x5d0] sm:$0xff] }
  0x7e   : > { %5804 = vmatpush3.bf16.msra.mxu1 %v7492_v4  ;;  %5741 = vmatprep.subr.bf16.mxu0 %v7494_v61  ;;  %10632 = vst [vmem:[#allocation48_spill] sm:$0xff] %v7560_v8  ;;  %v7562_v17 = vpack.c.bf16 %v588_v51, %v587_v34  ;;  %v603_v61 = vld [vmem:[%s6875_s29 + $0x540] sm:$0xff]  ;;  %v5256_v4 = vcombine.low %v7468_v43, %v7475_v0  ;;  %v622_v43 = vld [vmem:[%s6875_s29 + $0x5d8] sm:$0xff] }
  0x7f   : > { %1918 = vmatmul.mubr.bf16.gmra.mrb[36].mxu0 %v5240_v55  ;;  %5805 = vmatprep.subr.bf16.mxu1 %v7502_v35  ;;  %v7543_v55 = vld [vmem:[%s10452_s1 + $0x1d0] sm:$0xff]  ;;  %v572_v35 = vld [vmem:[%s6875_s29 + $0x448] sm:$0xff] }
  0x80   : > { %2015 = vmatmul.mubr.bf16.gmra.mrb[36].mxu1 %v5242_v42  ;;  %1925 = vmatprep.mubr.bf16.mxu0 %v5257_v31  ;;  %v7553_v42 = vld [vmem:[%s10452_s1 + $0x1d8] sm:$0xff]  ;;  %v7556_v31 = vpack.c.bf16 %v570_v54, %v569_v38  ;;  %10633 = vst [vmem:[#allocation49_spill] sm:$0xff] %v7562_v17  ;;  %v7570_v38 = vpack.c.bf16 %v620_v22, %v619_v60  ;;  %v604_v54 = vld [vmem:[%s6875_s29 + $0x548] sm:$0xff]  ;;  %v573_v60 = vld [vmem:[%s6875_s29 + $0x450] sm:$0xff] }
  0x81   : > { %2022 = vmatprep.mubr.bf16.mxu1 %v5259_v20  ;;  %5742 = vmatpush3.bf16.msra.mxu0 %v7516_v40  ;;  %v571_v20 = vld [vmem:[%s6875_s29 + $0x440] sm:$0xff]  ;;  %v5273_v51 = vcombine.high %v7536_v21, %v7543_v55  ;;  %v5275_v0 = vcombine.high %v7548_v3, %v7553_v42  ;;  %v7588_v26 = vpack.c.bf16 %v604_v54, %v603_v61  ;;  %v574_v22 = vld [vmem:[%s6875_s29 + $0x458] sm:$0xff]  ;;  %v7604_v61 = vld [vmem:[%s10452_s1 + $0x210] sm:$0xff] }
  0x82   : > { %10631 = vst [vmem:[#allocation47_spill] sm:$0xff] %v7556_v31  ;;  %5806 = vmatpush3.bf16.msra.mxu1 %v7520_v39  ;;  %5743 = vmatprep.subr.bf16.mxu0 %v7522_v49  ;;  %10634 = vst [vmem:[#allocation50_spill] sm:$0xff] %v7570_v38  ;;  %v589_v39 = vld [vmem:[%s6875_s29 + $0x4d0] sm:$0xff]  ;;  %v590_v49 = vld [vmem:[%s6875_s29 + $0x4d8] sm:$0xff]  ;;  %v7584_v34 = vpack.c.bf16 %v572_v35, %v571_v20  ;;  %v7596_v40 = vpack.c.bf16 %v622_v43, %v621_v7 }
  0x83   : > { %5807 = vmatprep.subr.bf16.mxu1 %v7528_v6  ;;  %10636 = vst [vmem:[#allocation52_spill] sm:$0xff] %v7588_v26  ;;  %v7590_v52 = vpack.c.bf16 %v590_v49, %v589_v39  ;;  %v605_v6 = vld [vmem:[%s6875_s29 + $0x550] sm:$0xff]  ;;  %v606_v35 = vld [vmem:[%s6875_s29 + $0x558] sm:$0xff]  ;;  %v591_v20 = vld [vmem:[%s6875_s29 + $0x4e0] sm:$0xff] }
  0x84   : > { %10635 = vst [vmem:[#allocation51_spill] sm:$0xff] %v7584_v34  ;;  %10638 = vst [vmem:[#allocation54_spill] sm:$0xff] %v7596_v40  ;;  %v623_v39 = vld [vmem:[%s6875_s29 + $0x5e0] sm:$0xff]  ;;  %v624_v49 = vld [vmem:[%s6875_s29 + $0x5e8] sm:$0xff]  ;;  %v7624_v7 = vpack.c.bf16 %v606_v35, %v605_v6  ;;  %v5274_v6 = vcombine.low %v7548_v3, %v7553_v42 }
  0x85   : > { %5744 = vmatpush3.bf16.msra.mxu0 %v7556_v31  ;;  %10637 = vst [vmem:[#allocation53_spill] sm:$0xff] %v7590_v52  ;;  %v592_v31 = vld [vmem:[%s6875_s29 + $0x4e8] sm:$0xff]  ;;  %v7614_v54 = vld [vmem:[%s10452_s1 + $0x218] sm:$0xff]  ;;  %v625_v35 = vld [vmem:[%s6875_s29 + $0x5f0] sm:$0xff] }
  0x86   : > { %5808 = vmatpush3.bf16.msra.mxu1 %v7560_v8  ;;  %5745 = vmatprep.subr.bf16.mxu0 %v7562_v17  ;;  %10640 = vst [vmem:[#allocation56_spill] sm:$0xff] %v7624_v7  ;;  %v7626_v43 = vpack.c.bf16 %v592_v31, %v591_v20  ;;  %v607_v17 = vld [vmem:[%s6875_s29 + $0x560] sm:$0xff]  ;;  %v5272_v8 = vcombine.low %v7536_v21, %v7543_v55  ;;  %v626_v20 = vld [vmem:[%s6875_s29 + $0x5f8] sm:$0xff] }
  0x87   : > { %1926 = vmatmul.mubr.bf16.gmra.mrb[40].mxu0 %v5256_v4  ;;  %5809 = vmatprep.subr.bf16.mxu1 %v7570_v38  ;;  %v893_v4 = vld [vmem:[%s10452_s1 + $0x250] sm:$0xff]  ;;  %v576_v38 = vld [vmem:[%s6875_s29 + $0x468] sm:$0xff] }
  0x88   : > { %2023 = vmatmul.mubr.bf16.gmra.mrb[40].mxu1 %v5258_v56  ;;  %1933 = vmatprep.mubr.bf16.mxu0 %v5273_v51  ;;  %v894_v56 = vld [vmem:[%s10452_s1 + $0x258] sm:$0xff]  ;;  %v7620_v51 = vpack.c.bf16 %v574_v22, %v573_v60  ;;  %10641 = vst [vmem:[#allocation57_spill] sm:$0xff] %v7626_v43  ;;  %v7634_v60 = vpack.c.bf16 %v624_v49, %v623_v39  ;;  %v608_v22 = vld [vmem:[%s6875_s29 + $0x568] sm:$0xff]  ;;  %v577_v39 = vld [vmem:[%s6875_s29 + $0x470] sm:$0xff] }
  0x89   : > { %2030 = vmatprep.mubr.bf16.mxu1 %v5275_v0  ;;  %5746 = vmatpush3.bf16.msra.mxu0 %v7584_v34  ;;  %v575_v0 = vld [vmem:[%s6875_s29 + $0x460] sm:$0xff]  ;;  %v5289_v31 = vcombine.high %v7604_v61, %v893_v4  ;;  %v5291_v21 = vcombine.high %v7614_v54, %v894_v56  ;;  %v7650_v3 = vpack.c.bf16 %v608_v22, %v607_v17  ;;  %v578_v49 = vld [vmem:[%s6875_s29 + $0x478] sm:$0xff]  ;;  %v901_v17 = vld [vmem:[%s10452_s1 + $0x290] sm:$0xff] }
  0x8a   : > { %10639 = vst [vmem:[#allocation55_spill] sm:$0xff] %v7620_v51  ;;  %5810 = vmatpush3.bf16.msra.mxu1 %v7588_v26  ;;  %5747 = vmatprep.subr.bf16.mxu0 %v7590_v52  ;;  %10642 = vst [vmem:[#allocation58_spill] sm:$0xff] %v7634_v60  ;;  %v593_v26 = vld [vmem:[%s6875_s29 + $0x4f0] sm:$0xff]  ;;  %v594_v52 = vld [vmem:[%s6875_s29 + $0x4f8] sm:$0xff]  ;;  %v7646_v55 = vpack.c.bf16 %v576_v38, %v575_v0  ;;  %v7658_v34 = vpack.c.bf16 %v626_v20, %v625_v35 }
  0x8b   : > { %5811 = vmatprep.subr.bf16.mxu1 %v7596_v40  ;;  %10644 = vst [vmem:[#allocation60_spill] sm:$0xff] %v7650_v3  ;;  %v7652_v42 = vpack.c.bf16 %v594_v52, %v593_v26  ;;  %v609_v40 = vld [vmem:[%s6875_s29 + $0x570] sm:$0xff]  ;;  %v610_v38 = vld [vmem:[%s6875_s29 + $0x578] sm:$0xff]  ;;  %v643_v0 = vld [vmem:[%s6875_s29 + $0x680] sm:$0xff]  ;;  %v7672_v26 = vpack.c.bf16 %v578_v49, %v577_v39  ;;  %v5288_v35 = vcombine.low %v7604_v61, %v893_v4 }
  0x8c   : > { %10643 = vst [vmem:[#allocation59_spill] sm:$0xff] %v7646_v55  ;;  %10646 = vst [vmem:[#allocation62_spill] sm:$0xff] %v7658_v34  ;;  %v902_v52 = vld [vmem:[%s10452_s1 + $0x298] sm:$0xff] }
  0x8d   : > { %5748 = vmatpush3.bf16.msra.mxu0 %v7620_v51  ;;  %10645 = vst [vmem:[#allocation61_spill] sm:$0xff] %v7652_v42  ;;  %v644_v51 = vld [vmem:[%s6875_s29 + $0x688] sm:$0xff]  ;;  %10647 = vst [vmem:[#allocation63_spill] sm:$0xff] %v7672_v26  ;;  %v910_v22 = vld [vmem:[%s10452_s1 + $0x2d8] sm:$0xff] }
  0x8e   : > { %5812 = vmatpush3.bf16.msra.mxu1 %v7624_v7  ;;  %5749 = vmatprep.subr.bf16.mxu0 %v7626_v43  ;;  %v675_v7 = vld [vmem:[%s6875_s29 + $0x780] sm:$0xff]  ;;  %v5307_v49 = vcombine.high %v902_v52, %v910_v22  ;;  %v918_v61 = vld [vmem:[%s10452_s1 + $0x318] sm:$0xff] }
  0x8f   : > { %1934 = vmatmul.mubr.bf16.gmra.mrb[44].mxu0 %v5272_v8  ;;  %5813 = vmatprep.subr.bf16.mxu1 %v7634_v60  ;;  %v909_v8 = vld [vmem:[%s10452_s1 + $0x2d0] sm:$0xff]  ;;  %v7688_v20 = vpack.c.bf16 %v676_v25, %v675_v7  ;;  %v926_v4 = vld [vmem:[%s10452_s1 + $0x358] sm:$0xff] }
  0x90   : > { %2031 = vmatmul.mubr.bf16.gmra.mrb[44].mxu1 %v5274_v6  ;;  %1941 = vmatprep.mubr.bf16.mxu0 %v5289_v31  ;;  %v7682_v6 = vpack.c.bf16 %v610_v38, %v609_v40  ;;  %v7684_v31 = vpack.c.bf16 %v644_v51, %v643_v0  ;;  %v5305_v39 = vcombine.high %v901_v17, %v909_v8  ;;  %v917_v25 = vld [vmem:[%s10452_s1 + $0x310] sm:$0xff] }
  0x91   : > { %2038 = vmatprep.mubr.bf16.mxu1 %v5291_v21  ;;  %5750 = vmatpush3.bf16.msra.mxu0 %v7646_v55  ;;  %10650 = vst [vmem:[#allocation66_spill] sm:$0xff] %v7688_v20  ;;  %v5290_v21 = vcombine.low %v7614_v54, %v894_v56  ;;  %v925_v40 = vld [vmem:[%s10452_s1 + $0x350] sm:$0xff]  ;;  %v5304_v54 = vcombine.low %v901_v17, %v909_v8  ;;  %v942_v17 = vld [vmem:[%s10452_s1 + $0x3d8] sm:$0xff]  ;;  %v648_v55 = vld [vmem:[%s6875_s29 + $0x6a8] sm:$0xff] }
  0x92   : > { %5814 = vmatpush3.bf16.msra.mxu1 %v7650_v3  ;;  %5751 = vmatprep.subr.bf16.mxu0 %v7652_v42  ;;  %10648 = vst [vmem:[#allocation64_spill] sm:$0xff] %v7682_v6  ;;  %10649 = vst [vmem:[#allocation65_spill] sm:$0xff] %v7684_v31  ;;  %v5306_v56 = vcombine.low %v902_v52, %v910_v22  ;;  %v5321_v51 = vcombine.high %v917_v25, %v925_v40  ;;  %v933_v38 = vld [vmem:[%s10452_s1 + $0x390] sm:$0xff]  ;;  %v647_v3 = vld [vmem:[%s6875_s29 + $0x6a0] sm:$0xff] }
  0x93   : > { %5815 = vmatprep.subr.bf16.mxu1 %v7658_v34  ;;  %v5323_v7 = vcombine.high %v918_v61, %v926_v4  ;;  %v941_v0 = vld [vmem:[%s10452_s1 + $0x3d0] sm:$0xff]  ;;  %v5320_v8 = vcombine.low %v917_v25, %v925_v40  ;;  %v5322_v52 = vcombine.low %v918_v61, %v926_v4  ;;  %v824_v25 = vld [vmem:[%s10452_s1 + $0x28] sm:$0xff]  ;;  %v630_v34 = vld [vmem:[%s6875_s29 + $0x618] sm:$0xff] }
  0x94   : > { %v5337_v22 = vcombine.high %v933_v38, %v941_v0  ;;  %v832_v40 = vld [vmem:[%s10452_s1 + $0x68] sm:$0xff]  ;;  %v5336_v61 = vcombine.low %v933_v38, %v941_v0  ;;  %v661_v42 = vld [vmem:[%s6875_s29 + $0x710] sm:$0xff] }
  0x95   : > { %5752 = vmatpush3.bf16.msra.mxu0 %v7672_v26  ;;  %v7744_v38 = vld [vmem:[%s10452_s1 + $0xa8] sm:$0xff]  ;;  %v629_v26 = vld [vmem:[%s6875_s29 + $0x610] sm:$0xff] }
  0x96   : > { %5816 = vmatpush3.bf16.msra.mxu1 %v7682_v6  ;;  %5865 = vmatprep.subr.bf16.mxu0 %v7684_v31  ;;  %v7749_v0 = vld [vmem:[%s10452_s1 + $0xe8] sm:$0xff] }
  0x97   : > { %1942 = vmatmul.mubr.bf16.gmra.mrb[48].mxu0 %v5288_v35  ;;  %5929 = vmatprep.subr.bf16.mxu1 %v7688_v20  ;;  %v934_v35 = vld [vmem:[%s10452_s1 + $0x398] sm:$0xff]  ;;  %v5247_v31 = vcombine.high %v7744_v38, %v7749_v0 }
  0x98   : > { %2039 = vmatmul.mubr.bf16.gmra.mrb[48].mxu1 %v5290_v21  ;;  %1949 = vmatprep.mubr.bf16.mxu0 %v5305_v39  ;;  %v5339_v21 = vcombine.high %v934_v35, %v942_v17  ;;  %v823_v39 = vld [vmem:[%s10452_s1 + $0x20] sm:$0xff]  ;;  %v5338_v4 = vcombine.low %v934_v35, %v942_v17  ;;  %v628_v17 = vld [vmem:[%s6875_s29 + $0x608] sm:$0xff]  ;;  %v678_v20 = vld [vmem:[%s6875_s29 + $0x798] sm:$0xff] }
  0x99   : > { %2046 = vmatprep.mubr.bf16.mxu1 %v5307_v49  ;;  %v831_v49 = vld [vmem:[%s10452_s1 + $0x60] sm:$0xff] }
  0x9a   : > { %v627_v35 = vld [vmem:[%s6875_s29 + $0x600] sm:$0xff] }
  0x9b   : > { %v7763_v6 = vpack.c.bf16 %v628_v17, %v627_v35  ;;  %v7780_v35 = vld [vmem:[%s10452_s1 + $0x120] sm:$0xff] }
  0x9c   : > { %v679_v17 = vld [vmem:[%s6875_s29 + $0x7a0] sm:$0xff] }
  0x9d   : > { %10651 = vst [vmem:[#allocation67_spill] sm:$0xff] %v7763_v6 }
  0x9f   : > { %1950 = vmatmul.mubr.bf16.gmra.mrb[52].mxu0 %v5304_v54  ;;  %v5229_v54 = vcombine.high %v823_v39, %v831_v49 }
  0xa0   : > { %2047 = vmatmul.mubr.bf16.gmra.mrb[52].mxu1 %v5306_v56  ;;  %1957 = vmatprep.mubr.bf16.mxu0 %v5321_v51  ;;  %v5231_v56 = vcombine.high %v824_v25, %v832_v40  ;;  %v7734_v51 = vld [vmem:[%s10452_s1 + $0xa0] sm:$0xff] }
  0xa1   : > { %2054 = vmatprep.mubr.bf16.mxu1 %v5323_v7  ;;  %v7739_v7 = vld [vmem:[%s10452_s1 + $0xe0] sm:$0xff] }
  0xa2   : > { %v5244_v60 = vcombine.low %v7734_v51, %v7739_v7 }
  0xa7   : > { %1958 = vmatmul.mubr.bf16.gmra.mrb[56].mxu0 %v5320_v8  ;;  %v659_v8 = vld [vmem:[%s6875_s29 + $0x700] sm:$0xff] }
  0xa8   : > { %2055 = vmatmul.mubr.bf16.gmra.mrb[56].mxu1 %v5322_v52  ;;  %1965 = vmatprep.mubr.bf16.mxu0 %v5337_v22  ;;  %v5228_v52 = vcombine.low %v823_v39, %v831_v49  ;;  %v660_v22 = vld [vmem:[%s6875_s29 + $0x708] sm:$0xff] }
  0xa9   : > { %2062 = vmatprep.mubr.bf16.mxu1 %v5339_v21  ;;  %v645_v21 = vld [vmem:[%s6875_s29 + $0x690] sm:$0xff]  ;;  %v7765_v39 = vpack.c.bf16 %v660_v22, %v659_v8  ;;  %v680_v8 = vld [vmem:[%s6875_s29 + $0x7a8] sm:$0xff] }
  0xaa   : > { %v7797_v22 = vld [vmem:[%s10452_s1 + $0x168] sm:$0xff] }
  0xab   : > { %10652 = vst [vmem:[#allocation68_spill] sm:$0xff] %v7765_v39 }
  0xaf   : > { %1966 = vmatmul.mubr.bf16.gmra.mrb[60].mxu0 %v5336_v61  ;;  %v646_v61 = vld [vmem:[%s6875_s29 + $0x698] sm:$0xff] }
  0xb0   : > { %2063 = vmatmul.mubr.bf16.gmra.mrb[60].mxu1 %v5338_v4  ;;  %2103 = vmatprep.mubr.bf16.mxu0 %v5229_v54  ;;  %v5230_v4 = vcombine.low %v824_v25, %v832_v40  ;;  %v5245_v54 = vcombine.high %v7734_v51, %v7739_v7  ;;  %v7767_v49 = vpack.c.bf16 %v646_v61, %v645_v21  ;;  %v662_v40 = vld [vmem:[%s6875_s29 + $0x718] sm:$0xff] }
  0xb1   : > { %2200 = vmatprep.mubr.bf16.mxu1 %v5231_v56  ;;  %v677_v56 = vld [vmem:[%s6875_s29 + $0x790] sm:$0xff]  ;;  %v7804_v21 = vpack.c.bf16 %v662_v40, %v661_v42  ;;  %v7806_v61 = vpack.c.bf16 %v648_v55, %v647_v3  ;;  %v5246_v55 = vcombine.low %v7744_v38, %v7749_v0  ;;  %v682_v40 = vld [vmem:[%s6875_s29 + $0x7b8] sm:$0xff] }
  0xb2   : > { %10653 = vst [vmem:[#allocation69_spill] sm:$0xff] %v7767_v49  ;;  %v7772_v25 = vpack.c.bf16 %v678_v20, %v677_v56  ;;  %v7787_v20 = vld [vmem:[%s10452_s1 + $0x160] sm:$0xff]  ;;  %v681_v42 = vld [vmem:[%s6875_s29 + $0x7b0] sm:$0xff] }
  0xb3   : > { %10656 = vst [vmem:[#allocation72_spill] sm:$0xff] %v7804_v21  ;;  %10657 = vst [vmem:[#allocation73_spill] sm:$0xff] %v7806_v61  ;;  %v663_v56 = vld [vmem:[%s6875_s29 + $0x720] sm:$0xff]  ;;  %v5261_v3 = vcombine.high %v7780_v35, %v7787_v20  ;;  %v5260_v43 = vcombine.low %v7780_v35, %v7787_v20  ;;  %v2740_v35 = vld [vmem:[%s10454_s3 + $0x8] sm:$0xff] }
  0xb4   : > { %10654 = vst [vmem:[#allocation70_spill] sm:$0xff] %v7772_v25  ;;  %2762 = vperm.xlu1 %6668, %v2740_v35   ;;  %v688_v35 = vld [vmem:[%s6875_s29 + $0x7e8] sm:$0xff] }
  0xb7   : > { %2104 = vmatmul.mubr.bf16.vlgmr.msra.gmra.mrb[64].mxu0 %v5228_v52  ;;  %v7792_v52 = vld [vmem:[%s10452_s1 + $0x128] sm:$0xff] }
  0xb8   : > { %2201 = vmatmul.mubr.bf16.vlgmr.msra.gmra.mrb[64].mxu1 %v5230_v4  ;;  %2111 = vmatprep.mubr.bf16.mxu0 %v5245_v54  ;;  %v631_v4 = vld [vmem:[%s6875_s29 + $0x620] sm:$0xff]  ;;  %v632_v54 = vld [vmem:[%s6875_s29 + $0x628] sm:$0xff]  ;;  %v5263_v51 = vcombine.high %v7792_v52, %v7797_v22 }
  0xb9   : > { %2208 = vmatprep.mubr.bf16.mxu1 %v5247_v31  ;;  %5866 = vmatpush3.bf16.msra.mxu0 %v7763_v6  ;;  %v7800_v31 = vpack.c.bf16 %v630_v34, %v629_v26  ;;  %v7814_v34 = vpack.c.bf16 %v680_v8, %v679_v17  ;;  %v664_v26 = vld [vmem:[%s6875_s29 + $0x728] sm:$0xff]  ;;  %v7828_v7 = vpack.c.bf16 %v632_v54, %v631_v4  ;;  %v633_v17 = vld [vmem:[%s6875_s29 + $0x630] sm:$0xff]  ;;  %v634_v8 = vld [vmem:[%s6875_s29 + $0x638] sm:$0xff] }
  0xba   : > { %5930 = vmatpush3.bf16.msra.mxu1 %v7765_v39  ;;  %5867 = vmatprep.subr.bf16.mxu0 %v7767_v49  ;;  %v649_v39 = vld [vmem:[%s6875_s29 + $0x6b0] sm:$0xff]  ;;  %v650_v49 = vld [vmem:[%s6875_s29 + $0x6b8] sm:$0xff]  ;;  %v7832_v38 = vpack.c.bf16 %v664_v26, %v663_v56  ;;  %v7845_v4 = vpack.c.bf16 %v682_v40, %v681_v42  ;;  %v7858_v56 = vld [vmem:[%s10452_s1 + $0x1e0] sm:$0xff] }
  0xbb   : > { %10655 = vst [vmem:[#allocation71_spill] sm:$0xff] %v7800_v31  ;;  %5931 = vmatprep.subr.bf16.mxu1 %v7772_v25  ;;  %10658 = vst [vmem:[#allocation74_spill] sm:$0xff] %v7814_v34  ;;  %v7834_v0 = vpack.c.bf16 %v650_v49, %v649_v39  ;;  %v665_v25 = vld [vmem:[%s6875_s29 + $0x730] sm:$0xff]  ;;  %v666_v54 = vld [vmem:[%s6875_s29 + $0x738] sm:$0xff] }
  0xbc   : > { %10659 = vst [vmem:[#allocation75_spill] sm:$0xff] %v7828_v7  ;;  %10660 = vst [vmem:[#allocation76_spill] sm:$0xff] %v7832_v38  ;;  %v683_v39 = vld [vmem:[%s6875_s29 + $0x7c0] sm:$0xff]  ;;  %v684_v49 = vld [vmem:[%s6875_s29 + $0x7c8] sm:$0xff]  ;;  %v7875_v42 = vpack.c.bf16 %v666_v54, %v665_v25  ;;  %v5262_v25 = vcombine.low %v7792_v52, %v7797_v22 }
  0xbd   : > { %5868 = vmatpush3.bf16.msra.mxu0 %v7800_v31  ;;  %10661 = vst [vmem:[#allocation77_spill] sm:$0xff] %v7834_v0  ;;  %v7842_v31 = vld [vmem:[%s10452_s1 + $0x1a0] sm:$0xff]  ;;  %10662 = vst [vmem:[#allocation78_spill] sm:$0xff] %v7845_v4  ;;  %v7863_v26 = vld [vmem:[%s10452_s1 + $0x1a8] sm:$0xff] }
  0xbe   : > { %5932 = vmatpush3.bf16.msra.mxu1 %v7804_v21  ;;  %5869 = vmatprep.subr.bf16.mxu0 %v7806_v61  ;;  %v651_v61 = vld [vmem:[%s6875_s29 + $0x6c0] sm:$0xff]  ;;  %v652_v21 = vld [vmem:[%s6875_s29 + $0x6c8] sm:$0xff]  ;;  %10664 = vst [vmem:[#allocation80_spill] sm:$0xff] %v7875_v42  ;;  %v686_v54 = vld [vmem:[%s6875_s29 + $0x7d8] sm:$0xff] }
  0xbf   : > { %2112 = vmatmul.mubr.bf16.gmra.mrb[68].mxu0 %v5244_v60  ;;  %5933 = vmatprep.subr.bf16.mxu1 %v7814_v34  ;;  %v2739_v60 = vld [vmem:[%s10454_s3] sm:$0xff]  ;;  %v7877_v40 = vpack.c.bf16 %v652_v21, %v651_v61  ;;  %v636_v34 = vld [vmem:[%s6875_s29 + $0x648] sm:$0xff]  ;;  %v5277_v21 = vcombine.high %v7842_v31, %v7858_v56  ;;  %v685_v61 = vld [vmem:[%s6875_s29 + $0x7d0] sm:$0xff] }
  0xc0   : > { %2209 = vmatmul.mubr.bf16.gmra.mrb[68].mxu1 %v5246_v55  ;;  %2119 = vmatprep.mubr.bf16.mxu0 %v5261_v3  ;;  %v7868_v55 = vld [vmem:[%s10452_s1 + $0x1e8] sm:$0xff]  ;;  %v7871_v3 = vpack.c.bf16 %v634_v8, %v633_v17  ;;  %v667_v6 = vld [vmem:[%s6875_s29 + $0x740] sm:$0xff]  ;;  %v7885_v17 = vpack.c.bf16 %v684_v49, %v683_v39  ;;  %v637_v49 = vld [vmem:[%s6875_s29 + $0x650] sm:$0xff] }
  0xc1   : > { %2216 = vmatprep.mubr.bf16.mxu1 %v5263_v51  ;;  %5870 = vmatpush3.bf16.msra.mxu0 %v7828_v7  ;;  %10665 = vst [vmem:[#allocation81_spill] sm:$0xff] %v7877_v40  ;;  %v635_v51 = vld [vmem:[%s6875_s29 + $0x640] sm:$0xff]  ;;  %v668_v8 = vld [vmem:[%s6875_s29 + $0x748] sm:$0xff]  ;;  %v654_v7 = vld [vmem:[%s6875_s29 + $0x6d8] sm:$0xff]  ;;  %v5279_v20 = vcombine.high %v7863_v26, %v7868_v55 }
  0xc2   : > { %10663 = vst [vmem:[#allocation79_spill] sm:$0xff] %v7871_v3  ;;  %5934 = vmatpush3.bf16.msra.mxu1 %v7832_v38  ;;  %5871 = vmatprep.subr.bf16.mxu0 %v7834_v0  ;;  %10666 = vst [vmem:[#allocation82_spill] sm:$0xff] %v7885_v17  ;;  %v653_v38 = vld [vmem:[%s6875_s29 + $0x6d0] sm:$0xff]  ;;  %v7902_v39 = vpack.c.bf16 %v636_v34, %v635_v51  ;;  %v7906_v52 = vpack.c.bf16 %v668_v8, %v667_v6  ;;  %v7916_v34 = vld [vmem:[%s10452_s1 + $0x220] sm:$0xff] }
  0xc3   : > { %5935 = vmatprep.subr.bf16.mxu1 %v7845_v4  ;;  %2757 = vperm.xlu0 %6667, %v2739_v60   ;;  %v7908_v22 = vpack.c.bf16 %v654_v7, %v653_v38  ;;  %v638_v60 = vld [vmem:[%s6875_s29 + $0x658] sm:$0xff]  ;;  %v669_v4 = vld [vmem:[%s6875_s29 + $0x750] sm:$0xff]  ;;  %v7921_v51 = vld [vmem:[%s10452_s1 + $0x260] sm:$0xff]  ;;  %v7924_v6 = vpack.c.bf16 %v686_v54, %v685_v61 }
  0xc4   : > { %10667 = vst [vmem:[#allocation83_spill] sm:$0xff] %v7902_v39  ;;  %10668 = vst [vmem:[#allocation84_spill] sm:$0xff] %v7906_v52  ;;  %v670_v7 = vld [vmem:[%s6875_s29 + $0x758] sm:$0xff]  ;;  %v655_v38 = vld [vmem:[%s6875_s29 + $0x6e0] sm:$0xff] }
  0xc5   : > { %5872 = vmatpush3.bf16.msra.mxu0 %v7871_v3  ;;  %10669 = vst [vmem:[#allocation85_spill] sm:$0xff] %v7908_v22  ;;  %10670 = vst [vmem:[#allocation86_spill] sm:$0xff] %v7924_v6  ;;  %v656_v8 = vld [vmem:[%s6875_s29 + $0x6e8] sm:$0xff]  ;;  %v2742_v54 = vld [vmem:[%s10454_s3 + $0x18] sm:$0xff] }
  0xc6   : > { %5936 = vmatpush3.bf16.msra.mxu1 %v7875_v42  ;;  %5873 = vmatprep.subr.bf16.mxu0 %v7877_v40  ;;  %v2741_v40 = vld [vmem:[%s10454_s3 + $0x10] sm:$0xff]  ;;  %v7937_v61 = vld [vmem:[%s10452_s1 + $0x228] sm:$0xff]  ;;  %v639_v42 = vld [vmem:[%s6875_s29 + $0x660] sm:$0xff] }
  0xc7   : > { %2120 = vmatmul.mubr.bf16.gmra.mrb[72].mxu0 %v5260_v43  ;;  %5937 = vmatprep.subr.bf16.mxu1 %v7885_v17  ;;  %v687_v43 = vld [vmem:[%s6875_s29 + $0x7e0] sm:$0xff]  ;;  %v7954_v17 = vpack.c.bf16 %v656_v8, %v655_v38  ;;  %v640_v3 = vld [vmem:[%s6875_s29 + $0x668] sm:$0xff]  ;;  %v689_v38 = vld [vmem:[%s6875_s29 + $0x7f0] sm:$0xff] }
  0xc8   : > { %2217 = vmatmul.mubr.bf16.gmra.mrb[72].mxu1 %v5262_v25  ;;  %2127 = vmatprep.mubr.bf16.mxu0 %v5277_v21  ;;  %v7942_v25 = vld [vmem:[%s10452_s1 + $0x268] sm:$0xff]  ;;  %v7945_v21 = vpack.c.bf16 %v638_v60, %v637_v49  ;;  %v671_v0 = vld [vmem:[%s6875_s29 + $0x760] sm:$0xff]  ;;  %v5276_v49 = vcombine.low %v7842_v31, %v7858_v56  ;;  %v7962_v60 = vpack.c.bf16 %v688_v35, %v687_v43  ;;  %v690_v31 = vld [vmem:[%s6875_s29 + $0x7f8] sm:$0xff] }
  0xc9   : > { %2224 = vmatprep.mubr.bf16.mxu1 %v5279_v20  ;;  %5874 = vmatpush3.bf16.msra.mxu0 %v7902_v39  ;;  %v7952_v20 = vpack.c.bf16 %v670_v7, %v669_v4  ;;  %v672_v39 = vld [vmem:[%s6875_s29 + $0x768] sm:$0xff]  ;;  %v5278_v4 = vcombine.low %v7863_v26, %v7868_v55  ;;  %v5293_v7 = vcombine.high %v7916_v34, %v7921_v51  ;;  %v642_v43 = vld [vmem:[%s6875_s29 + $0x678] sm:$0xff] }
  0xca   : > { %5938 = vmatpush3.bf16.msra.mxu1 %v7906_v52  ;;  %5875 = vmatprep.subr.bf16.mxu0 %v7908_v22  ;;  %v657_v52 = vld [vmem:[%s6875_s29 + $0x6f0] sm:$0xff]  ;;  %v658_v22 = vld [vmem:[%s6875_s29 + $0x6f8] sm:$0xff]  ;;  %v5295_v56 = vcombine.high %v7937_v61, %v7942_v25  ;;  %v7976_v8 = vpack.c.bf16 %v640_v3, %v639_v42  ;;  %v7980_v26 = vpack.c.bf16 %v672_v39, %v671_v0  ;;  %v2743_v3 = vld [vmem:[%s10454_s3 + $0x20] sm:$0xff] }
  0xcb   : > { %5939 = vmatprep.subr.bf16.mxu1 %v7924_v6  ;;  %2767 = vperm.xlu0 %6667, %v2741_v40   ;;  %v7982_v55 = vpack.c.bf16 %v658_v22, %v657_v52  ;;  %v641_v40 = vld [vmem:[%s6875_s29 + $0x670] sm:$0xff]  ;;  %v7987_v35 = vpack.c.bf16 %v690_v31, %v689_v38  ;;  %v674_v6 = vld [vmem:[%s6875_s29 + $0x778] sm:$0xff]  ;;  %v903_v0 = vld [vmem:[%s10452_s1 + $0x2a0] sm:$0xff]  ;;  %v5294_v38 = vcombine.low %v7937_v61, %v7942_v25 }
  0xcc   : > { %2772 = vperm.xlu1 %6668, %v2742_v54   ;;  %v673_v54 = vld [vmem:[%s6875_s29 + $0x770] sm:$0xff]  ;;  %v911_v42 = vld [vmem:[%s10452_s1 + $0x2e0] sm:$0xff]  ;;  %v8001_v39 = vpack.c.bf16 %v642_v43, %v641_v40  ;;  %v2744_v52 = vld [vmem:[%s10454_s3 + $0x28] sm:$0xff] }
  0xcd   : > { %5876 = vmatpush3.bf16.msra.mxu0 %v7945_v21  ;;  %v904_v22 = vld [vmem:[%s10452_s1 + $0x2a8] sm:$0xff]  ;;  %v5309_v31 = vcombine.high %v903_v0, %v911_v42  ;;  %v2747_v25 = vld [vmem:[%s10454_s3 + $0x40] sm:$0xff]  ;;  %v5308_v40 = vcombine.low %v903_v0, %v911_v42 }
  0xce   : > { %5940 = vmatpush3.bf16.msra.mxu1 %v7952_v20  ;;  %5877 = vmatprep.subr.bf16.mxu0 %v7954_v17  ;;  %v928_v61 = vld [vmem:[%s10452_s1 + $0x368] sm:$0xff]  ;;  %v935_v0 = vld [vmem:[%s10452_s1 + $0x3a0] sm:$0xff] }
  0xcf   : > { %2128 = vmatmul.mubr.bf16.gmra.mrb[76].mxu0 %v5276_v49  ;;  %5941 = vmatprep.subr.bf16.mxu1 %v7962_v60  ;;  %v912_v49 = vld [vmem:[%s10452_s1 + $0x2e8] sm:$0xff]  ;;  %v943_v42 = vld [vmem:[%s10452_s1 + $0x3e0] sm:$0xff] }
  0xd0   : > { %2225 = vmatmul.mubr.bf16.gmra.mrb[76].mxu1 %v5278_v4  ;;  %2135 = vmatprep.mubr.bf16.mxu0 %v5293_v7  ;;  %v8014_v4 = vpack.c.bf16 %v674_v6, %v673_v54  ;;  %v5292_v7 = vcombine.low %v7916_v34, %v7921_v51  ;;  %v2745_v6 = vld [vmem:[%s10454_s3 + $0x30] sm:$0xff]  ;;  %v2746_v34 = vld [vmem:[%s10454_s3 + $0x38] sm:$0xff]  ;;  %v919_v51 = vld [vmem:[%s10452_s1 + $0x320] sm:$0xff]  ;;  %v5310_v54 = vcombine.low %v904_v22, %v912_v49 }
  0xd1   : > { %2232 = vmatprep.mubr.bf16.mxu1 %v5295_v56  ;;  %5878 = vmatpush3.bf16.msra.mxu0 %v7976_v8  ;;  %v5311_v56 = vcombine.high %v904_v22, %v912_v49  ;;  %v2748_v43 = vld [vmem:[%s10454_s3 + $0x48] sm:$0xff] }
  0xd2   : > { %5942 = vmatpush3.bf16.msra.mxu1 %v7980_v26  ;;  %5879 = vmatprep.subr.bf16.mxu0 %v7982_v55  ;;  %v936_v22 = vld [vmem:[%s10452_s1 + $0x3a8] sm:$0xff] }
  0xd3   : > { %5943 = vmatprep.subr.bf16.mxu1 %v7987_v35  ;;  %2777 = vperm.xlu0 %6667, %v2743_v3   ;;  %v944_v49 = vld [vmem:[%s10452_s1 + $0x3e8] sm:$0xff] }
  0xd4   : > { %2782 = vperm.xlu1 %6668, %v2744_v52  }
  0xd5   : > { %5880 = vmatpush3.bf16.msra.mxu0 %v8001_v39 }
  0xd6   : > { %5944 = vmatpush3.bf16.msra.mxu1 %v8014_v4  ;;  %5993 = vmatprep.subr.bf16.mxu0 %v6880_v10  ;;  %v927_v10 = vld [vmem:[%s10452_s1 + $0x360] sm:$0xff] }
  0xd7   : > { %2136 = vmatmul.mubr.bf16.gmra.mrb[80].mxu0 %v5292_v7  ;;  %6057 = vmatprep.subr.bf16.mxu1 %v6885_v14  ;;  %v920_v14 = vld [vmem:[%s10452_s1 + $0x328] sm:$0xff]  ;;  %v5325_v3 = vcombine.high %v919_v51, %v927_v10  ;;  %v2749_v7 = vld [vmem:[%s10454_s3 + $0x50] sm:$0xff] }
  0xd8   : > { %2233 = vmatmul.mubr.bf16.gmra.mrb[80].mxu1 %v5294_v38  ;;  %2143 = vmatprep.mubr.bf16.mxu0 %v5309_v31  ;;  %v5327_v52 = vcombine.high %v920_v14, %v928_v61  ;;  %v2750_v38 = vld [vmem:[%s10454_s3 + $0x58] sm:$0xff]  ;;  %v2751_v31 = vld [vmem:[%s10454_s3 + $0x60] sm:$0xff] }
  0xd9   : > { %2240 = vmatprep.mubr.bf16.mxu1 %v5311_v56  ;;  %2787 = vperm.xlu0 %6667, %v2745_v6   ;;  %v5324_v56 = vcombine.low %v919_v51, %v927_v10  ;;  %v2752_v6 = vld [vmem:[%s10454_s3 + $0x68] sm:$0xff]  ;;  %v825_v51 = vld [vmem:[%s10452_s1 + $0x30] sm:$0xff] }
  0xda   : > { %2792 = vperm.xlu1 %6668, %v2746_v34   ;;  %v5326_v34 = vcombine.low %v920_v14, %v928_v61  ;;  %v833_v10 = vld [vmem:[%s10452_s1 + $0x70] sm:$0xff]  ;;  %v826_v14 = vld [vmem:[%s10452_s1 + $0x38] sm:$0xff] }
  0xdb   : > { %v834_v61 = vld [vmem:[%s10452_s1 + $0x78] sm:$0xff] }
  0xdd   : > { %2797 = vperm.xlu0 %6667, %v2747_v25   ;;  %v5341_v25 = vcombine.high %v935_v0, %v943_v42 }
  0xde   : > { %2802 = vperm.xlu1 %6668, %v2748_v43   ;;  %v2753_v43 = vld [vmem:[%s10454_s3 + $0x70] sm:$0xff] }
  0xdf   : > { %2144 = vmatmul.mubr.bf16.gmra.mrb[84].mxu0 %v5308_v40  ;;  %v5343_v40 = vcombine.high %v936_v22, %v944_v49 }
  0xe0   : > { %2241 = vmatmul.mubr.bf16.gmra.mrb[84].mxu1 %v5310_v54  ;;  %2151 = vmatprep.mubr.bf16.mxu0 %v5325_v3  ;;  %v2754_v54 = vld [vmem:[%s10454_s3 + $0x78] sm:$0xff]  ;;  %v5340_v3 = vcombine.low %v935_v0, %v943_v42  ;;  %v5232_v42 = vcombine.low %v825_v51, %v833_v10 }
  0xe1   : > { %2248 = vmatprep.mubr.bf16.mxu1 %v5327_v52  ;;  %2807 = vperm.xlu0 %6667, %v2749_v7   ;;  %v5342_v52 = vcombine.low %v936_v22, %v944_v49  ;;  %v5233_v7 = vcombine.high %v825_v51, %v833_v10  ;;  %v850_v0 = vld [vmem:[%s10452_s1 + $0xf8] sm:$0xff]  ;;  %v5234_v22 = vcombine.low %v826_v14, %v834_v61 }
  0xe2   : > { %2812 = vperm.xlu1 %6668, %v2750_v38   ;;  %v5235_v38 = vcombine.high %v826_v14, %v834_v61 }
  0xe5   : > { %2817 = vperm.xlu0 %6667, %v2751_v31   ;;  %v841_v31 = vld [vmem:[%s10452_s1 + $0xb0] sm:$0xff] }
  0xe6   : > { %2822 = vperm.xlu1 %6668, %v2752_v6   ;;  %v842_v6 = vld [vmem:[%s10452_s1 + $0xb8] sm:$0xff] }
  0xe7   : > { %2152 = vmatmul.mubr.bf16.gmra.mrb[88].mxu0 %v5324_v56  ;;  %v849_v56 = vld [vmem:[%s10452_s1 + $0xf0] sm:$0xff]  ;;  %v5250_v10 = vcombine.low %v842_v6, %v850_v0 }
  0xe8   : > { %2249 = vmatmul.mubr.bf16.gmra.mrb[88].mxu1 %v5326_v34  ;;  %2159 = vmatprep.mubr.bf16.mxu0 %v5341_v25  ;;  %v5249_v49 = vcombine.high %v841_v31, %v849_v56  ;;  %v5251_v34 = vcombine.high %v842_v6, %v850_v0  ;;  %v857_v25 = vld [vmem:[%s10452_s1 + $0x130] sm:$0xff]  ;;  %v5248_v51 = vcombine.low %v841_v31, %v849_v56 }
  0xe9   : > { %2256 = vmatprep.mubr.bf16.mxu1 %v5343_v40  ;;  %2827 = vperm.xlu0 %6667, %v2753_v43   ;;  %v865_v40 = vld [vmem:[%s10452_s1 + $0x170] sm:$0xff]  ;;  %v858_v43 = vld [vmem:[%s10452_s1 + $0x138] sm:$0xff] }
  0xea   : > { %2832 = vperm.xlu1 %6668, %v2754_v54   ;;  %v866_v54 = vld [vmem:[%s10452_s1 + $0x178] sm:$0xff]  ;;  %v5265_v14 = vcombine.high %v857_v25, %v865_v40 }
  0xeb   : > { %v5267_v61 = vcombine.high %v858_v43, %v866_v54 }
  0xef   : > { %2160 = vmatmul.mubr.bf16.gmra.mrb[92].mxu0 %v5340_v3 }
  0xf0   : > { %2257 = vmatmul.mubr.bf16.gmra.mrb[92].mxu1 %v5342_v52  ;;  %2297 = vmatprep.mubr.bf16.mxu0 %v5233_v7 }
  0xf1   : > { %2394 = vmatprep.mubr.bf16.mxu1 %v5235_v38 }
  0xf7   : > { %2298 = vmatmul.mubr.bf16.vlgmr.msra.gmra.mrb[96].mxu0 %v5232_v42 }
  0xf8   : > { %2395 = vmatmul.mubr.bf16.vlgmr.msra.gmra.mrb[96].mxu1 %v5234_v22  ;;  %2305 = vmatprep.mubr.bf16.mxu0 %v5249_v49 }
  0xf9   : > { %2402 = vmatprep.mubr.bf16.mxu1 %v5251_v34  ;;  %5994 = vmatpush3.bf16.msra.mxu0 %v6887_v15  ;;  %v873_v15 = vld [vmem:[%s10452_s1 + $0x1b0] sm:$0xff] }
  0xfa   : > { %6058 = vmatpush3.bf16.msra.mxu1 %v6893_v19  ;;  %5995 = vmatprep.subr.bf16.mxu0 %v6900_v23  ;;  %v881_v19 = vld [vmem:[%s10452_s1 + $0x1f0] sm:$0xff]  ;;  %v874_v23 = vld [vmem:[%s10452_s1 + $0x1b8] sm:$0xff] }
  0xfb   : > { %6059 = vmatprep.subr.bf16.mxu1 %v6902_v24  ;;  %v882_v24 = vld [vmem:[%s10452_s1 + $0x1f8] sm:$0xff]  ;;  %v5280_v7 = vcombine.low %v873_v15, %v881_v19 }
  0xfc   : > { %v5283_v3 = vcombine.high %v874_v23, %v882_v24  ;;  %v5282_v56 = vcombine.low %v874_v23, %v882_v24 }
  0xfd   : > { %5996 = vmatpush3.bf16.msra.mxu0 %v6908_v28  ;;  %v5264_v28 = vcombine.low %v857_v25, %v865_v40 }
  0xfe   : > { %6060 = vmatpush3.bf16.msra.mxu1 %v6915_v32  ;;  %5997 = vmatprep.subr.bf16.mxu0 %v6917_v33  ;;  %v5266_v32 = vcombine.low %v858_v43, %v866_v54  ;;  %v966_v33 = vpop.permute.xlu0 %965  ;;  %v906_v54 = vld [vmem:[%s10452_s1 + $0x2b8] sm:$0xff] }
  0xff   : > { %2306 = vmatmul.mubr.bf16.gmra.mrb[100].mxu0 %v5248_v51  ;;  %6061 = vmatprep.subr.bf16.mxu1 %v6922_v37  ;;  %v5281_v37 = vcombine.high %v873_v15, %v881_v19  ;;  %v914_v51 = vld [vmem:[%s10452_s1 + $0x2f8] sm:$0xff] }
 0x100   : > { %2403 = vmatmul.mubr.bf16.gmra.mrb[100].mxu1 %v5250_v10  ;;  %2313 = vmatprep.mubr.bf16.mxu0 %v5265_v14 }
 0x101   : > { %2410 = vmatprep.mubr.bf16.mxu1 %v5267_v61  ;;  %5998 = vmatpush3.bf16.msra.mxu0 %v6928_v41  ;;  %v976_v41 = vpop.permute.xlu1 %975 }
 0x102   : > { %6062 = vmatpush3.bf16.msra.mxu1 %v6935_v45  ;;  %5999 = vmatprep.subr.bf16.mxu0 %v6937_v46  ;;  %v8146_v45 = vld [vmem:[%s10452_s1 + $0x230] sm:$0xff] }
 0x103   : > { %6063 = vmatprep.subr.bf16.mxu1 %v6943_v50  ;;  %v8151_v46 = vld [vmem:[%s10452_s1 + $0x270] sm:$0xff] }
 0x104   : > { %v5297_v6 = vcombine.high %v8146_v45, %v8151_v46 }
 0x105   : > { %6000 = vmatpush3.bf16.msra.mxu0 %v6952_v57  ;;  %v971_v57 = vpop.permute.xlu0 %970 }
 0x106   : > { %6064 = vmatpush3.bf16.msra.mxu1 %v6956_v58  ;;  %6001 = vmatprep.subr.bf16.mxu0 %v6958_v59  ;;  %v8157_v58 = vld [vmem:[%s10452_s1 + $0x238] sm:$0xff] }
 0x107   : > { %2314 = vmatmul.mubr.bf16.gmra.mrb[104].mxu0 %v5264_v28  ;;  %6065 = vmatprep.subr.bf16.mxu1 %v6964_v63  ;;  %v8162_v59 = vld [vmem:[%s10452_s1 + $0x278] sm:$0xff] }
 0x108   : > { %2411 = vmatmul.mubr.bf16.gmra.mrb[104].mxu1 %v5266_v32  ;;  %2321 = vmatprep.mubr.bf16.mxu0 %v5281_v37  ;;  %v5298_v23 = vcombine.low %v8157_v58, %v8162_v59 }
 0x109   : > { %2418 = vmatprep.mubr.bf16.mxu1 %v5283_v3  ;;  %6002 = vmatpush3.bf16.msra.mxu0 %v6972_v9 }
 0x10a   : > { %v5497_v50 = vpop.f32.mrb[0].mxu0  ;;  %6066 = vmatpush3.bf16.msra.mxu1 %v6976_v11  ;;  %6003 = vmatprep.subr.bf16.mxu0 %v6978_v12  ;;  %v5299_v11 = vcombine.high %v8157_v58, %v8162_v59  ;;  %v930_v58 = vld [vmem:[%s10452_s1 + $0x378] sm:$0xff] }
 0x10b   : > { %v5561_v63 = vpop.f32.mrb[0].mxu1  ;;  %v5498_v52 = vpop.f32.mrb[1].mxu0  ;;  %6067 = vmatprep.subr.bf16.mxu1 %v6984_v18 }
 0x10c   : > { %v5499_v9 = vadd.f32 %v5498_v52, %v5497_v50  ;;  %v5562_v38 = vpop.f32.mrb[1].mxu1  ;;  %v5500_v31 = vpop.f32.mrb[2].mxu0 }
 0x10d   : > { %v5563_v0 = vadd.f32 %v5562_v38, %v5561_v63  ;;  %v5564_v42 = vpop.f32.mrb[2].mxu1  ;;  %v5501_v22 = vpop.f32.mrb[3].mxu0  ;;  %6004 = vmatpush3.bf16.msra.mxu0 %v6992_v27  ;;  %v905_v27 = vld [vmem:[%s10452_s1 + $0x2b0] sm:$0xff] }
 0x10e   : > { %v1718_v12 = vadd.f32 %v5499_v9, %v966_v33  ;;  %v5565_v49 = vpop.f32.mrb[3].mxu1  ;;  %v5502_v34 = vadd.f32 %v5501_v22, %v5500_v31  ;;  %6068 = vmatpush3.bf16.msra.mxu1 %v6996_v29  ;;  %6005 = vmatprep.subr.bf16.mxu0 %v6998_v30  ;;  %v913_v29 = vld [vmem:[%s10452_s1 + $0x2f0] sm:$0xff]  ;;  %v986_v50 = vpop.permute.xlu0 %985  ;;  %v5314_v31 = vcombine.low %v906_v54, %v914_v51 }
 0x10f   : > { %v5566_v18 = vadd.f32 %v5565_v49, %v5564_v42  ;;  %2322 = vmatmul.mubr.bf16.gmra.mrb[108].mxu0 %v5280_v7  ;;  %6069 = vmatprep.subr.bf16.mxu1 %v7004_v36  ;;  %v981_v36 = vpop.permute.xlu1 %980  ;;  %v5313_v24 = vcombine.high %v905_v27, %v913_v29  ;;  %v5312_v52 = vcombine.low %v905_v27, %v913_v29  ;;  %v937_v29 = vld [vmem:[%s10452_s1 + $0x3b0] sm:$0xff] }
 0x110   : > { %v1721_v25 = vadd.f32 %v5502_v34, %v971_v57  ;;  %2419 = vmatmul.mubr.bf16.gmra.mrb[108].mxu1 %v5282_v56  ;;  %2329 = vmatprep.mubr.bf16.mxu0 %v5297_v6  ;;  %v8175_v40 = vadd.f32 %v5563_v0, %v1718_v12 }
 0x111   : > { %2426 = vmatprep.mubr.bf16.mxu1 %v5299_v11  ;;  %6006 = vmatpush3.bf16.msra.mxu0 %v7012_v44  ;;  %v5296_v44 = vcombine.low %v8146_v45, %v8151_v46 }
 0x112   : > { %v8184_v30 = vadd.f32 %v5566_v18, %v1721_v25  ;;  %v5503_v43 = vpop.f32.mrb[4].mxu0  ;;  %6070 = vmatpush3.bf16.msra.mxu1 %v7016_v47  ;;  %6007 = vmatprep.subr.bf16.mxu0 %v7018_v48  ;;  %v5315_v47 = vcombine.high %v906_v54, %v914_v51  ;;  %v996_v27 = vpop.permute.xlu0 %995 }
 0x113   : > { %v5567_v10 = vpop.f32.mrb[4].mxu1  ;;  %v5504_v14 = vpop.f32.mrb[5].mxu0  ;;  %6071 = vmatprep.subr.bf16.mxu1 %v7024_v53 }
 0x114   : > { %v5505_v61 = vadd.f32 %v5504_v14, %v5503_v43  ;;  %v5568_v15 = vpop.f32.mrb[5].mxu1  ;;  %v5506_v19 = vpop.f32.mrb[6].mxu0  ;;  %v945_v43 = vld [vmem:[%s10452_s1 + $0x3f0] sm:$0xff]  ;;  %v946_v14 = vld [vmem:[%s10452_s1 + $0x3f8] sm:$0xff] }
 0x115   : > { %v5569_v28 = vadd.f32 %v5568_v15, %v5567_v10  ;;  %v5570_v32 = vpop.f32.mrb[6].mxu1  ;;  %v5507_v33 = vpop.f32.mrb[7].mxu0  ;;  %6008 = vmatpush3.bf16.msra.mxu0 %v7032_v62  ;;  %v921_v62 = vld [vmem:[%s10452_s1 + $0x330] sm:$0xff]  ;;  %v938_v10 = vld [vmem:[%s10452_s1 + $0x3b8] sm:$0xff] }
 0x116   : > { %v1726_v48 = vadd.f32 %v5505_v61, %v976_v41  ;;  %v5571_v37 = vpop.f32.mrb[7].mxu1  ;;  %v5508_v3 = vadd.f32 %v5507_v33, %v5506_v19  ;;  %6072 = vmatpush3.bf16.msra.mxu1 %v7041_v5  ;;  %6121 = vmatprep.subr.bf16.mxu0 %v7058_v13  ;;  %v929_v5 = vld [vmem:[%s10452_s1 + $0x370] sm:$0xff]  ;;  %v991_v57 = vpop.permute.xlu1 %990 }
 0x117   : > { %v5572_v53 = vadd.f32 %v5571_v37, %v5570_v32  ;;  %2330 = vmatmul.mubr.bf16.gmra.mrb[112].mxu0 %v5296_v44  ;;  %6185 = vmatprep.subr.bf16.mxu1 %v7061_v16  ;;  %v922_v16 = vld [vmem:[%s10452_s1 + $0x338] sm:$0xff]  ;;  %v5329_v56 = vcombine.high %v921_v62, %v929_v5  ;;  %v5328_v15 = vcombine.low %v921_v62, %v929_v5  ;;  %v1006_v62 = vpop.permute.xlu0 %1005  ;;  %v2920_v5 = vld [vmem:[%s10456_s5] sm:$0xff] }
 0x118   : > { %v1729_v45 = vadd.f32 %v5508_v3, %v981_v36  ;;  %2427 = vmatmul.mubr.bf16.gmra.mrb[112].mxu1 %v5298_v23  ;;  %2337 = vmatprep.mubr.bf16.mxu0 %v5313_v24  ;;  %v8203_v46 = vadd.f32 %v5569_v28, %v1726_v48  ;;  %v5331_v22 = vcombine.high %v922_v16, %v930_v58 }
 0x119   : > { %2434 = vmatprep.mubr.bf16.mxu1 %v5315_v47  ;;  %v5330_v28 = vcombine.low %v922_v16, %v930_v58  ;;  %v5345_v32 = vcombine.high %v937_v29, %v945_v43  ;;  %v5347_v37 = vcombine.high %v938_v10, %v946_v14  ;;  %v2928_v16 = vld [vmem:[%s10456_s5 + $0x40] sm:$0xff] }
 0x11a   : > { %v8211_v13 = vadd.f32 %v5572_v53, %v1729_v45  ;;  %v5509_v41 = vpop.f32.mrb[8].mxu0  ;;  %v1001_v51 = vpop.permute.xlu1 %1000 }
 0x11b   : > { %v5573_v59 = vpop.f32.mrb[8].mxu1  ;;  %v5510_v63 = vpop.f32.mrb[9].mxu0 }
 0x11c   : > { %v5511_v7 = vadd.f32 %v5510_v63, %v5509_v41  ;;  %v5574_v9 = vpop.f32.mrb[9].mxu1  ;;  %v5512_v38 = vpop.f32.mrb[10].mxu0 }
 0x11d   : > { %v5575_v6 = vadd.f32 %v5574_v9, %v5573_v59  ;;  %v5576_v0 = vpop.f32.mrb[10].mxu1  ;;  %v5513_v42 = vpop.f32.mrb[11].mxu0 }
 0x11e   : > { %v1734_v11 = vadd.f32 %v5511_v7, %v986_v50  ;;  %v5514_v12 = vadd.f32 %v5513_v42, %v5512_v38  ;;  %v5577_v49 = vpop.f32.mrb[11].mxu1  ;;  %v1011_v63 = vpop.permute.xlu1 %1010  ;;  %v2929_v7 = vld [vmem:[%s10456_s5 + $0x48] sm:$0xff]  ;;  %v5346_v42 = vcombine.low %v938_v10, %v946_v14  ;;  %v2944_v10 = vld [vmem:[%s10456_s5 + $0xc0] sm:$0xff] }
 0x11f   : > { %v5578_v34 = vadd.f32 %v5577_v49, %v5576_v0  ;;  %2338 = vmatmul.mubr.bf16.gmra.mrb[116].mxu0 %v5312_v52  ;;  %v2921_v52 = vld [vmem:[%s10456_s5 + $0x8] sm:$0xff] }
 0x120   : > { %v8219_v18 = vadd.f32 %v5575_v6, %v1734_v11  ;;  %v1737_v25 = vadd.f32 %v5514_v12, %v991_v57  ;;  %2435 = vmatmul.mubr.bf16.gmra.mrb[116].mxu1 %v5314_v31  ;;  %2345 = vmatprep.mubr.bf16.mxu0 %v5329_v56  ;;  %v5344_v31 = vcombine.low %v937_v29, %v945_v43  ;;  %v1016_v29 = vpop.permute.xlu0 %1015  ;;  %v2936_v43 = vld [vmem:[%s10456_s5 + $0x80] sm:$0xff] }
 0x121   : > { %2442 = vmatprep.mubr.bf16.mxu1 %v5331_v22  ;;  %v5349_v22 = vcombine.high %v2920_v5, %v2928_v16 }
 0x122   : > { %v8227_v36 = vadd.f32 %v5578_v34, %v1737_v25  ;;  %v5515_v54 = vpop.f32.mrb[12].mxu0  ;;  %v5351_v34 = vcombine.high %v2921_v52, %v2929_v7 }
 0x123   : > { %v5579_v44 = vpop.f32.mrb[12].mxu1  ;;  %v5516_v61 = vpop.f32.mrb[13].mxu0 }
 0x124   : > { %v5517_v19 = vadd.f32 %v5516_v61, %v5515_v54  ;;  %v5580_v23 = vpop.f32.mrb[13].mxu1  ;;  %v5518_v24 = vpop.f32.mrb[14].mxu0 }
 0x125   : > { %v5581_v33 = vadd.f32 %v5580_v23, %v5579_v44  ;;  %v5582_v47 = vpop.f32.mrb[14].mxu1  ;;  %v5519_v48 = vpop.f32.mrb[15].mxu0  ;;  %v2937_v23 = vld [vmem:[%s10456_s5 + $0x88] sm:$0xff] }
 0x126   : > { %v1742_v3 = vadd.f32 %v5517_v19, %v996_v27  ;;  %v5520_v53 = vadd.f32 %v5519_v48, %v5518_v24  ;;  %v5583_v45 = vpop.f32.mrb[15].mxu1  ;;  %v1021_v19 = vpop.permute.xlu1 %1020  ;;  %v2945_v24 = vld [vmem:[%s10456_s5 + $0xc8] sm:$0xff] }
 0x127   : > { %v5584_v50 = vadd.f32 %v5583_v45, %v5582_v47  ;;  %2346 = vmatmul.mubr.bf16.gmra.mrb[120].mxu0 %v5328_v15 }
 0x128   : > { %v8235_v41 = vadd.f32 %v5581_v33, %v1742_v3  ;;  %v1745_v57 = vadd.f32 %v5520_v53, %v1001_v51  ;;  %2443 = vmatmul.mubr.bf16.gmra.mrb[120].mxu1 %v5330_v28  ;;  %2353 = vmatprep.mubr.bf16.mxu0 %v5345_v32  ;;  %v5348_v33 = vcombine.low %v2920_v5, %v2928_v16  ;;  %v1026_v5 = vpop.permute.xlu0 %1025  ;;  %v8272_v16 = vld [vmem:[%s10456_s5 + $0x100] sm:$0xff] }
 0x129   : > { %2450 = vmatprep.mubr.bf16.mxu1 %v5347_v37  ;;  %v5350_v3 = vcombine.low %v2921_v52, %v2929_v7  ;;  %v5365_v53 = vcombine.high %v2936_v43, %v2944_v10  ;;  %v8277_v52 = vld [vmem:[%s10456_s5 + $0x140] sm:$0xff] }
 0x12a   : > { %v8243_v58 = vadd.f32 %v5584_v50, %v1745_v57  ;;  %v5521_v59 = vpop.f32.mrb[16].mxu0 }
 0x12b   : > { %v5585_v9 = vpop.f32.mrb[16].mxu1  ;;  %v5522_v38 = vpop.f32.mrb[17].mxu0 }
 0x12c   : > { %v5523_v56 = vadd.f32 %v5522_v38, %v5521_v59  ;;  %v5586_v6 = vpop.f32.mrb[17].mxu1  ;;  %v5524_v0 = vpop.f32.mrb[18].mxu0 }
 0x12d   : > { %v5587_v11 = vadd.f32 %v5586_v6, %v5585_v9  ;;  %v5588_v12 = vpop.f32.mrb[18].mxu1  ;;  %v5525_v49 = vpop.f32.mrb[19].mxu0 }
 0x12e   : > { %v1750_v25 = vadd.f32 %v5523_v56, %v1006_v62  ;;  %v5526_v27 = vadd.f32 %v5525_v49, %v5524_v0  ;;  %v5589_v54 = vpop.f32.mrb[19].mxu1  ;;  %v5367_v62 = vcombine.high %v2937_v23, %v2945_v24  ;;  %v1031_v0 = vpop.permute.xlu1 %1030  ;;  %v5364_v49 = vcombine.low %v2936_v43, %v2944_v10  ;;  %v10674_v10 = vld [vmem:[#allocation8_spill] sm:$0xff] }
 0x12f   : > { %v5590_v51 = vadd.f32 %v5589_v54, %v5588_v12  ;;  %2354 = vmatmul.mubr.bf16.gmra.mrb[124].mxu0 %v5344_v31 }
 0x130   : > { %v8251_v44 = vadd.f32 %v5587_v11, %v1750_v25  ;;  %v1753_v61 = vadd.f32 %v5526_v27, %v1011_v63  ;;  %2451 = vmatmul.mubr.bf16.gmra.mrb[124].mxu1 %v5346_v42  ;;  %3720 = vmatprep.mubr.bf16.mxu0 %v5349_v22  ;;  %v8285_v42 = vld [vmem:[%s10456_s5 + $0x108] sm:$0xff]  ;;  %v10671_v11 = vld [vmem:[#allocation5_spill] sm:$0xff] }
 0x131   : > { %3817 = vmatprep.mubr.bf16.mxu1 %v5351_v34  ;;  %v8290_v22 = vld [vmem:[%s10456_s5 + $0x148] sm:$0xff] }
 0x132   : > { %v8259_v14 = vadd.f32 %v5590_v51, %v1753_v61  ;;  %v5527_v15 = vpop.f32.mrb[20].mxu0  ;;  %v10672_v34 = vld [vmem:[#allocation6_spill] sm:$0xff]  ;;  %v5366_v51 = vcombine.low %v2937_v23, %v2945_v24  ;;  %v5381_v61 = vcombine.high %v8272_v16, %v8277_v52 }
 0x133   : > { %v5591_v28 = vpop.f32.mrb[20].mxu1  ;;  %v5528_v32 = vpop.f32.mrb[21].mxu0  ;;  %v10676_v23 = vld [vmem:[#allocation10_spill] sm:$0xff] }
 0x134   : > { %v5529_v47 = vadd.f32 %v5528_v32, %v5527_v15  ;;  %v5592_v48 = vpop.f32.mrb[21].mxu1  ;;  %v5530_v37 = vpop.f32.mrb[22].mxu0 }
 0x135   : > { %v5593_v45 = vadd.f32 %v5592_v48, %v5591_v28  ;;  %v5594_v50 = vpop.f32.mrb[22].mxu1  ;;  %v5531_v57 = vpop.f32.mrb[23].mxu0  ;;  %v10673_v28 = vld [vmem:[#allocation7_spill] sm:$0xff] }
 0x136   : > { %v1758_v59 = vadd.f32 %v5529_v47, %v1016_v29  ;;  %v5532_v63 = vadd.f32 %v5531_v57, %v5530_v37  ;;  %v5595_v9 = vpop.f32.mrb[23].mxu1  ;;  %v10675_v47 = vld [vmem:[#allocation9_spill] sm:$0xff] }
 0x137   : > { %v5596_v38 = vadd.f32 %v5595_v9, %v5594_v50  ;;  %3721 = vmatmul.mubr.bf16.vlgmr.msra.gmra.mrb[128].mxu0 %v5348_v33  ;;  %v10677_v50 = vld [vmem:[#allocation11_spill] sm:$0xff]  ;;  %v8326_v9 = vld [vmem:[%s10456_s5 + $0x1c8] sm:$0xff] }
 0x138   : > { %v8267_v31 = vadd.f32 %v5593_v45, %v1758_v59  ;;  %v1761_v56 = vadd.f32 %v5532_v63, %v1021_v19  ;;  %3818 = vmatmul.mubr.bf16.vlgmr.msra.gmra.mrb[128].mxu1 %v5350_v3  ;;  %3728 = vmatprep.mubr.bf16.mxu0 %v5365_v53  ;;  %v1036_v3 = vpop.permute.xlu0 %1035  ;;  %v8308_v53 = vld [vmem:[%s10456_s5 + $0x180] sm:$0xff]  ;;  %v1041_v59 = vpop.permute.xlu1 %1040  ;;  %v8321_v63 = vld [vmem:[%s10456_s5 + $0x188] sm:$0xff] }
 0x139   : > { %3825 = vmatprep.mubr.bf16.mxu1 %v5367_v62  ;;  %6122 = vmatpush3.bf16.msra.mxu0 %v7082_v1  ;;  %v8313_v45 = vld [vmem:[%s10456_s5 + $0x1c0] sm:$0xff] }
 0x13a   : > { %v8280_v7 = vadd.f32 %v5596_v38, %v1761_v56  ;;  %v5533_v6 = vpop.f32.mrb[24].mxu0  ;;  %6186 = vmatpush3.bf16.msra.mxu1 %v7085_v2  ;;  %6123 = vmatprep.subr.bf16.mxu0 %v10671_v11  ;;  %v5383_v2 = vcombine.high %v8285_v42, %v8290_v22  ;;  %v10678_v38 = vld [vmem:[#allocation12_spill] sm:$0xff]  ;;  %v10679_v56 = vld [vmem:[#allocation13_spill] sm:$0xff]  ;;  %v10680_v11 = vld [vmem:[#allocation14_spill] sm:$0xff] }
 0x13b   : > { %v5597_v12 = vpop.f32.mrb[24].mxu1  ;;  %v5534_v1 = vpop.f32.mrb[25].mxu0  ;;  %6187 = vmatprep.subr.bf16.mxu1 %v10672_v34  ;;  %v5382_v34 = vcombine.low %v8285_v42, %v8290_v22  ;;  %v10684_v42 = vld [vmem:[#allocation18_spill] sm:$0xff] }
 0x13c   : > { %v5535_v25 = vadd.f32 %v5534_v1, %v5533_v6  ;;  %v5598_v27 = vpop.f32.mrb[25].mxu1  ;;  %v5536_v54 = vpop.f32.mrb[26].mxu0 }
 0x13d   : > { %v5599_v29 = vadd.f32 %v5598_v27, %v5597_v12  ;;  %v5600_v15 = vpop.f32.mrb[26].mxu1  ;;  %v5537_v19 = vpop.f32.mrb[27].mxu0  ;;  %6124 = vmatpush3.bf16.msra.mxu0 %v10673_v28 }
 0x13e   : > { %v1766_v32 = vadd.f32 %v5535_v25, %v1026_v5  ;;  %v5538_v33 = vadd.f32 %v5537_v19, %v5536_v54  ;;  %v5601_v43 = vpop.f32.mrb[27].mxu1  ;;  %6188 = vmatpush3.bf16.msra.mxu1 %v10674_v10  ;;  %6125 = vmatprep.subr.bf16.mxu0 %v10675_v47  ;;  %v5397_v25 = vcombine.high %v8308_v53, %v8313_v45  ;;  %v10682_v19 = vld [vmem:[#allocation16_spill] sm:$0xff]  ;;  %v10685_v10 = vld [vmem:[#allocation19_spill] sm:$0xff] }
 0x13f   : > { %v5602_v48 = vadd.f32 %v5601_v43, %v5600_v15  ;;  %3729 = vmatmul.mubr.bf16.gmra.mrb[132].mxu0 %v5364_v49  ;;  %6189 = vmatprep.subr.bf16.mxu1 %v10676_v23  ;;  %v8353_v43 = vld [vmem:[%s10456_s5 + $0x240] sm:$0xff]  ;;  %v8361_v23 = vld [vmem:[%s10456_s5 + $0x208] sm:$0xff] }
 0x140   : > { %v8303_v24 = vadd.f32 %v5599_v29, %v1766_v32  ;;  %v1769_v37 = vadd.f32 %v5538_v33, %v1031_v0  ;;  %3826 = vmatmul.mubr.bf16.gmra.mrb[132].mxu1 %v5366_v51  ;;  %3736 = vmatprep.mubr.bf16.mxu0 %v5381_v61  ;;  %v5380_v0 = vcombine.low %v8272_v16, %v8277_v52  ;;  %v10681_v29 = vld [vmem:[#allocation15_spill] sm:$0xff]  ;;  %v8348_v33 = vld [vmem:[%s10456_s5 + $0x200] sm:$0xff] }
 0x141   : > { %3833 = vmatprep.mubr.bf16.mxu1 %v5383_v2  ;;  %6126 = vmatpush3.bf16.msra.mxu0 %v10677_v50  ;;  %v5399_v61 = vcombine.high %v8321_v63, %v8326_v9  ;;  %v10683_v2 = vld [vmem:[#allocation17_spill] sm:$0xff] }
 0x142   : > { %v8316_v57 = vadd.f32 %v5602_v48, %v1769_v37  ;;  %v5539_v62 = vpop.f32.mrb[28].mxu0  ;;  %6190 = vmatpush3.bf16.msra.mxu1 %v10678_v38  ;;  %6127 = vmatprep.subr.bf16.mxu0 %v10679_v56  ;;  %v8366_v37 = vld [vmem:[%s10456_s5 + $0x248] sm:$0xff]  ;;  %v10687_v50 = vld [vmem:[#allocation21_spill] sm:$0xff]  ;;  %v5396_v38 = vcombine.low %v8308_v53, %v8313_v45 }
 0x143   : > { %v5603_v5 = vpop.f32.mrb[28].mxu1  ;;  %v5540_v6 = vpop.f32.mrb[29].mxu0  ;;  %6191 = vmatprep.subr.bf16.mxu1 %v10680_v11  ;;  %v10688_v56 = vld [vmem:[#allocation22_spill] sm:$0xff]  ;;  %v5398_v11 = vcombine.low %v8321_v63, %v8326_v9 }
 0x144   : > { %v5541_v12 = vadd.f32 %v5540_v6, %v5539_v62  ;;  %v5604_v1 = vpop.f32.mrb[29].mxu1  ;;  %v5542_v49 = vpop.f32.mrb[30].mxu0  ;;  %v10692_v9 = vld [vmem:[#allocation26_spill] sm:$0xff] }
 0x145   : > { %v5605_v27 = vadd.f32 %v5604_v1, %v5603_v5  ;;  %v5606_v54 = vpop.f32.mrb[30].mxu1  ;;  %v5543_v51 = vpop.f32.mrb[31].mxu0  ;;  %6128 = vmatpush3.bf16.msra.mxu0 %v10681_v29 }
 0x146   : > { %v1774_v16 = vadd.f32 %v5541_v12, %v1036_v3  ;;  %v5544_v52 = vadd.f32 %v5543_v51, %v5542_v49  ;;  %v5607_v15 = vpop.f32.mrb[31].mxu1  ;;  %6192 = vmatpush3.bf16.msra.mxu1 %v10682_v19  ;;  %6129 = vmatprep.subr.bf16.mxu0 %v10683_v2  ;;  %v10686_v3 = vld [vmem:[#allocation20_spill] sm:$0xff]  ;;  %v5413_v12 = vcombine.high %v8348_v33, %v8353_v43 }
 0x147   : > { %v5608_v28 = vadd.f32 %v5607_v15, %v5606_v54  ;;  %3737 = vmatmul.mubr.bf16.gmra.mrb[136].mxu0 %v5380_v0  ;;  %6193 = vmatprep.subr.bf16.mxu1 %v10684_v42  ;;  %v10690_v51 = vld [vmem:[#allocation24_spill] sm:$0xff]  ;;  %v10693_v15 = vld [vmem:[#allocation27_spill] sm:$0xff] }
 0x148   : > { %v8343_v22 = vadd.f32 %v5605_v27, %v1774_v16  ;;  %v1777_v32 = vadd.f32 %v5544_v52, %v1041_v59  ;;  %3834 = vmatmul.mubr.bf16.gmra.mrb[136].mxu1 %v5382_v34  ;;  %3744 = vmatprep.mubr.bf16.mxu0 %v5397_v25  ;;  %v5415_v25 = vcombine.high %v8361_v23, %v8366_v37  ;;  %v10689_v27 = vld [vmem:[#allocation23_spill] sm:$0xff]  ;;  %v3008_v52 = vld [vmem:[%s10456_s5 + $0x2c0] sm:$0xff]  ;;  %v10694_v42 = vld [vmem:[#allocation28_spill] sm:$0xff] }
 0x149   : > { %3841 = vmatprep.mubr.bf16.mxu1 %v5399_v61  ;;  %6130 = vmatpush3.bf16.msra.mxu0 %v10685_v10  ;;  %v10691_v61 = vld [vmem:[#allocation25_spill] sm:$0xff] }
 0x14a   : > { %v8356_v47 = vadd.f32 %v5608_v28, %v1777_v32  ;;  %v5625_v48 = vpop.f32.mrb[32].mxu0  ;;  %6194 = vmatpush3.bf16.msra.mxu1 %v10686_v3  ;;  %6131 = vmatprep.subr.bf16.mxu0 %v10687_v50  ;;  %v3009_v28 = vld [vmem:[%s10456_s5 + $0x2c8] sm:$0xff]  ;;  %v10695_v32 = vld [vmem:[#allocation29_spill] sm:$0xff]  ;;  %v5412_v3 = vcombine.low %v8348_v33, %v8353_v43  ;;  %v10698_v33 = vld [vmem:[#allocation32_spill] sm:$0xff] }
 0x14b   : > { %v5689_v62 = vpop.f32.mrb[32].mxu1  ;;  %v5626_v59 = vpop.f32.mrb[33].mxu0  ;;  %6195 = vmatprep.subr.bf16.mxu1 %v10688_v56  ;;  %v10696_v50 = vld [vmem:[#allocation30_spill] sm:$0xff]  ;;  %v5414_v56 = vcombine.low %v8361_v23, %v8366_v37  ;;  %v10699_v43 = vld [vmem:[#allocation33_spill] sm:$0xff] }
 0x14c   : > { %v5627_v5 = vadd.f32 %v5626_v59, %v5625_v48  ;;  %v5690_v6 = vpop.f32.mrb[33].mxu1  ;;  %v5628_v0 = vpop.f32.mrb[34].mxu0 }
 0x14d   : > { %v5691_v1 = vadd.f32 %v5690_v6, %v5689_v62  ;;  %v5692_v49 = vpop.f32.mrb[34].mxu1  ;;  %v5629_v34 = vpop.f32.mrb[35].mxu0  ;;  %6132 = vmatpush3.bf16.msra.mxu0 %v10689_v27 }
 0x14e   : > { %v1912_v53 = vadd.f32 %v5627_v5, %v8175_v40  ;;  %v5630_v45 = vadd.f32 %v5629_v34, %v5628_v0  ;;  %v5693_v54 = vpop.f32.mrb[35].mxu1  ;;  %6196 = vmatpush3.bf16.msra.mxu1 %v10690_v51  ;;  %6133 = vmatprep.subr.bf16.mxu0 %v10691_v61  ;;  %v3000_v40 = vld [vmem:[%s10456_s5 + $0x280] sm:$0xff]  ;;  %v3017_v61 = vld [vmem:[%s10456_s5 + $0x308] sm:$0xff] }
 0x14f   : > { %v5694_v63 = vadd.f32 %v5693_v54, %v5692_v49  ;;  %3745 = vmatmul.mubr.bf16.gmra.mrb[140].mxu0 %v5396_v38  ;;  %6197 = vmatprep.subr.bf16.mxu1 %v10692_v9  ;;  %v5429_v5 = vcombine.high %v3000_v40, %v3008_v52 }
 0x150   : > { %v8384_v29 = vadd.f32 %v5691_v1, %v1912_v53  ;;  %v1915_v16 = vadd.f32 %v5630_v45, %v8184_v30  ;;  %3842 = vmatmul.mubr.bf16.gmra.mrb[140].mxu1 %v5398_v11  ;;  %3752 = vmatprep.mubr.bf16.mxu0 %v5413_v12  ;;  %v3001_v30 = vld [vmem:[%s10456_s5 + $0x288] sm:$0xff]  ;;  %v10697_v1 = vld [vmem:[#allocation31_spill] sm:$0xff]  ;;  %v3024_v45 = vld [vmem:[%s10456_s5 + $0x340] sm:$0xff] }
 0x151   : > { %3849 = vmatprep.mubr.bf16.mxu1 %v5415_v25  ;;  %6134 = vmatpush3.bf16.msra.mxu0 %v10693_v15  ;;  %v5431_v12 = vcombine.high %v3001_v30, %v3009_v28  ;;  %v10700_v53 = vld [vmem:[#allocation34_spill] sm:$0xff] }
 0x152   : > { %v8394_v19 = vadd.f32 %v5694_v63, %v1915_v16  ;;  %v5631_v2 = vpop.f32.mrb[36].mxu0  ;;  %6198 = vmatpush3.bf16.msra.mxu1 %v10694_v42  ;;  %6135 = vmatprep.subr.bf16.mxu0 %v10695_v32  ;;  %v5428_v16 = vcombine.low %v3000_v40, %v3008_v52  ;;  %v5430_v32 = vcombine.low %v3001_v30, %v3009_v28  ;;  %v3032_v40 = vld [vmem:[%s10456_s5 + $0x380] sm:$0xff]  ;;  %v3033_v28 = vld [vmem:[%s10456_s5 + $0x388] sm:$0xff] }
 0x153   : > { %v5695_v10 = vpop.f32.mrb[36].mxu1  ;;  %v5632_v48 = vpop.f32.mrb[37].mxu0  ;;  %6199 = vmatprep.subr.bf16.mxu1 %v10696_v50  ;;  %v3040_v52 = vld [vmem:[%s10456_s5 + $0x3c0] sm:$0xff] }
 0x154   : > { %v5633_v62 = vadd.f32 %v5632_v48, %v5631_v2  ;;  %v5696_v59 = vpop.f32.mrb[37].mxu1  ;;  %v5634_v38 = vpop.f32.mrb[38].mxu0 }
 0x155   : > { %v5697_v6 = vadd.f32 %v5696_v59, %v5695_v10  ;;  %v5698_v0 = vpop.f32.mrb[38].mxu1  ;;  %v5635_v11 = vpop.f32.mrb[39].mxu0  ;;  %6136 = vmatpush3.bf16.msra.mxu0 %v10697_v1 }
 0x156   : > { %v1920_v49 = vadd.f32 %v5633_v62, %v8203_v46  ;;  %v5636_v34 = vadd.f32 %v5635_v11, %v5634_v38  ;;  %v5699_v25 = vpop.f32.mrb[39].mxu1  ;;  %6200 = vmatpush3.bf16.msra.mxu1 %v10698_v33  ;;  %6249 = vmatprep.subr.bf16.mxu0 %v10699_v43  ;;  %v3016_v46 = vld [vmem:[%s10456_s5 + $0x300] sm:$0xff]  ;;  %v5461_v43 = vcombine.high %v3032_v40, %v3040_v52 }
 0x157   : > { %v5700_v27 = vadd.f32 %v5699_v25, %v5698_v0  ;;  %3753 = vmatmul.mubr.bf16.gmra.mrb[144].mxu0 %v5412_v3  ;;  %6313 = vmatprep.subr.bf16.mxu1 %v10700_v53  ;;  %v5445_v10 = vcombine.high %v3016_v46, %v3024_v45  ;;  %v5444_v1 = vcombine.low %v3016_v46, %v3024_v45  ;;  %v2922_v46 = vld [vmem:[%s10456_s5 + $0x10] sm:$0xff] }
 0x158   : > { %v8414_v23 = vadd.f32 %v5697_v6, %v1920_v49  ;;  %v1923_v37 = vadd.f32 %v5636_v34, %v8211_v13  ;;  %3850 = vmatmul.mubr.bf16.gmra.mrb[144].mxu1 %v5414_v56  ;;  %3760 = vmatprep.mubr.bf16.mxu0 %v5429_v5  ;;  %v3025_v13 = vld [vmem:[%s10456_s5 + $0x348] sm:$0xff]  ;;  %v2930_v45 = vld [vmem:[%s10456_s5 + $0x50] sm:$0xff] }
 0x159   : > { %3857 = vmatprep.mubr.bf16.mxu1 %v5431_v12  ;;  %v5447_v62 = vcombine.high %v3017_v61, %v3025_v13  ;;  %v5446_v33 = vcombine.low %v3017_v61, %v3025_v13  ;;  %v2923_v13 = vld [vmem:[%s10456_s5 + $0x18] sm:$0xff] }
 0x15a   : > { %v8423_v54 = vadd.f32 %v5700_v27, %v1923_v37  ;;  %v5637_v51 = vpop.f32.mrb[40].mxu0 }
 0x15b   : > { %v5701_v63 = vpop.f32.mrb[40].mxu1  ;;  %v5638_v9 = vpop.f32.mrb[41].mxu0 }
 0x15c   : > { %v5639_v15 = vadd.f32 %v5638_v9, %v5637_v51  ;;  %v5702_v2 = vpop.f32.mrb[41].mxu1  ;;  %v5640_v42 = vpop.f32.mrb[42].mxu0 }
 0x15d   : > { %v5703_v48 = vadd.f32 %v5702_v2, %v5701_v63  ;;  %v5704_v3 = vpop.f32.mrb[42].mxu1  ;;  %v5641_v50 = vpop.f32.mrb[43].mxu0 }
 0x15e   : > { %v1928_v59 = vadd.f32 %v5639_v15, %v8219_v18  ;;  %v5642_v38 = vadd.f32 %v5641_v50, %v5640_v42  ;;  %v5705_v56 = vpop.f32.mrb[43].mxu1 }
 0x15f   : > { %v5706_v5 = vadd.f32 %v5705_v56, %v5704_v3  ;;  %3761 = vmatmul.mubr.bf16.gmra.mrb[148].mxu0 %v5428_v16 }
 0x160   : > { %v8432_v6 = vadd.f32 %v5703_v48, %v1928_v59  ;;  %v1931_v0 = vadd.f32 %v5642_v38, %v8227_v36  ;;  %3858 = vmatmul.mubr.bf16.gmra.mrb[148].mxu1 %v5430_v32  ;;  %3768 = vmatprep.mubr.bf16.mxu0 %v5445_v10  ;;  %v3041_v36 = vld [vmem:[%s10456_s5 + $0x3c8] sm:$0xff]  ;;  %v5460_v48 = vcombine.low %v3032_v40, %v3040_v52  ;;  %v2938_v40 = vld [vmem:[%s10456_s5 + $0x90] sm:$0xff] }
 0x161   : > { %3865 = vmatprep.mubr.bf16.mxu1 %v5447_v62  ;;  %v5463_v51 = vcombine.high %v3033_v28, %v3041_v36  ;;  %v5462_v59 = vcombine.low %v3033_v28, %v3041_v36  ;;  %v5353_v38 = vcombine.high %v2922_v46, %v2930_v45  ;;  %v2946_v52 = vld [vmem:[%s10456_s5 + $0xd0] sm:$0xff]  ;;  %v2939_v36 = vld [vmem:[%s10456_s5 + $0x98] sm:$0xff] }
 0x162   : > { %v8441_v18 = vadd.f32 %v5706_v5, %v1931_v0  ;;  %v5643_v30 = vpop.f32.mrb[44].mxu0 }
 0x163   : > { %v5707_v11 = vpop.f32.mrb[44].mxu1  ;;  %v5644_v12 = vpop.f32.mrb[45].mxu0 }
 0x164   : > { %v5645_v49 = vadd.f32 %v5644_v12, %v5643_v30  ;;  %v5708_v34 = vpop.f32.mrb[45].mxu1  ;;  %v5646_v25 = vpop.f32.mrb[46].mxu0 }
 0x165   : > { %v5709_v27 = vadd.f32 %v5708_v34, %v5707_v11  ;;  %v5710_v53 = vpop.f32.mrb[46].mxu1  ;;  %v5647_v37 = vpop.f32.mrb[47].mxu0 }
 0x166   : > { %v1936_v63 = vadd.f32 %v5645_v49, %v8235_v41  ;;  %v5648_v9 = vadd.f32 %v5647_v37, %v5646_v25  ;;  %v5711_v16 = vpop.f32.mrb[47].mxu1 }
 0x167   : > { %v5712_v15 = vadd.f32 %v5711_v16, %v5710_v53  ;;  %3769 = vmatmul.mubr.bf16.gmra.mrb[152].mxu0 %v5444_v1 }
 0x168   : > { %v8450_v2 = vadd.f32 %v5709_v27, %v1936_v63  ;;  %v1939_v42 = vadd.f32 %v5648_v9, %v8243_v58  ;;  %3866 = vmatmul.mubr.bf16.gmra.mrb[152].mxu1 %v5446_v33  ;;  %3776 = vmatprep.mubr.bf16.mxu0 %v5461_v43  ;;  %v2931_v58 = vld [vmem:[%s10456_s5 + $0x58] sm:$0xff]  ;;  %v5352_v27 = vcombine.low %v2922_v46, %v2930_v45  ;;  %v8492_v46 = vld [vmem:[%s10456_s5 + $0x110] sm:$0xff] }
 0x169   : > { %3873 = vmatprep.mubr.bf16.mxu1 %v5463_v51  ;;  %v5355_v30 = vcombine.high %v2923_v13, %v2931_v58  ;;  %v5354_v63 = vcombine.low %v2923_v13, %v2931_v58  ;;  %v5369_v9 = vcombine.high %v2938_v40, %v2946_v52  ;;  %v10701_v45 = vld [vmem:[#allocation35_spill] sm:$0xff] }
 0x16a   : > { %v8459_v41 = vadd.f32 %v5712_v15, %v1939_v42  ;;  %v5649_v61 = vpop.f32.mrb[48].mxu0 }
 0x16b   : > { %v5713_v32 = vpop.f32.mrb[48].mxu1  ;;  %v5650_v10 = vpop.f32.mrb[49].mxu0 }
 0x16c   : > { %v5651_v3 = vadd.f32 %v5650_v10, %v5649_v61  ;;  %v5714_v50 = vpop.f32.mrb[49].mxu1  ;;  %v5652_v62 = vpop.f32.mrb[50].mxu0 }
 0x16d   : > { %v5715_v56 = vadd.f32 %v5714_v50, %v5713_v32  ;;  %v5716_v5 = vpop.f32.mrb[50].mxu1  ;;  %v5653_v0 = vpop.f32.mrb[51].mxu0 }
 0x16e   : > { %v1944_v11 = vadd.f32 %v5651_v3, %v8251_v44  ;;  %v5654_v12 = vadd.f32 %v5653_v0, %v5652_v62  ;;  %v5717_v1 = vpop.f32.mrb[51].mxu1 }
 0x16f   : > { %v5718_v49 = vadd.f32 %v5717_v1, %v5716_v5  ;;  %3777 = vmatmul.mubr.bf16.gmra.mrb[156].mxu0 %v5460_v48 }
 0x170   : > { %v8468_v34 = vadd.f32 %v5715_v56, %v1944_v11  ;;  %v1947_v25 = vadd.f32 %v5654_v12, %v8259_v14  ;;  %3874 = vmatmul.mubr.bf16.gmra.mrb[156].mxu1 %v5462_v59  ;;  %3914 = vmatprep.mubr.bf16.mxu0 %v5353_v38  ;;  %v2947_v14 = vld [vmem:[%s10456_s5 + $0xd8] sm:$0xff]  ;;  %v10703_v56 = vld [vmem:[#allocation37_spill] sm:$0xff]  ;;  %v10704_v11 = vld [vmem:[#allocation38_spill] sm:$0xff] }
 0x171   : > { %4011 = vmatprep.mubr.bf16.mxu1 %v5355_v30  ;;  %v5371_v61 = vcombine.high %v2939_v36, %v2947_v14  ;;  %v8510_v59 = vld [vmem:[%s10456_s5 + $0x158] sm:$0xff]  ;;  %v5368_v30 = vcombine.low %v2938_v40, %v2946_v52 }
 0x172   : > { %v8477_v44 = vadd.f32 %v5718_v49, %v1947_v25  ;;  %v5655_v28 = vpop.f32.mrb[52].mxu0  ;;  %v10702_v38 = vld [vmem:[#allocation36_spill] sm:$0xff]  ;;  %v5370_v25 = vcombine.low %v2939_v36, %v2947_v14  ;;  %v10708_v14 = vld [vmem:[#allocation42_spill] sm:$0xff] }
 0x173   : > { %v5719_v33 = vpop.f32.mrb[52].mxu1  ;;  %v5656_v43 = vpop.f32.mrb[53].mxu0 }
 0x174   : > { %v5657_v53 = vadd.f32 %v5656_v43, %v5655_v28  ;;  %v5720_v37 = vpop.f32.mrb[53].mxu1  ;;  %v5658_v51 = vpop.f32.mrb[54].mxu0 }
 0x175   : > { %v5721_v16 = vadd.f32 %v5720_v37, %v5719_v33  ;;  %v5722_v15 = vpop.f32.mrb[54].mxu1  ;;  %v5659_v42 = vpop.f32.mrb[55].mxu0  ;;  %v10705_v37 = vld [vmem:[#allocation39_spill] sm:$0xff] }
 0x176   : > { %v1952_v32 = vadd.f32 %v5657_v53, %v8267_v31  ;;  %v5660_v10 = vadd.f32 %v5659_v42, %v5658_v51  ;;  %v5723_v48 = vpop.f32.mrb[55].mxu1  ;;  %v8497_v31 = vld [vmem:[%s10456_s5 + $0x150] sm:$0xff] }
 0x177   : > { %v5724_v3 = vadd.f32 %v5723_v48, %v5722_v15  ;;  %3915 = vmatmul.mubr.bf16.vlgmr.msra.gmra.mrb[160].mxu0 %v5352_v27  ;;  %v5385_v28 = vcombine.high %v8492_v46, %v8497_v31  ;;  %v8535_v42 = vld [vmem:[%s10456_s5 + $0x1d0] sm:$0xff]  ;;  %v8548_v48 = vld [vmem:[%s10456_s5 + $0x1d8] sm:$0xff] }
 0x178   : > { %v8486_v50 = vadd.f32 %v5721_v16, %v1952_v32  ;;  %v1955_v62 = vadd.f32 %v5660_v10, %v8280_v7  ;;  %4012 = vmatmul.mubr.bf16.vlgmr.msra.gmra.mrb[160].mxu1 %v5354_v63  ;;  %3922 = vmatprep.mubr.bf16.mxu0 %v5369_v9  ;;  %v8505_v7 = vld [vmem:[%s10456_s5 + $0x118] sm:$0xff]  ;;  %v10707_v9 = vld [vmem:[#allocation41_spill] sm:$0xff] }
 0x179   : > { %4019 = vmatprep.mubr.bf16.mxu1 %v5371_v61  ;;  %6250 = vmatpush3.bf16.msra.mxu0 %v10701_v45  ;;  %v5387_v53 = vcombine.high %v8505_v7, %v8510_v59  ;;  %v10706_v63 = vld [vmem:[#allocation40_spill] sm:$0xff]  ;;  %v10709_v61 = vld [vmem:[#allocation43_spill] sm:$0xff] }
 0x17a   : > { %v8500_v13 = vadd.f32 %v5724_v3, %v1955_v62  ;;  %v5661_v58 = vpop.f32.mrb[56].mxu0  ;;  %6314 = vmatpush3.bf16.msra.mxu1 %v10702_v38  ;;  %6251 = vmatprep.subr.bf16.mxu0 %v10703_v56  ;;  %v10710_v3 = vld [vmem:[#allocation44_spill] sm:$0xff]  ;;  %v10711_v62 = vld [vmem:[#allocation45_spill] sm:$0xff]  ;;  %v5384_v38 = vcombine.low %v8492_v46, %v8497_v31  ;;  %v10712_v56 = vld [vmem:[#allocation46_spill] sm:$0xff] }
 0x17b   : > { %v5725_v5 = vpop.f32.mrb[56].mxu1  ;;  %v5662_v0 = vpop.f32.mrb[57].mxu0  ;;  %6315 = vmatprep.subr.bf16.mxu1 %v10704_v11  ;;  %v5386_v11 = vcombine.low %v8505_v7, %v8510_v59  ;;  %v10716_v59 = vld [vmem:[#allocation50_spill] sm:$0xff] }
 0x17c   : > { %v5663_v12 = vadd.f32 %v5662_v0, %v5661_v58  ;;  %v5726_v1 = vpop.f32.mrb[57].mxu1  ;;  %v5664_v49 = vpop.f32.mrb[58].mxu0 }
 0x17d   : > { %v5727_v33 = vadd.f32 %v5726_v1, %v5725_v5  ;;  %v5728_v43 = vpop.f32.mrb[58].mxu1  ;;  %v5665_v27 = vpop.f32.mrb[59].mxu0  ;;  %6252 = vmatpush3.bf16.msra.mxu0 %v10705_v37 }
 0x17e   : > { %v1960_v51 = vadd.f32 %v5663_v12, %v8303_v24  ;;  %v5666_v40 = vadd.f32 %v5665_v27, %v5664_v49  ;;  %v5729_v52 = vpop.f32.mrb[59].mxu1  ;;  %6316 = vmatpush3.bf16.msra.mxu1 %v10706_v63  ;;  %6253 = vmatprep.subr.bf16.mxu0 %v10707_v9  ;;  %v8530_v24 = vld [vmem:[%s10456_s5 + $0x190] sm:$0xff]  ;;  %v10714_v27 = vld [vmem:[#allocation48_spill] sm:$0xff] }
 0x17f   : > { %v5730_v36 = vadd.f32 %v5729_v52, %v5728_v43  ;;  %3923 = vmatmul.mubr.bf16.gmra.mrb[164].mxu0 %v5368_v30  ;;  %6317 = vmatprep.subr.bf16.mxu1 %v10708_v14  ;;  %v5401_v12 = vcombine.high %v8530_v24, %v8535_v42  ;;  %v10717_v52 = vld [vmem:[#allocation51_spill] sm:$0xff]  ;;  %v10718_v14 = vld [vmem:[#allocation52_spill] sm:$0xff] }
 0x180   : > { %v8524_v16 = vadd.f32 %v5727_v33, %v1960_v51  ;;  %v1963_v15 = vadd.f32 %v5666_v40, %v8316_v57  ;;  %4020 = vmatmul.mubr.bf16.gmra.mrb[164].mxu1 %v5370_v25  ;;  %3930 = vmatprep.mubr.bf16.mxu0 %v5385_v28  ;;  %v8543_v57 = vld [vmem:[%s10456_s5 + $0x198] sm:$0xff]  ;;  %v10713_v33 = vld [vmem:[#allocation47_spill] sm:$0xff] }
 0x181   : > { %4027 = vmatprep.mubr.bf16.mxu1 %v5387_v53  ;;  %6254 = vmatpush3.bf16.msra.mxu0 %v10709_v61  ;;  %v5403_v28 = vcombine.high %v8543_v57, %v8548_v48  ;;  %v10715_v53 = vld [vmem:[#allocation49_spill] sm:$0xff]  ;;  %v8577_v40 = vld [vmem:[%s10456_s5 + $0x250] sm:$0xff] }
 0x182   : > { %v8538_v32 = vadd.f32 %v5730_v36, %v1963_v15  ;;  %v5667_v10 = vpop.f32.mrb[60].mxu0  ;;  %6318 = vmatpush3.bf16.msra.mxu1 %v10710_v3  ;;  %6255 = vmatprep.subr.bf16.mxu0 %v10711_v62  ;;  %v8590_v36 = vld [vmem:[%s10456_s5 + $0x258] sm:$0xff]  ;;  %v10719_v15 = vld [vmem:[#allocation53_spill] sm:$0xff]  ;;  %v5400_v3 = vcombine.low %v8530_v24, %v8535_v42  ;;  %v10720_v62 = vld [vmem:[#allocation54_spill] sm:$0xff] }
 0x183   : > { %v5731_v45 = vpop.f32.mrb[60].mxu1  ;;  %v5668_v58 = vpop.f32.mrb[61].mxu0  ;;  %6319 = vmatprep.subr.bf16.mxu1 %v10712_v56  ;;  %v5402_v56 = vcombine.low %v8543_v57, %v8548_v48  ;;  %v10724_v48 = vld [vmem:[#allocation58_spill] sm:$0xff] }
 0x184   : > { %v5669_v5 = vadd.f32 %v5668_v58, %v5667_v10  ;;  %v5732_v0 = vpop.f32.mrb[61].mxu1  ;;  %v5670_v30 = vpop.f32.mrb[62].mxu0 }
 0x185   : > { %v5733_v1 = vadd.f32 %v5732_v0, %v5731_v45  ;;  %v5734_v49 = vpop.f32.mrb[62].mxu1  ;;  %v5671_v25 = vpop.f32.mrb[63].mxu0  ;;  %6256 = vmatpush3.bf16.msra.mxu0 %v10713_v33 }
 0x186   : > { %v1968_v46 = vadd.f32 %v5669_v5, %v8343_v22  ;;  %v5672_v31 = vadd.f32 %v5671_v25, %v5670_v30  ;;  %v5735_v43 = vpop.f32.mrb[63].mxu1  ;;  %6320 = vmatpush3.bf16.msra.mxu1 %v10714_v27  ;;  %6257 = vmatprep.subr.bf16.mxu0 %v10715_v53  ;;  %v8572_v22 = vld [vmem:[%s10456_s5 + $0x210] sm:$0xff]  ;;  %v10722_v25 = vld [vmem:[#allocation56_spill] sm:$0xff] }
 0x187   : > { %v5736_v7 = vadd.f32 %v5735_v43, %v5734_v49  ;;  %3931 = vmatmul.mubr.bf16.gmra.mrb[168].mxu0 %v5384_v38  ;;  %6321 = vmatprep.subr.bf16.mxu1 %v10716_v59  ;;  %v5417_v5 = vcombine.high %v8572_v22, %v8577_v40  ;;  %v10725_v43 = vld [vmem:[#allocation59_spill] sm:$0xff]  ;;  %v10726_v59 = vld [vmem:[#allocation60_spill] sm:$0xff] }
 0x188   : > { %v8566_v37 = vadd.f32 %v5733_v1, %v1968_v46  ;;  %v1971_v51 = vadd.f32 %v5672_v31, %v8356_v47  ;;  %4028 = vmatmul.mubr.bf16.gmra.mrb[168].mxu1 %v5386_v11  ;;  %3938 = vmatprep.mubr.bf16.mxu0 %v5401_v12  ;;  %v8585_v47 = vld [vmem:[%s10456_s5 + $0x218] sm:$0xff]  ;;  %v10721_v1 = vld [vmem:[#allocation55_spill] sm:$0xff] }
 0x189   : > { %4035 = vmatprep.mubr.bf16.mxu1 %v5403_v28  ;;  %6258 = vmatpush3.bf16.msra.mxu0 %v10717_v52  ;;  %v5419_v12 = vcombine.high %v8585_v47, %v8590_v36  ;;  %v10723_v28 = vld [vmem:[#allocation57_spill] sm:$0xff]  ;;  %v3010_v31 = vld [vmem:[%s10456_s5 + $0x2d0] sm:$0xff] }
 0x18a   : > { %v8580_v63 = vadd.f32 %v5736_v7, %v1971_v51  ;;  %v5753_v9 = vpop.f32.mrb[64].mxu0  ;;  %6322 = vmatpush3.bf16.msra.mxu1 %v10718_v14  ;;  %6259 = vmatprep.subr.bf16.mxu0 %v10719_v15  ;;  %v3011_v7 = vld [vmem:[%s10456_s5 + $0x2d8] sm:$0xff]  ;;  %v10727_v51 = vld [vmem:[#allocation61_spill] sm:$0xff]  ;;  %v5416_v14 = vcombine.low %v8572_v22, %v8577_v40  ;;  %v10728_v15 = vld [vmem:[#allocation62_spill] sm:$0xff] }
 0x18b   : > { %v5817_v61 = vpop.f32.mrb[64].mxu1  ;;  %v5754_v10 = vpop.f32.mrb[65].mxu0  ;;  %6323 = vmatprep.subr.bf16.mxu1 %v10720_v62  ;;  %v5418_v62 = vcombine.low %v8585_v47, %v8590_v36  ;;  %v10730_v22 = vld [vmem:[#allocation64_spill] sm:$0xff]  ;;  %v10731_v40 = vld [vmem:[#allocation65_spill] sm:$0xff] }
 0x18c   : > { %v5755_v45 = vadd.f32 %v5754_v10, %v5753_v9  ;;  %v5818_v58 = vpop.f32.mrb[65].mxu1  ;;  %v5756_v38 = vpop.f32.mrb[66].mxu0 }
 0x18d   : > { %v5819_v0 = vadd.f32 %v5818_v58, %v5817_v61  ;;  %v5820_v30 = vpop.f32.mrb[66].mxu1  ;;  %v5757_v11 = vpop.f32.mrb[67].mxu0  ;;  %6260 = vmatpush3.bf16.msra.mxu0 %v10721_v1 }
 0x18e   : > { %v2106_v24 = vadd.f32 %v5755_v45, %v8384_v29  ;;  %v5758_v42 = vadd.f32 %v5757_v11, %v5756_v38  ;;  %v5821_v49 = vpop.f32.mrb[67].mxu1  ;;  %6324 = vmatpush3.bf16.msra.mxu1 %v10722_v25  ;;  %6261 = vmatprep.subr.bf16.mxu0 %v10723_v28  ;;  %v3002_v29 = vld [vmem:[%s10456_s5 + $0x290] sm:$0xff]  ;;  %v3019_v28 = vld [vmem:[%s10456_s5 + $0x318] sm:$0xff] }
 0x18f   : > { %v5822_v57 = vadd.f32 %v5821_v49, %v5820_v30  ;;  %3939 = vmatmul.mubr.bf16.gmra.mrb[172].mxu0 %v5400_v3  ;;  %6325 = vmatprep.subr.bf16.mxu1 %v10724_v48  ;;  %v5433_v45 = vcombine.high %v3002_v29, %v3010_v31 }
 0x190   : > { %v8608_v33 = vadd.f32 %v5819_v0, %v2106_v24  ;;  %v2109_v46 = vadd.f32 %v5758_v42, %v8394_v19  ;;  %4036 = vmatmul.mubr.bf16.gmra.mrb[172].mxu1 %v5402_v56  ;;  %3946 = vmatprep.mubr.bf16.mxu0 %v5417_v5  ;;  %v3003_v19 = vld [vmem:[%s10456_s5 + $0x298] sm:$0xff]  ;;  %v10729_v0 = vld [vmem:[#allocation63_spill] sm:$0xff]  ;;  %v10732_v24 = vld [vmem:[#allocation66_spill] sm:$0xff] }
 0x191   : > { %4043 = vmatprep.mubr.bf16.mxu1 %v5419_v12  ;;  %6262 = vmatpush3.bf16.msra.mxu0 %v10725_v43  ;;  %v5435_v5 = vcombine.high %v3003_v19, %v3011_v7  ;;  %v3026_v42 = vld [vmem:[%s10456_s5 + $0x350] sm:$0xff] }
 0x192   : > { %v8618_v27 = vadd.f32 %v5822_v57, %v2109_v46  ;;  %v5759_v53 = vpop.f32.mrb[68].mxu0  ;;  %6326 = vmatpush3.bf16.msra.mxu1 %v10726_v59  ;;  %6263 = vmatprep.subr.bf16.mxu0 %v10727_v51  ;;  %v5432_v46 = vcombine.low %v3002_v29, %v3010_v31  ;;  %v5434_v51 = vcombine.low %v3003_v19, %v3011_v7  ;;  %v3034_v29 = vld [vmem:[%s10456_s5 + $0x390] sm:$0xff]  ;;  %v3035_v7 = vld [vmem:[%s10456_s5 + $0x398] sm:$0xff] }
 0x193   : > { %v5823_v52 = vpop.f32.mrb[68].mxu1  ;;  %v5760_v9 = vpop.f32.mrb[69].mxu0  ;;  %6327 = vmatprep.subr.bf16.mxu1 %v10728_v15  ;;  %v3042_v31 = vld [vmem:[%s10456_s5 + $0x3d0] sm:$0xff] }
 0x194   : > { %v5761_v61 = vadd.f32 %v5760_v9, %v5759_v53  ;;  %v5824_v10 = vpop.f32.mrb[69].mxu1  ;;  %v5762_v3 = vpop.f32.mrb[70].mxu0 }
 0x195   : > { %v5825_v58 = vadd.f32 %v5824_v10, %v5823_v52  ;;  %v5826_v38 = vpop.f32.mrb[70].mxu1  ;;  %v5763_v56 = vpop.f32.mrb[71].mxu0  ;;  %6264 = vmatpush3.bf16.msra.mxu0 %v10729_v0 }
 0x196   : > { %v2114_v30 = vadd.f32 %v5761_v61, %v8414_v23  ;;  %v5764_v11 = vadd.f32 %v5763_v56, %v5762_v3  ;;  %v5827_v12 = vpop.f32.mrb[71].mxu1  ;;  %6328 = vmatpush3.bf16.msra.mxu1 %v10730_v22  ;;  %6377 = vmatprep.subr.bf16.mxu0 %v10731_v40  ;;  %v3018_v23 = vld [vmem:[%s10456_s5 + $0x310] sm:$0xff]  ;;  %v5465_v40 = vcombine.high %v3034_v29, %v3042_v31 }
 0x197   : > { %v5828_v1 = vadd.f32 %v5827_v12, %v5826_v38  ;;  %3947 = vmatmul.mubr.bf16.gmra.mrb[176].mxu0 %v5416_v14  ;;  %6441 = vmatprep.subr.bf16.mxu1 %v10732_v24  ;;  %v5449_v52 = vcombine.high %v3018_v23, %v3026_v42  ;;  %v5448_v0 = vcombine.low %v3018_v23, %v3026_v42  ;;  %v2924_v23 = vld [vmem:[%s10456_s5 + $0x20] sm:$0xff] }
 0x198   : > { %v8638_v47 = vadd.f32 %v5825_v58, %v2114_v30  ;;  %v2117_v36 = vadd.f32 %v5764_v11, %v8423_v54  ;;  %4044 = vmatmul.mubr.bf16.gmra.mrb[176].mxu1 %v5418_v62  ;;  %3954 = vmatprep.mubr.bf16.mxu0 %v5433_v45  ;;  %v3027_v54 = vld [vmem:[%s10456_s5 + $0x358] sm:$0xff]  ;;  %v2932_v42 = vld [vmem:[%s10456_s5 + $0x60] sm:$0xff] }
 0x199   : > { %4051 = vmatprep.mubr.bf16.mxu1 %v5435_v5  ;;  %v5451_v61 = vcombine.high %v3019_v28, %v3027_v54  ;;  %v5450_v22 = vcombine.low %v3019_v28, %v3027_v54  ;;  %v2925_v54 = vld [vmem:[%s10456_s5 + $0x28] sm:$0xff] }
 0x19a   : > { %v8647_v49 = vadd.f32 %v5828_v1, %v2117_v36  ;;  %v5765_v25 = vpop.f32.mrb[72].mxu0 }
 0x19b   : > { %v5829_v57 = vpop.f32.mrb[72].mxu1  ;;  %v5766_v48 = vpop.f32.mrb[73].mxu0 }
 0x19c   : > { %v5767_v43 = vadd.f32 %v5766_v48, %v5765_v25  ;;  %v5830_v53 = vpop.f32.mrb[73].mxu1  ;;  %v5768_v59 = vpop.f32.mrb[74].mxu0 }
 0x19d   : > { %v5831_v9 = vadd.f32 %v5830_v53, %v5829_v57  ;;  %v5832_v14 = vpop.f32.mrb[74].mxu1  ;;  %v5769_v15 = vpop.f32.mrb[75].mxu0 }
 0x19e   : > { %v2122_v10 = vadd.f32 %v5767_v43, %v8432_v6  ;;  %v5770_v3 = vadd.f32 %v5769_v15, %v5768_v59  ;;  %v5833_v62 = vpop.f32.mrb[75].mxu1 }
 0x19f   : > { %v5834_v45 = vadd.f32 %v5833_v62, %v5832_v14  ;;  %3955 = vmatmul.mubr.bf16.gmra.mrb[180].mxu0 %v5432_v46 }
 0x1a0   : > { %v8656_v58 = vadd.f32 %v5831_v9, %v2122_v10  ;;  %v2125_v38 = vadd.f32 %v5770_v3, %v8441_v18  ;;  %4052 = vmatmul.mubr.bf16.gmra.mrb[180].mxu1 %v5434_v51  ;;  %3962 = vmatprep.mubr.bf16.mxu0 %v5449_v52  ;;  %v3043_v18 = vld [vmem:[%s10456_s5 + $0x3d8] sm:$0xff]  ;;  %v5464_v9 = vcombine.low %v3034_v29, %v3042_v31  ;;  %v2940_v29 = vld [vmem:[%s10456_s5 + $0xa0] sm:$0xff] }
 0x1a1   : > { %4059 = vmatprep.mubr.bf16.mxu1 %v5451_v61  ;;  %v5467_v25 = vcombine.high %v3035_v7, %v3043_v18  ;;  %v5466_v10 = vcombine.low %v3035_v7, %v3043_v18  ;;  %v5357_v3 = vcombine.high %v2924_v23, %v2932_v42  ;;  %v2948_v31 = vld [vmem:[%s10456_s5 + $0xe0] sm:$0xff]  ;;  %v2941_v18 = vld [vmem:[%s10456_s5 + $0xa8] sm:$0xff] }
 0x1a2   : > { %v8665_v6 = vadd.f32 %v5834_v45, %v2125_v38  ;;  %v5771_v19 = vpop.f32.mrb[76].mxu0 }
 0x1a3   : > { %v5835_v56 = vpop.f32.mrb[76].mxu1  ;;  %v5772_v5 = vpop.f32.mrb[77].mxu0 }
 0x1a4   : > { %v5773_v30 = vadd.f32 %v5772_v5, %v5771_v19  ;;  %v5836_v11 = vpop.f32.mrb[77].mxu1  ;;  %v5774_v12 = vpop.f32.mrb[78].mxu0 }
 0x1a5   : > { %v5837_v1 = vadd.f32 %v5836_v11, %v5835_v56  ;;  %v5838_v24 = vpop.f32.mrb[78].mxu1  ;;  %v5775_v36 = vpop.f32.mrb[79].mxu0 }
 0x1a6   : > { %v2130_v57 = vadd.f32 %v5773_v30, %v8450_v2  ;;  %v5776_v48 = vadd.f32 %v5775_v36, %v5774_v12  ;;  %v5839_v46 = vpop.f32.mrb[79].mxu1 }
 0x1a7   : > { %v5840_v43 = vadd.f32 %v5839_v46, %v5838_v24  ;;  %3963 = vmatmul.mubr.bf16.gmra.mrb[184].mxu0 %v5448_v0 }
 0x1a8   : > { %v8674_v53 = vadd.f32 %v5837_v1, %v2130_v57  ;;  %v2133_v59 = vadd.f32 %v5776_v48, %v8459_v41  ;;  %4060 = vmatmul.mubr.bf16.gmra.mrb[184].mxu1 %v5450_v22  ;;  %3970 = vmatprep.mubr.bf16.mxu0 %v5465_v40  ;;  %v2933_v41 = vld [vmem:[%s10456_s5 + $0x68] sm:$0xff]  ;;  %v5356_v1 = vcombine.low %v2924_v23, %v2932_v42  ;;  %v8716_v23 = vld [vmem:[%s10456_s5 + $0x120] sm:$0xff]  ;;  %v10733_v42 = vld [vmem:[#allocation67_spill] sm:$0xff] }
 0x1a9   : > { %4067 = vmatprep.mubr.bf16.mxu1 %v5467_v25  ;;  %v5359_v19 = vcombine.high %v2925_v54, %v2933_v41  ;;  %v5358_v57 = vcombine.low %v2925_v54, %v2933_v41  ;;  %v5373_v48 = vcombine.high %v2940_v29, %v2948_v31 }
 0x1aa   : > { %v8683_v2 = vadd.f32 %v5840_v43, %v2133_v59  ;;  %v5777_v28 = vpop.f32.mrb[80].mxu0 }
 0x1ab   : > { %v5841_v51 = vpop.f32.mrb[80].mxu1  ;;  %v5778_v52 = vpop.f32.mrb[81].mxu0 }
 0x1ac   : > { %v5779_v14 = vadd.f32 %v5778_v52, %v5777_v28  ;;  %v5842_v15 = vpop.f32.mrb[81].mxu1  ;;  %v5780_v61 = vpop.f32.mrb[82].mxu0 }
 0x1ad   : > { %v5843_v62 = vadd.f32 %v5842_v15, %v5841_v51  ;;  %v5844_v45 = vpop.f32.mrb[82].mxu1  ;;  %v5781_v38 = vpop.f32.mrb[83].mxu0 }
 0x1ae   : > { %v2138_v56 = vadd.f32 %v5779_v14, %v8468_v34  ;;  %v5782_v5 = vadd.f32 %v5781_v38, %v5780_v61  ;;  %v5845_v0 = vpop.f32.mrb[83].mxu1 }
 0x1af   : > { %v5846_v30 = vadd.f32 %v5845_v0, %v5844_v45  ;;  %3971 = vmatmul.mubr.bf16.gmra.mrb[188].mxu0 %v5464_v9 }
 0x1b0   : > { %v8692_v11 = vadd.f32 %v5843_v62, %v2138_v56  ;;  %v2141_v12 = vadd.f32 %v5782_v5, %v8477_v44  ;;  %4068 = vmatmul.mubr.bf16.gmra.mrb[188].mxu1 %v5466_v10  ;;  %4108 = vmatprep.mubr.bf16.mxu0 %v5357_v3  ;;  %v2949_v44 = vld [vmem:[%s10456_s5 + $0xe8] sm:$0xff]  ;;  %v10734_v3 = vld [vmem:[#allocation68_spill] sm:$0xff]  ;;  %v10735_v62 = vld [vmem:[#allocation69_spill] sm:$0xff] }
 0x1b1   : > { %4205 = vmatprep.mubr.bf16.mxu1 %v5359_v19  ;;  %v5375_v28 = vcombine.high %v2941_v18, %v2949_v44  ;;  %v8734_v10 = vld [vmem:[%s10456_s5 + $0x168] sm:$0xff]  ;;  %v5372_v19 = vcombine.low %v2940_v29, %v2948_v31 }
 0x1b2   : > { %v8701_v34 = vadd.f32 %v5846_v30, %v2141_v12  ;;  %v5783_v7 = vpop.f32.mrb[84].mxu0  ;;  %v10736_v56 = vld [vmem:[#allocation70_spill] sm:$0xff]  ;;  %v5374_v12 = vcombine.low %v2941_v18, %v2949_v44 }
 0x1b3   : > { %v5847_v22 = vpop.f32.mrb[84].mxu1  ;;  %v5784_v40 = vpop.f32.mrb[85].mxu0  ;;  %v10740_v44 = vld [vmem:[#allocation74_spill] sm:$0xff] }
 0x1b4   : > { %v5785_v24 = vadd.f32 %v5784_v40, %v5783_v7  ;;  %v5848_v36 = vpop.f32.mrb[85].mxu1  ;;  %v5786_v25 = vpop.f32.mrb[86].mxu0 }
 0x1b5   : > { %v5849_v46 = vadd.f32 %v5848_v36, %v5847_v22  ;;  %v5850_v43 = vpop.f32.mrb[86].mxu1  ;;  %v5787_v59 = vpop.f32.mrb[87].mxu0  ;;  %v10737_v36 = vld [vmem:[#allocation71_spill] sm:$0xff] }
 0x1b6   : > { %v2146_v51 = vadd.f32 %v5785_v24, %v8486_v50  ;;  %v5788_v52 = vadd.f32 %v5787_v59, %v5786_v25  ;;  %v5851_v9 = vpop.f32.mrb[87].mxu1  ;;  %v8721_v50 = vld [vmem:[%s10456_s5 + $0x160] sm:$0xff] }
 0x1b7   : > { %v5852_v14 = vadd.f32 %v5851_v9, %v5850_v43  ;;  %4109 = vmatmul.mubr.bf16.vlgmr.msra.gmra.mrb[192].mxu0 %v5356_v1  ;;  %v5389_v7 = vcombine.high %v8716_v23, %v8721_v50  ;;  %v8759_v59 = vld [vmem:[%s10456_s5 + $0x1e0] sm:$0xff]  ;;  %v8772_v9 = vld [vmem:[%s10456_s5 + $0x1e8] sm:$0xff] }
 0x1b8   : > { %v8710_v15 = vadd.f32 %v5849_v46, %v2146_v51  ;;  %v2149_v61 = vadd.f32 %v5788_v52, %v8500_v13  ;;  %4206 = vmatmul.mubr.bf16.vlgmr.msra.gmra.mrb[192].mxu1 %v5358_v57  ;;  %4116 = vmatprep.mubr.bf16.mxu0 %v5373_v48  ;;  %v8729_v13 = vld [vmem:[%s10456_s5 + $0x128] sm:$0xff]  ;;  %v10738_v57 = vld [vmem:[#allocation72_spill] sm:$0xff]  ;;  %v10739_v48 = vld [vmem:[#allocation73_spill] sm:$0xff] }
 0x1b9   : > { %4213 = vmatprep.mubr.bf16.mxu1 %v5375_v28  ;;  %6378 = vmatpush3.bf16.msra.mxu0 %v10733_v42  ;;  %v5391_v24 = vcombine.high %v8729_v13, %v8734_v10  ;;  %v10742_v28 = vld [vmem:[#allocation75_spill] sm:$0xff] }
 0x1ba   : > { %v8724_v54 = vadd.f32 %v5852_v14, %v2149_v61  ;;  %v5789_v41 = vpop.f32.mrb[88].mxu0  ;;  %6442 = vmatpush3.bf16.msra.mxu1 %v10734_v3  ;;  %6379 = vmatprep.subr.bf16.mxu0 %v10735_v62  ;;  %v10744_v14 = vld [vmem:[#allocation76_spill] sm:$0xff]  ;;  %v10745_v61 = vld [vmem:[#allocation77_spill] sm:$0xff]  ;;  %v5388_v3 = vcombine.low %v8716_v23, %v8721_v50  ;;  %v10746_v62 = vld [vmem:[#allocation78_spill] sm:$0xff] }
 0x1bb   : > { %v5853_v45 = vpop.f32.mrb[88].mxu1  ;;  %v5790_v38 = vpop.f32.mrb[89].mxu0  ;;  %6443 = vmatprep.subr.bf16.mxu1 %v10736_v56  ;;  %v5390_v56 = vcombine.low %v8729_v13, %v8734_v10  ;;  %v10750_v10 = vld [vmem:[#allocation82_spill] sm:$0xff] }
 0x1bc   : > { %v5791_v5 = vadd.f32 %v5790_v38, %v5789_v41  ;;  %v5854_v0 = vpop.f32.mrb[89].mxu1  ;;  %v5792_v30 = vpop.f32.mrb[90].mxu0 }
 0x1bd   : > { %v5855_v22 = vadd.f32 %v5854_v0, %v5853_v45  ;;  %v5856_v40 = vpop.f32.mrb[90].mxu1  ;;  %v5793_v1 = vpop.f32.mrb[91].mxu0  ;;  %6380 = vmatpush3.bf16.msra.mxu0 %v10737_v36 }
 0x1be   : > { %v2154_v25 = vadd.f32 %v5791_v5, %v8524_v16  ;;  %v5794_v29 = vadd.f32 %v5793_v1, %v5792_v30  ;;  %v5857_v31 = vpop.f32.mrb[91].mxu1  ;;  %6444 = vmatpush3.bf16.msra.mxu1 %v10738_v57  ;;  %6381 = vmatprep.subr.bf16.mxu0 %v10739_v48  ;;  %v8754_v16 = vld [vmem:[%s10456_s5 + $0x1a0] sm:$0xff]  ;;  %v10748_v1 = vld [vmem:[#allocation80_spill] sm:$0xff] }
 0x1bf   : > { %v5858_v18 = vadd.f32 %v5857_v31, %v5856_v40  ;;  %4117 = vmatmul.mubr.bf16.gmra.mrb[196].mxu0 %v5372_v19  ;;  %6445 = vmatprep.subr.bf16.mxu1 %v10740_v44  ;;  %v5405_v5 = vcombine.high %v8754_v16, %v8759_v59  ;;  %v10752_v31 = vld [vmem:[#allocation83_spill] sm:$0xff]  ;;  %v10754_v44 = vld [vmem:[#allocation84_spill] sm:$0xff] }
 0x1c0   : > { %v8748_v46 = vadd.f32 %v5855_v22, %v2154_v25  ;;  %v2157_v43 = vadd.f32 %v5794_v29, %v8538_v32  ;;  %4214 = vmatmul.mubr.bf16.gmra.mrb[196].mxu1 %v5374_v12  ;;  %4124 = vmatprep.mubr.bf16.mxu0 %v5389_v7  ;;  %v8767_v32 = vld [vmem:[%s10456_s5 + $0x1a8] sm:$0xff]  ;;  %v10747_v22 = vld [vmem:[#allocation79_spill] sm:$0xff]  ;;  %v8801_v29 = vld [vmem:[%s10456_s5 + $0x260] sm:$0xff] }
 0x1c1   : > { %4221 = vmatprep.mubr.bf16.mxu1 %v5391_v24  ;;  %6382 = vmatpush3.bf16.msra.mxu0 %v10742_v28  ;;  %v5407_v7 = vcombine.high %v8767_v32, %v8772_v9  ;;  %v10749_v24 = vld [vmem:[#allocation81_spill] sm:$0xff] }
 0x1c2   : > { %10741 = vst [vmem:[#allocation5_spill] sm:$0xff] %v8748_v46  ;;  %v8762_v51 = vadd.f32 %v5858_v18, %v2157_v43  ;;  %v5795_v52 = vpop.f32.mrb[92].mxu0  ;;  %6446 = vmatpush3.bf16.msra.mxu1 %v10744_v14  ;;  %6383 = vmatprep.subr.bf16.mxu0 %v10745_v61  ;;  %v8814_v18 = vld [vmem:[%s10456_s5 + $0x268] sm:$0xff]  ;;  %v10755_v43 = vld [vmem:[#allocation85_spill] sm:$0xff]  ;;  %v5404_v14 = vcombine.low %v8754_v16, %v8759_v59 }
 0x1c3   : > { %v5859_v42 = vpop.f32.mrb[92].mxu1  ;;  %v5796_v41 = vpop.f32.mrb[93].mxu0  ;;  %6447 = vmatprep.subr.bf16.mxu1 %v10746_v62  ;;  %v10756_v61 = vld [vmem:[#allocation86_spill] sm:$0xff]  ;;  %v5406_v62 = vcombine.low %v8767_v32, %v8772_v9  ;;  %v8833_v16 = vld [vmem:[%s10456_s5 + $0x2e0] sm:$0xff] }
 0x1c4   : > { %10743 = vst [vmem:[#allocation6_spill] sm:$0xff] %v8762_v51  ;;  %v5797_v45 = vadd.f32 %v5796_v41, %v5795_v52  ;;  %v5860_v38 = vpop.f32.mrb[93].mxu1  ;;  %v5798_v19 = vpop.f32.mrb[94].mxu0  ;;  %v8840_v32 = vld [vmem:[%s10456_s5 + $0x2a8] sm:$0xff] }
 0x1c5   : > { %v5861_v0 = vadd.f32 %v5860_v38, %v5859_v42  ;;  %v5862_v30 = vpop.f32.mrb[94].mxu1  ;;  %v5799_v12 = vpop.f32.mrb[95].mxu0  ;;  %6384 = vmatpush3.bf16.msra.mxu0 %v10747_v22  ;;  %v8828_v38 = vld [vmem:[%s10456_s5 + $0x2a0] sm:$0xff] }
 0x1c6   : > { %v2162_v23 = vadd.f32 %v5797_v45, %v8566_v37  ;;  %v5800_v50 = vadd.f32 %v5799_v12, %v5798_v19  ;;  %v5863_v40 = vpop.f32.mrb[95].mxu1  ;;  %6448 = vmatpush3.bf16.msra.mxu1 %v10748_v1  ;;  %6385 = vmatprep.subr.bf16.mxu0 %v10749_v24  ;;  %v8796_v37 = vld [vmem:[%s10456_s5 + $0x220] sm:$0xff]  ;;  %v8875_v1 = vld [vmem:[%s10456_s5 + $0x368] sm:$0xff] }
 0x1c7   : > { %v5864_v13 = vadd.f32 %v5863_v40, %v5862_v30  ;;  %4125 = vmatmul.mubr.bf16.gmra.mrb[200].mxu0 %v5388_v3  ;;  %6449 = vmatprep.subr.bf16.mxu1 %v10750_v10  ;;  %v5421_v45 = vcombine.high %v8796_v37, %v8801_v29  ;;  %v5420_v12 = vcombine.low %v8796_v37, %v8801_v29  ;;  %v8854_v22 = vld [vmem:[%s10456_s5 + $0x320] sm:$0xff]  ;;  %v8870_v40 = vld [vmem:[%s10456_s5 + $0x328] sm:$0xff] }
 0x1c8   : > { %v8790_v36 = vadd.f32 %v5861_v0, %v2162_v23  ;;  %v2165_v25 = vadd.f32 %v5800_v50, %v8580_v63  ;;  %4222 = vmatmul.mubr.bf16.gmra.mrb[200].mxu1 %v5390_v56  ;;  %4132 = vmatprep.mubr.bf16.mxu0 %v5405_v5  ;;  %v8809_v63 = vld [vmem:[%s10456_s5 + $0x228] sm:$0xff]  ;;  %v5437_v50 = vcombine.high %v8828_v38, %v8833_v16  ;;  %v8891_v10 = vld [vmem:[%s10456_s5 + $0x3e0] sm:$0xff] }
 0x1c9   : > { %4229 = vmatprep.mubr.bf16.mxu1 %v5407_v7  ;;  %6386 = vmatpush3.bf16.msra.mxu0 %v10752_v31  ;;  %v5423_v5 = vcombine.high %v8809_v63, %v8814_v18  ;;  %v8849_v7 = vld [vmem:[%s10456_s5 + $0x2e8] sm:$0xff]  ;;  %v5422_v23 = vcombine.low %v8809_v63, %v8814_v18  ;;  %v9091_v18 = vld [vmem:[%s10456_s5 + $0x2b0] sm:$0xff] }
 0x1ca   : > { %10751 = vst [vmem:[#allocation7_spill] sm:$0xff] %v8790_v36  ;;  %v8804_v57 = vadd.f32 %v5864_v13, %v2165_v25  ;;  %v5881_v48 = vpop.f32.mrb[96].mxu0  ;;  %6450 = vmatpush3.bf16.msra.mxu1 %v10754_v44  ;;  %6387 = vmatprep.subr.bf16.mxu0 %v10755_v43  ;;  %v8896_v25 = vld [vmem:[%s10456_s5 + $0x3a8] sm:$0xff]  ;;  %v8913_v44 = vld [vmem:[%s10456_s5 + $0x30] sm:$0xff]  ;;  %10767 = vst [vmem:[#allocation19_spill] sm:$0xff] %v9091_v18  ;;  %v10769_v36 = vcombine.low %v8828_v38, %v8833_v16 }
 0x1cb   : > { %v5945_v28 = vpop.f32.mrb[96].mxu1  ;;  %v5882_v52 = vpop.f32.mrb[97].mxu0  ;;  %6451 = vmatprep.subr.bf16.mxu1 %v10756_v61  ;;  %v8918_v43 = vld [vmem:[%s10456_s5 + $0x70] sm:$0xff]  ;;  %v10772_v38 = vcombine.low %v8840_v32, %v8849_v7 }
 0x1cc   : > { %10753 = vst [vmem:[#allocation8_spill] sm:$0xff] %v8804_v57  ;;  %v5883_v42 = vadd.f32 %v5882_v52, %v5881_v48  ;;  %v5946_v41 = vpop.f32.mrb[97].mxu1  ;;  %v5884_v3 = vpop.f32.mrb[98].mxu0 }
 0x1cd   : > { %v5947_v59 = vadd.f32 %v5946_v41, %v5945_v28  ;;  %v5948_v19 = vpop.f32.mrb[98].mxu1  ;;  %v5885_v56 = vpop.f32.mrb[99].mxu0  ;;  %6388 = vmatpush3.bf16.msra.mxu0 %v7945_v21  ;;  %v8859_v21 = vld [vmem:[%s10456_s5 + $0x360] sm:$0xff]  ;;  %v8937_v41 = vld [vmem:[%s10456_s5 + $0x78] sm:$0xff] }
 0x1ce   : > { %v2300_v9 = vadd.f32 %v5883_v42, %v8608_v33  ;;  %v5886_v0 = vadd.f32 %v5885_v56, %v5884_v3  ;;  %v5949_v30 = vpop.f32.mrb[99].mxu1  ;;  %6452 = vmatpush3.bf16.msra.mxu1 %v7952_v20  ;;  %6389 = vmatprep.subr.bf16.mxu0 %v7954_v17  ;;  %v8880_v17 = vld [vmem:[%s10456_s5 + $0x3a0] sm:$0xff]  ;;  %v8932_v42 = vld [vmem:[%s10456_s5 + $0x38] sm:$0xff]  ;;  %v8956_v56 = vld [vmem:[%s10456_s5 + $0xf0] sm:$0xff]  ;;  %v10773_v16 = vcombine.high %v8854_v22, %v8859_v21 }
 0x1cf   : > { %v5950_v33 = vadd.f32 %v5949_v30, %v5948_v19  ;;  %4133 = vmatmul.mubr.bf16.gmra.mrb[204].mxu0 %v5404_v14  ;;  %6453 = vmatprep.subr.bf16.mxu1 %v7962_v60  ;;  %v8901_v60 = vld [vmem:[%s10456_s5 + $0x3e8] sm:$0xff]  ;;  %v8951_v19 = vld [vmem:[%s10456_s5 + $0xb0] sm:$0xff]  ;;  %v9024_v30 = vld [vmem:[%s10456_s5 + $0x1b8] sm:$0xff] }
 0x1d0   : > { %v8883_v20 = vadd.f32 %v5947_v59, %v2300_v9  ;;  %v2303_v24 = vadd.f32 %v5886_v0, %v8618_v27  ;;  %4230 = vmatmul.mubr.bf16.gmra.mrb[204].mxu1 %v5406_v62  ;;  %4140 = vmatprep.mubr.bf16.mxu0 %v5421_v45  ;;  %v5439_v27 = vcombine.high %v8840_v32, %v8849_v7  ;;  %v8986_v45 = vld [vmem:[%s10456_s5 + $0x170] sm:$0xff] }
 0x1d1   : > { %4237 = vmatprep.mubr.bf16.mxu1 %v5423_v5  ;;  %6390 = vmatpush3.bf16.msra.mxu0 %v7976_v8  ;;  %10761 = vst [vmem:[#allocation13_spill] sm:$0xff] %v9024_v30 }
 0x1d2   : > { %10757 = vst [vmem:[#allocation9_spill] sm:$0xff] %v8883_v20  ;;  %v2547_v28 = vmul.f32 1.442695, %v8883_v20  ;;  %v8921_v52 = vadd.f32 %v5950_v33, %v2303_v24  ;;  %v5887_v14 = vpop.f32.mrb[100].mxu0  ;;  %6454 = vmatpush3.bf16.msra.mxu1 %v7980_v26  ;;  %6391 = vmatprep.subr.bf16.mxu0 %v7982_v55  ;;  %v8967_v33 = vld [vmem:[%s10456_s5 + $0xb8] sm:$0xff]  ;;  %vm2531_vm1 = vcmp.gt.f32.partialorder %v8883_v20, 20.0 }
 0x1d3   : > { %v5951_v3 = vpop.f32.mrb[100].mxu1  ;;  %v5888_v62 = vpop.f32.mrb[101].mxu0  ;;  %6455 = vmatprep.subr.bf16.mxu1 %v7987_v35  ;;  %v8972_v24 = vld [vmem:[%s10456_s5 + $0xf8] sm:$0xff]  ;;  %v8981_v35 = vld [vmem:[%s10456_s5 + $0x130] sm:$0xff] }
 0x1d4   : > { %10758 = vst [vmem:[#allocation10_spill] sm:$0xff] %v8921_v52  ;;  %6669 = vpow2.f32 %v2547_v28  ;;  %v5952_v5 = vpop.f32.mrb[101].mxu1  ;;  %v5890_v9 = vpop.f32.mrb[102].mxu0  ;;  %v2549_v28 = vmul.f32 1.442695, %v8921_v52  ;;  %v5889_v55 = vadd.f32 %v5888_v62, %v5887_v14  ;;  %vm2532_vm2 = vcmp.gt.f32.partialorder %v8921_v52, 20.0 }
 0x1d5   : > { %v5953_v0 = vadd.f32 %v5952_v5, %v5951_v3  ;;  %v5954_v59 = vpop.f32.mrb[102].mxu1  ;;  %v5891_v26 = vpop.f32.mrb[103].mxu0  ;;  %6392 = vmatpush3.bf16.msra.mxu0 %v8001_v39  ;;  %v8998_v5 = vld [vmem:[%s10456_s5 + $0x138] sm:$0xff]  ;;  %v9019_v39 = vld [vmem:[%s10456_s5 + $0x1f0] sm:$0xff] }
 0x1d6   : > { %v5892_v61 = vadd.f32 %v5891_v26, %v5890_v9  ;;  %v5955_v14 = vpop.f32.mrb[103].mxu1  ;;  %6456 = vmatpush3.bf16.msra.mxu1 %v8014_v4  ;;  %v9003_v26 = vld [vmem:[%s10456_s5 + $0x178] sm:$0xff]  ;;  %v9008_v4 = vld [vmem:[%s10456_s5 + $0x1b0] sm:$0xff]  ;;  %6671 = vpow2.f32 %v2549_v28  ;;  %v2308_v9 = vadd.f32 %v5889_v55, %v8638_v47  ;;  %10760 = vst [vmem:[#allocation12_spill] sm:$0xff] %v9019_v39 }
 0x1d7   : > { %10759 = vst [vmem:[#allocation11_spill] sm:$0xff] %v9008_v4  ;;  %v5956_v3 = vadd.f32 %v5955_v14, %v5954_v59  ;;  %4141 = vmatmul.mubr.bf16.gmra.mrb[208].mxu0 %v5420_v12  ;;  %v9029_v47 = vld [vmem:[%s10456_s5 + $0x1f8] sm:$0xff]  ;;  %v9045_v55 = vld [vmem:[%s10456_s5 + $0x230] sm:$0xff]  ;;  %v2459_v12 = vmul.f32 %v8883_v20, %v8883_v20 }
 0x1d8   : > { %10762 = vst [vmem:[#allocation14_spill] sm:$0xff] %v9029_v47  ;;  %v2311_v37 = vadd.f32 %v5892_v61, %v8647_v49  ;;  %4238 = vmatmul.mubr.bf16.gmra.mrb[208].mxu1 %v5422_v23  ;;  %4148 = vmatprep.mubr.bf16.mxu0 %v5437_v50  ;;  %10763 = vst [vmem:[#allocation15_spill] sm:$0xff] %v9045_v55  ;;  %v9050_v49 = vld [vmem:[%s10456_s5 + $0x270] sm:$0xff]  ;;  %v9052_v63 = vadd.f32 %v5953_v0, %v2308_v9  ;;  %v9074_v14 = vld [vmem:[%s10456_s5 + $0x238] sm:$0xff] }
 0x1d9   : > { %10764 = vst [vmem:[#allocation16_spill] sm:$0xff] %v9050_v49  ;;  %4245 = vmatprep.mubr.bf16.mxu1 %v5439_v27  ;;  %10765 = vst [vmem:[#allocation17_spill] sm:$0xff] %v9074_v14  ;;  %v2460_v9 = vmul.f32 %v8921_v52, %v8921_v52  ;;  %v9096_v23 = vld [vmem:[%s10456_s5 + $0x2f0] sm:$0xff]  ;;  %v10782_v47 = vcombine.low %v8854_v22, %v8859_v21  ;;  %v10784_v22 = vcombine.high %v8880_v17, %v8891_v10 }
 0x1da   : > { %v9063_v61 = vadd.f32 %v5956_v3, %v2311_v37  ;;  %v5893_v59 = vpop.f32.mrb[104].mxu0  ;;  %v9079_v3 = vld [vmem:[%s10456_s5 + $0x278] sm:$0xff]  ;;  %v2551_v37 = vmul.f32 1.442695, %v9052_v63  ;;  %10768 = vst [vmem:[#allocation20_spill] sm:$0xff] %v9096_v23  ;;  %v2461_v48 = vmul.f32 %v9052_v63, %v9052_v63  ;;  %vm2533_vm5 = vcmp.gt.f32.partialorder %v9052_v63, 20.0 }
 0x1db   : > { %10766 = vst [vmem:[#allocation18_spill] sm:$0xff] %v9079_v3  ;;  %v5957_v0 = vpop.f32.mrb[104].mxu1  ;;  %v5894_v28 = vpop.f32.mrb[105].mxu0 }
 0x1dc   : > { %v2553_v29 = vmul.f32 1.442695, %v9063_v61  ;;  %v5895_v62 = vadd.f32 %v5894_v28, %v5893_v59  ;;  %v5958_v27 = vpop.f32.mrb[105].mxu1  ;;  %v5896_v8 = vpop.f32.mrb[106].mxu0  ;;  %6673 = vpow2.f32 %v2551_v37  ;;  %v2479_v32 = vsel %vm2475_vm0, %v2461_v48, 0.0 }
 0x1dd   : > { %v5959_v31 = vadd.f32 %v5958_v27, %v5957_v0  ;;  %v5960_v13 = vpop.f32.mrb[106].mxu1  ;;  %v5897_v57 = vpop.f32.mrb[107].mxu0  ;;  %v2477_v0 = vsel %vm2475_vm0, %v2460_v9, 0.0  ;;  %v2476_v9 = vsel %vm2475_vm0, %v2459_v12, 0.0  ;;  %v9149_v12 = vld [vmem:[%s10456_s5 + $0x370] sm:$0xff]  ;;  %v2462_v7 = vmul.f32 %v9063_v61, %v9063_v61 }
 0x1de   : > { %v9107_v51 = vpop.eup %6669  ;;  %6675 = vpow2.f32 %v2553_v29  ;;  %v2316_v59 = vadd.f32 %v5895_v62, %v8656_v58  ;;  %v5961_v28 = vpop.f32.mrb[107].mxu1  ;;  %v5898_v27 = vadd.f32 %v5897_v57, %v5896_v8  ;;  %v9124_v58 = vld [vmem:[%s10456_s5 + $0x2b8] sm:$0xff]  ;;  %v9144_v29 = vld [vmem:[%s10456_s5 + $0x330] sm:$0xff]  ;;  %10775 = vst [vmem:[#allocation24_spill] sm:$0xff] %v9149_v12  ;;  %v2478_v48 = vadd.f32 %v2477_v0, %v2476_v9 }
 0x1df   : > { %v2579_v37 = vadd.f32 1.0, %v9107_v51  ;;  %4149 = vmatmul.mubr.bf16.gmra.mrb[212].mxu0 %v10769_v36  ;;  %10770 = vst [vmem:[#allocation21_spill] sm:$0xff] %v9124_v58  ;;  %v9129_v62 = vld [vmem:[%s10456_s5 + $0x2f8] sm:$0xff]  ;;  %v2582_v57 = vmul.f32 -0.5, %v9107_v51  ;;  %v5962_v36 = vadd.f32 %v5961_v28, %v5960_v13  ;;  %10774 = vst [vmem:[#allocation23_spill] sm:$0xff] %v9144_v29  ;;  %vm2534_vm7 = vcmp.gt.f32.partialorder %v9063_v61, 20.0 }
 0x1e0   : > { %10771 = vst [vmem:[#allocation22_spill] sm:$0xff] %v9129_v62  ;;  %v9133_v8 = vadd.f32 %v5959_v31, %v2316_v59  ;;  %4246 = vmatmul.mubr.bf16.gmra.mrb[212].mxu1 %v10772_v38  ;;  %4156 = vmatprep.mubr.bf16.mxu0 %v10773_v16  ;;  %v9151_v31 = vpop.eup %6671  ;;  %v2319_v13 = vadd.f32 %v5898_v27, %v8665_v6  ;;  %v9163_v28 = vld [vmem:[%s10456_s5 + $0x338] sm:$0xff]  ;;  %v2585_v49 = vand.u32 2147483647, %v9107_v51 }
 0x1e1   : > { %6677 = vlog2.f32 %v2579_v37  ;;  %v10776_v59 = vcombine.high %v8870_v40, %v8875_v1  ;;  %10777 = vst [vmem:[#allocation25_spill] sm:$0xff] %v9163_v28  ;;  %v9168_v37 = vld [vmem:[%s10456_s5 + $0x378] sm:$0xff]  ;;  %v2588_v38 = vadd.f32 1.0, %v9151_v31  ;;  %v2583_v9 = vadd.f32 1.0, %v2582_v57 }
 0x1e2   : > { %10778 = vst [vmem:[#allocation26_spill] sm:$0xff] %v9168_v37  ;;  %v5899_v16 = vpop.f32.mrb[108].mxu0  ;;  %v9176_v50 = vadd.f32 %v5962_v36, %v2319_v13  ;;  %v2480_v3 = vadd.f32 %v2479_v32, %v2478_v48  ;;  %v9187_v36 = vld [vmem:[%s10456_s5 + $0x3b0] sm:$0xff]  ;;  %v2591_v0 = vmul.f32 -0.5, %v9151_v31  ;;  %v2481_v57 = vsel %vm2475_vm0, %v2462_v7, 0.0 }
 0x1e3   : > { %4253 = vmatprep.mubr.bf16.mxu1 %v10776_v59  ;;  %v2555_v59 = vmul.f32 1.442695, %v9133_v8  ;;  %v5963_v46 = vpop.f32.mrb[108].mxu1  ;;  %v5900_v23 = vpop.f32.mrb[109].mxu0  ;;  %6679 = vlog2.f32 %v2588_v38  ;;  %10780 = vst [vmem:[#allocation28_spill] sm:$0xff] %v9187_v36  ;;  %v9192_v13 = vld [vmem:[%s10456_s5 + $0x3f0] sm:$0xff]  ;;  %v2463_v32 = vmul.f32 %v9133_v8, %v9133_v8 }
 0x1e4   : > { %10779 = vst [vmem:[#allocation27_spill] sm:$0xff] %v9176_v50  ;;  %v5964_v14 = vpop.f32.mrb[109].mxu1  ;;  %v5902_v6 = vpop.f32.mrb[110].mxu0  ;;  %10781 = vst [vmem:[#allocation29_spill] sm:$0xff] %v9192_v13  ;;  %v2557_v27 = vmul.f32 1.442695, %v9176_v50  ;;  %v5901_v18 = vadd.f32 %v5900_v23, %v5899_v16  ;;  %v2482_v16 = vadd.f32 %v2481_v57, %v2480_v3 }
 0x1e5   : > { %6681 = vpow2.f32 %v2555_v59  ;;  %v5966_v48 = vpop.f32.mrb[110].mxu1  ;;  %v5903_v38 = vpop.f32.mrb[111].mxu0  ;;  %v5965_v12 = vadd.f32 %v5964_v14, %v5963_v46  ;;  %v2584_v46 = vmul.f32 %v9107_v51, %v2583_v9  ;;  %v2594_v23 = vand.u32 2147483647, %v9151_v31 }
 0x1e6   : > { %v5967_v29 = vpop.f32.mrb[111].mxu1  ;;  %v9201_v58 = vpop.eup %6673  ;;  %v5904_v55 = vadd.f32 %v5903_v38, %v5902_v6  ;;  %v2592_v21 = vadd.f32 1.0, %v2591_v0  ;;  %v2483_v51 = vsel %vm2475_vm0, %v2463_v32, 0.0  ;;  %6683 = vpow2.f32 %v2557_v27 }
 0x1e7   : > { %v5968_v7 = vadd.f32 %v5967_v29, %v5966_v48  ;;  %4157 = vmatmul.mubr.bf16.gmra.mrb[216].mxu0 %v10782_v47  ;;  %v2597_v14 = vadd.f32 1.0, %v9201_v58  ;;  %v10783_v29 = vcombine.low %v8870_v40, %v8875_v1  ;;  %v10785_v6 = vcombine.high %v8896_v25, %v8901_v60 }
 0x1e8   : > { %v9209_v30 = vpop.eup %6675  ;;  %4164 = vmatprep.mubr.bf16.mxu0 %v10784_v22  ;;  %v2600_v40 = vmul.f32 -0.5, %v9201_v58  ;;  %v2464_v1 = vmul.f32 %v9176_v50, %v9176_v50  ;;  %v2324_v3 = vadd.f32 %v5901_v18, %v8674_v53  ;;  %v2603_v0 = vand.u32 2147483647, %v9201_v58 }
 0x1e9   : > { %4254 = vmatmul.mubr.bf16.gmra.mrb[216].mxu1 %v10783_v29  ;;  %v2606_v47 = vadd.f32 1.0, %v9209_v30  ;;  %6685 = vlog2.f32 %v2597_v14  ;;  %v2609_v32 = vmul.f32 -0.5, %v9209_v30  ;;  %v2327_v27 = vadd.f32 %v5904_v55, %v8683_v2 }
 0x1ea   : > { %4261 = vmatprep.mubr.bf16.mxu1 %v10785_v6  ;;  %v5905_v9 = vpop.f32.mrb[112].mxu0  ;;  %v2612_v14 = vand.u32 2147483647, %v9209_v30  ;;  %v9235_v22 = vadd.f32 %v5965_v12, %v2324_v3  ;;  %vm9241_vm3 = vcmp.lt.f32.partialorder %v2585_v49, 0.0004427343  ;;  %v2601_v12 = vadd.f32 1.0, %v2600_v40 }
 0x1eb   : > { %v6678_v57 = vpop.eup %6677  ;;  %6687 = vlog2.f32 %v2606_v47  ;;  %v5969_v48 = vpop.f32.mrb[112].mxu1  ;;  %v9245_v47 = vadd.f32 %v5968_v7, %v2327_v27  ;;  %vm9257_vm4 = vcmp.lt.f32.partialorder %v2594_v23, 0.0004427343  ;;  %v2485_v18 = vsel %vm2475_vm0, %v2464_v1, 0.0  ;;  %v9275_v23 = vld [vmem:[%s10456_s5 + $0x3b8] sm:$0xff] }
 0x1ec   : > { %v5906_v38 = vpop.f32.mrb[113].mxu0  ;;  %v2581_v29 = vmul.f32 0.6931472, %v6678_v57  ;;  %v5970_v59 = vpop.f32.mrb[113].mxu1  ;;  %v2484_v57 = vadd.f32 %v2483_v51, %v2482_v16  ;;  %v2559_v7 = vmul.f32 1.442695, %v9235_v22  ;;  %v10797_v51 = vcombine.low %v8896_v25, %v8901_v60 }
 0x1ed   : > { %v9237_v6 = vadd.f32 %v5906_v38, %v5905_v9  ;;  %v9239_v53 = vpop.f32.mrb[114].mxu0  ;;  %10788 = vst [vmem:[#allocation30_spill] sm:$0xff] %v9245_v47  ;;  %v9247_v62 = vadd.f32 %v5970_v59, %v5969_v48  ;;  %v9249_v2 = vpop.f32.mrb[114].mxu1  ;;  %v2593_v38 = vmul.f32 %v9151_v31, %v2592_v21  ;;  %10792 = vst [vmem:[#allocation31_spill] sm:$0xff] %v9275_v23  ;;  %v9280_v16 = vld [vmem:[%s10456_s5 + $0x3f8] sm:$0xff]  ;;  %v2610_v21 = vadd.f32 1.0, %v2609_v32 }
 0x1ee   : > { %v9251_v55 = vpop.f32.mrb[115].mxu0  ;;  %v6680_v3 = vpop.eup %6679  ;;  %v2587_v9 = vsel %vm9241_vm3, %v2584_v46, %v2581_v29  ;;  %v10791_v46 = vcombine.low %v8880_v17, %v8891_v10  ;;  %vm9282_vm6 = vcmp.lt.f32.partialorder %v2603_v0, 0.0004427343  ;;  %vm9287_vm8 = vcmp.lt.f32.partialorder %v2612_v14, 0.0004427343 }
 0x1ef   : > { %v9262_v59 = vpop.f32.mrb[115].mxu1  ;;  %v9264_v27 = vpop.eup %6681  ;;  %v2590_v48 = vmul.f32 0.6931472, %v6680_v3  ;;  %v10798_v40 = vcombine.high %v8913_v44, %v8918_v43  ;;  %v2723_v0 = vsel %vm2531_vm1, %v8883_v20, %v2587_v9  ;;  %v2465_v29 = vmul.f32 %v9235_v22, %v9235_v22 }
 0x1f0   : > { %4165 = vmatmul.mubr.bf16.gmra.mrb[220].mxu0 %v10791_v46  ;;  %v2615_v10 = vadd.f32 1.0, %v9264_v27  ;;  %v2758_v1 = vpop.permute.xlu0 %2757  ;;  %6689 = vpow2.f32 %v2559_v7  ;;  %v10799_v25 = vcombine.high %v8932_v42, %v8937_v41  ;;  %v2763_v60 = vpop.permute.xlu1 %2762  ;;  %v2618_v3 = vmul.f32 -0.5, %v9264_v27 }
 0x1f1   : > { %4262 = vmatmul.mubr.bf16.gmra.mrb[220].mxu1 %v10797_v51  ;;  %4302 = vmatprep.mubr.bf16.mxu0 %v10798_v40  ;;  %v2596_v32 = vsel %vm9257_vm4, %v2593_v38, %v2590_v48  ;;  %v2466_v9 = vmul.f32 %v9245_v47, %v9245_v47  ;;  %v9314_v48 = vpop.eup %6683  ;;  %v2621_v7 = vand.u32 2147483647, %v9264_v27  ;;  %v2486_v38 = vadd.f32 %v2485_v18, %v2484_v57 }
 0x1f2   : > { %4399 = vmatprep.mubr.bf16.mxu1 %v10799_v25  ;;  %v2724_v14 = vsel %vm2532_vm2, %v8921_v52, %v2596_v32  ;;  %6691 = vlog2.f32 %v2615_v10  ;;  %v5911_v49 = vpop.f32.mrb[116].mxu0  ;;  %v2561_v46 = vmul.f32 1.442695, %v9245_v47  ;;  %v2602_v20 = vmul.f32 %v9201_v58, %v2601_v12 }
 0x1f3   : > { %v5975_v51 = vpop.f32.mrb[116].mxu1  ;;  %v5912_v40 = vpop.f32.mrb[117].mxu0  ;;  %v2836_v10 = vmul.f32 %v2763_v60, %v2724_v14  ;;  %v2611_v52 = vmul.f32 %v9209_v30, %v2610_v21  ;;  %v2624_v13 = vadd.f32 1.0, %v9314_v48  ;;  %v2835_v39 = vmul.f32 %v2758_v1, %v2723_v0 }
 0x1f4   : > { %v6686_v32 = vpop.eup %6685  ;;  %v5976_v36 = vpop.f32.mrb[117].mxu1  ;;  %v2487_v18 = vsel %vm2475_vm0, %v2465_v29, 0.0  ;;  %6693 = vpow2.f32 %v2561_v46  ;;  %v2619_v23 = vadd.f32 1.0, %v2618_v3  ;;  %v9327_v58 = vsel %vm2475_vm0, %v2466_v9, 0.0 }
 0x1f5   : > { %v5914_v37 = vpop.f32.mrb[118].mxu0  ;;  %v6688_v28 = vpop.eup %6687  ;;  %v2599_v57 = vmul.f32 0.6931472, %v6686_v32  ;;  %6695 = vlog2.f32 %v2624_v13  ;;  %vm2535_vm9 = vcmp.gt.f32.partialorder %v9133_v8, 20.0  ;;  %vm9334_vm10 = vcmp.lt.f32.partialorder %v2621_v7, 0.0004427343 }
 0x1f6   : > { %v9324_v4 = vpop.f32.mrb[118].mxu1  ;;  %v5915_v47 = vpop.f32.mrb[119].mxu0  ;;  %v2608_v25 = vmul.f32 0.6931472, %v6688_v28  ;;  %v2332_v1 = vadd.f32 %v9237_v6, %v8692_v11  ;;  %v5910_v28 = vadd.f32 %v9251_v55, %v9239_v53  ;;  %v10802_v13 = vcombine.low %v8913_v44, %v8918_v43 }
 0x1f7   : > { %v9329_v30 = vpop.f32.mrb[119].mxu1  ;;  %v2605_v12 = vsel %vm9282_vm6, %v2602_v20, %v2599_v57  ;;  %v2768_v0 = vpop.permute.xlu0 %2767  ;;  %v2852_v31 = vsel %vm2475_vm0, %v2836_v10, 0.0  ;;  %v5974_v11 = vadd.f32 %v9262_v59, %v9249_v2  ;;  %v10803_v6 = vcombine.low %v8932_v42, %v8937_v41 }
 0x1f8   : > { %4303 = vmatmul.mubr.bf16.vlgmr.msra.gmra.mrb[224].mxu0 %v10802_v13  ;;  %v2725_v20 = vsel %vm2533_vm5, %v9052_v63, %v2605_v12  ;;  %v2614_v29 = vsel %vm9287_vm8, %v2611_v52, %v2608_v25  ;;  %v9360_v43 = vadd.f32 %v9247_v62, %v2332_v1  ;;  %v2335_v55 = vadd.f32 %v5910_v28, %v8701_v34  ;;  %v2773_v17 = vpop.permute.xlu1 %2772 }
 0x1f9   : > { %4400 = vmatmul.mubr.bf16.vlgmr.msra.gmra.mrb[224].mxu1 %v10803_v6  ;;  %v2837_v53 = vmul.f32 %v2768_v0, %v2725_v20  ;;  %v2726_v44 = vsel %vm2534_vm7, %v9063_v61, %v2614_v29  ;;  %v10804_v52 = vcombine.high %v8951_v19, %v8956_v56  ;;  %v2627_v2 = vmul.f32 -0.5, %v9314_v48 }
 0x1fa   : > { %v5913_v59 = vadd.f32 %v5912_v40, %v5911_v49  ;;  %v9367_v42 = vadd.f32 %v5976_v36, %v5975_v51  ;;  %v9369_v41 = vadd.f32 %v5915_v47, %v5914_v37  ;;  %v9371_v60 = vpop.f32.mrb[120].mxu0  ;;  %v10805_v62 = vcombine.high %v8967_v33, %v8972_v24  ;;  %v9376_v14 = vpop.eup %6689 }
 0x1fb   : > { %4310 = vmatprep.mubr.bf16.mxu0 %v10804_v52  ;;  %v2851_v34 = vsel %vm2475_vm0, %v2835_v39, 0.0  ;;  %v2854_v3 = vsel %vm2475_vm0, %v2837_v53, 0.0  ;;  %v2488_v9 = vadd.f32 %v2487_v18, %v2486_v38  ;;  %v2563_v7 = vmul.f32 1.442695, %v9360_v43  ;;  %v9381_v49 = vpop.f32.mrb[120].mxu1  ;;  %v9383_v36 = vpop.f32.mrb[121].mxu0 }
 0x1fc   : > { %4407 = vmatprep.mubr.bf16.mxu1 %v10805_v62  ;;  %v6692_v37 = vpop.eup %6691  ;;  %v2853_v47 = vadd.f32 %v2852_v31, %v2851_v34  ;;  %v2838_v46 = vmul.f32 %v2773_v17, %v2726_v44  ;;  %v2620_v51 = vmul.f32 %v9264_v27, %v2619_v23  ;;  %v2633_v40 = vadd.f32 1.0, %v9376_v14  ;;  %v5982_v25 = vpop.f32.mrb[121].mxu1 }
 0x1fd   : > { %v5920_v32 = vpop.f32.mrb[122].mxu0  ;;  %v2617_v10 = vmul.f32 0.6931472, %v6692_v37  ;;  %v2630_v39 = vand.u32 2147483647, %v9314_v48  ;;  %v2467_v38 = vmul.f32 %v9360_v43, %v9360_v43  ;;  %6697 = vpow2.f32 %v2563_v7  ;;  %v9390_v57 = vpop.f32.mrb[122].mxu1 }
 0x1fe   : > { %v2855_v18 = vadd.f32 %v2854_v3, %v2853_v47  ;;  %v2628_v12 = vadd.f32 1.0, %v2627_v2  ;;  %6699 = vlog2.f32 %v2633_v40  ;;  %v2636_v1 = vmul.f32 -0.5, %v9376_v14  ;;  %v5921_v28 = vpop.f32.mrb[123].mxu0  ;;  %v9393_v27 = vpop.f32.mrb[123].mxu1 }
 0x1ff   : > { %v9395_v23 = vpop.eup %6693  ;;  %v2623_v13 = vsel %vm9334_vm10, %v2620_v51, %v2617_v10  ;;  %vm2536_vm11 = vcmp.gt.f32.partialorder %v9176_v50, 20.0  ;;  %v2639_v0 = vand.u32 2147483647, %v9376_v14  ;;  %v9401_v31 = vadd.f32 %v5974_v11, %v2335_v55 }
 0x200   : > { %v2340_v20 = vadd.f32 %v5913_v59, %v8710_v15  ;;  %v10807_v29 = vcombine.low %v8951_v19, %v8956_v56  ;;  %v6696_v6 = vpop.eup %6695  ;;  %v2856_v53 = vsel %vm2475_vm0, %v2838_v46, 0.0  ;;  %v2727_v21 = vsel %vm2535_vm9, %v9133_v8, %v2623_v13  ;;  %v2778_v59 = vpop.permute.xlu0 %2777 }
 0x201   : > { %10806 = vst [vmem:[#allocation32_spill] sm:$0xff] %v9401_v31  ;;  %v2642_v44 = vadd.f32 1.0, %v9395_v23  ;;  %v2645_v52 = vmul.f32 -0.5, %v9395_v23  ;;  %v10808_v11 = vcombine.low %v8967_v33, %v8972_v24  ;;  %v10809_v15 = vcombine.high %v8981_v35, %v8986_v45 }
 0x202   : > { %4311 = vmatmul.mubr.bf16.gmra.mrb[228].mxu0 %v10807_v29  ;;  %v2626_v19 = vmul.f32 0.6931472, %v6696_v6  ;;  %v2490_v56 = vadd.f32 %v9327_v58, %v2488_v9  ;;  %v2491_v55 = vsel %vm2475_vm0, %v2467_v38, 0.0  ;;  %v2468_v17 = vmul.f32 %v9401_v31, %v9401_v31  ;;  %v9432_v58 = vpop.f32.mrb[124].mxu0 }
 0x203   : > { %4408 = vmatmul.mubr.bf16.gmra.mrb[228].mxu1 %v10808_v11  ;;  %4318 = vmatprep.mubr.bf16.mxu0 %v10809_v15  ;;  %v10810_v2 = vcombine.high %v8998_v5, %v9003_v26  ;;  %v2629_v33 = vmul.f32 %v9314_v48, %v2628_v12  ;;  %vm9427_vm12 = vcmp.lt.f32.partialorder %v2630_v39, 0.0004427343  ;;  %6701 = vlog2.f32 %v2642_v44  ;;  %v9439_v37 = vpop.f32.mrb[124].mxu1  ;;  %v5924_v48 = vpop.f32.mrb[125].mxu0 }
 0x204   : > { %v2565_v62 = vmul.f32 1.442695, %v9401_v31  ;;  %v2857_v34 = vadd.f32 %v2856_v53, %v2855_v18  ;;  %v2839_v3 = vmul.f32 %v2778_v59, %v2727_v21  ;;  %vm2537_vm13 = vcmp.gt.f32.partialorder %v9235_v22, 20.0  ;;  %v5988_v10 = vpop.f32.mrb[125].mxu1  ;;  %v5926_v39 = vpop.f32.mrb[126].mxu0 }
 0x205   : > { %4415 = vmatprep.mubr.bf16.mxu1 %v10810_v2  ;;  %v2637_v9 = vadd.f32 1.0, %v2636_v1  ;;  %vm9435_vm14 = vcmp.lt.f32.partialorder %v2639_v0, 0.0004427343  ;;  %v2632_v47 = vsel %vm9427_vm12, %v2629_v33, %v2626_v19  ;;  %v2646_v46 = vadd.f32 1.0, %v2645_v52  ;;  %v9450_v1 = vpop.f32.mrb[126].mxu1  ;;  %v5927_v13 = vpop.f32.mrb[127].mxu0 }
 0x206   : > { %v2648_v51 = vand.u32 2147483647, %v9395_v23  ;;  %v2492_v40 = vadd.f32 %v2491_v55, %v2490_v56  ;;  %v2493_v38 = vsel %vm2475_vm0, %v2468_v17, 0.0  ;;  %6703 = vpow2.f32 %v2565_v62  ;;  %v9457_v21 = vpop.f32.mrb[127].mxu1  ;;  %v10821_v52 = vld [vmem:[#allocation12_spill] sm:$0xff]  ;;  %v10823_v19 = vld [vmem:[#allocation13_spill] sm:$0xff]  ;;  %v2783_v17 = vpop.permute.xlu1 %2782 }
 0x207   : > { %v9446_v18 = vadd.f32 %v9367_v42, %v2340_v20  ;;  %v2343_v12 = vadd.f32 %v9369_v41, %v8724_v54  ;;  %v5980_v0 = vadd.f32 %v9329_v30, %v9324_v4  ;;  %v5919_v29 = vadd.f32 %v9383_v36, %v9371_v60  ;;  %v9459_v44 = vpop.eup %6697  ;;  %v10815_v41 = vld [vmem:[#allocation30_spill] sm:$0xff] }
 0x208   : > { %v5983_v6 = vadd.f32 %v5982_v25, %v9381_v49  ;;  %v5922_v53 = vadd.f32 %v5921_v28, %v5920_v32  ;;  %v2858_v42 = vsel %vm2475_vm0, %v2839_v3, 0.0  ;;  %v2638_v54 = vmul.f32 %v9376_v14, %v2637_v9  ;;  %v6700_v60 = vpop.eup %6699  ;;  %v10820_v28 = vld [vmem:[#allocation11_spill] sm:$0xff]  ;;  %v10824_v56 = vld [vmem:[#allocation14_spill] sm:$0xff]  ;;  %v2788_v9 = vpop.permute.xlu0 %2787 }
 0x209   : > { %vm2538_vm15 = vcmp.gt.f32.partialorder %v10815_v41, 20.0  ;;  %v2469_v20 = vmul.f32 %v9446_v18, %v9446_v18  ;;  %v2567_v4 = vmul.f32 1.442695, %v9446_v18  ;;  %v10816_v30 = vcombine.low %v8981_v35, %v8986_v45 }
 0x20a   : > { %v2728_v49 = vsel %vm2536_vm11, %v9176_v50, %v2632_v47  ;;  %vm9473_vm1 = vcmp.lt.f32.partialorder %v2648_v51, 0.0004427343  ;;  %v2651_v14 = vadd.f32 1.0, %v9459_v44  ;;  %v2494_v25 = vadd.f32 %v2493_v38, %v2492_v40  ;;  %v10827_v51 = vld [vmem:[#allocation6_spill] sm:$0xff] }
 0x20b   : > { %4319 = vmatmul.mubr.bf16.gmra.mrb[232].mxu0 %v10816_v30  ;;  %v10819_v32 = vcombine.low %v8998_v5, %v9003_v26  ;;  %v10822_v45 = vcombine.high %v10820_v28, %v10821_v52  ;;  %v2635_v35 = vmul.f32 0.6931472, %v6700_v60  ;;  %v2495_v11 = vsel %vm2475_vm0, %v2469_v20, 0.0 }
 0x20c   : > { %6705 = vpow2.f32 %v2567_v4  ;;  %v9485_v15 = vadd.f32 %v5980_v0, %v2343_v12  ;;  %v10825_v55 = vcombine.high %v10823_v19, %v10824_v56  ;;  %v2859_v2 = vadd.f32 %v2858_v42, %v2857_v34 }
 0x20d   : > { %4416 = vmatmul.mubr.bf16.gmra.mrb[232].mxu1 %v10819_v32  ;;  %4326 = vmatprep.mubr.bf16.mxu0 %v10822_v45  ;;  %v2647_v59 = vmul.f32 %v9395_v23, %v2646_v46  ;;  %6707 = vlog2.f32 %v2651_v14  ;;  %v2496_v5 = vadd.f32 %v2495_v11, %v2494_v25  ;;  %v2840_v26 = vmul.f32 %v2783_v17, %v2728_v49  ;;  %v6702_v3 = vpop.eup %6701  ;;  %v10826_v23 = vld [vmem:[#allocation5_spill] sm:$0xff]  ;;  %v10836_v45 = vld [vmem:[#allocation31_spill] sm:$0xff] }
 0x20e   : > { %4423 = vmatprep.mubr.bf16.mxu1 %v10825_v55  ;;  %v2641_v33 = vsel %vm9435_vm14, %v2638_v54, %v2635_v35  ;;  %v2470_v24 = vmul.f32 %v9485_v15, %v9485_v15  ;;  %v2569_v62 = vmul.f32 1.442695, %v9485_v15  ;;  %v2654_v34 = vmul.f32 -0.5, %v9459_v44  ;;  %v10833_v32 = vld [vmem:[#allocation17_spill] sm:$0xff] }
 0x20f   : > { %v2729_v47 = vsel %vm2537_vm13, %v9235_v22, %v2641_v33  ;;  %v2348_v46 = vadd.f32 %v5919_v29, %v10826_v23  ;;  %v2351_v40 = vadd.f32 %v5922_v53, %v10827_v51  ;;  %v2644_v7 = vmul.f32 0.6931472, %v6702_v3 }
 0x210   : > { %v2841_v38 = vmul.f32 %v2788_v9, %v2729_v47  ;;  %v2497_v12 = vsel %vm2475_vm0, %v2470_v24, 0.0  ;;  %6709 = vpow2.f32 %v2569_v62  ;;  %v5986_v54 = vadd.f32 %v9393_v27, %v9390_v57  ;;  %v9508_v4 = vpop.eup %6703 }
 0x211   : > { %v2498_v0 = vadd.f32 %v2497_v12, %v2496_v5  ;;  %v9503_v42 = vadd.f32 %v5983_v6, %v2348_v46  ;;  %v5925_v20 = vadd.f32 %v5924_v48, %v9432_v58  ;;  %v2860_v30 = vsel %vm2475_vm0, %v2840_v26, 0.0  ;;  %v10837_v5 = vld [vmem:[#allocation7_spill] sm:$0xff] }
 0x212   : > { %v2650_v29 = vsel %vm9473_vm1, %v2647_v59, %v2644_v7  ;;  %v5989_v53 = vadd.f32 %v5988_v10, %v9439_v37  ;;  %v9514_v60 = vadd.f32 %v5927_v13, %v5926_v39  ;;  %v10828_v6 = vcombine.low %v10820_v28, %v10821_v52  ;;  %v10830_v37 = vld [vmem:[#allocation15_spill] sm:$0xff]  ;;  %v10831_v10 = vld [vmem:[#allocation16_spill] sm:$0xff]  ;;  %v2793_v13 = vpop.permute.xlu1 %2792  ;;  %v10834_v28 = vld [vmem:[#allocation18_spill] sm:$0xff] }
 0x213   : > { %v2730_v57 = vsel %vm2538_vm15, %v10815_v41, %v2650_v29  ;;  %v2655_v27 = vadd.f32 1.0, %v2654_v34  ;;  %v2657_v58 = vand.u32 2147483647, %v9459_v44  ;;  %v2660_v48 = vadd.f32 1.0, %v9508_v4 }
 0x214   : > { %4327 = vmatmul.mubr.bf16.gmra.mrb[236].mxu0 %v10828_v6  ;;  %v10829_v49 = vcombine.low %v10823_v19, %v10824_v56  ;;  %v10832_v39 = vcombine.high %v10830_v37, %v10831_v10  ;;  %v2862_v36 = vsel %vm2475_vm0, %v2841_v38, 0.0  ;;  %v2663_v14 = vmul.f32 -0.5, %v9508_v4  ;;  %v10844_v6 = vld [vmem:[#allocation19_spill] sm:$0xff] }
 0x215   : > { %v2471_v25 = vmul.f32 %v9503_v42, %v9503_v42  ;;  %v10835_v52 = vcombine.high %v10833_v32, %v10834_v28  ;;  %v2842_v11 = vmul.f32 %v2793_v13, %v2730_v57  ;;  %6711 = vlog2.f32 %v2660_v48  ;;  %v10845_v57 = vld [vmem:[#allocation20_spill] sm:$0xff]  ;;  %v6009_v13 = vpop.f32.mrb[128].mxu0 }
 0x216   : > { %4424 = vmatmul.mubr.bf16.gmra.mrb[236].mxu1 %v10829_v49  ;;  %4334 = vmatprep.mubr.bf16.mxu0 %v10832_v39  ;;  %v2571_v19 = vmul.f32 1.442695, %v9503_v42  ;;  %v9540_v56 = vadd.f32 %v5986_v54, %v2351_v40  ;;  %v9542_v55 = vpop.eup %6705  ;;  %v2861_v17 = vadd.f32 %v2860_v30, %v2859_v2  ;;  %vm2539_vm2 = vcmp.gt.f32.partialorder %v9360_v43, 20.0  ;;  %v2798_v54 = vpop.permute.xlu0 %2797 }
 0x217   : > { %4431 = vmatprep.mubr.bf16.mxu1 %v10835_v52  ;;  %v2499_v59 = vsel %vm2475_vm0, %v2471_v25, 0.0  ;;  %v2356_v26 = vadd.f32 %v5925_v20, %v10837_v5  ;;  %v6708_v33 = vpop.eup %6707  ;;  %v2656_v24 = vmul.f32 %v9459_v44, %v2655_v27  ;;  %vm9548_vm3 = vcmp.lt.f32.partialorder %v2657_v58, 0.0004427343 }
 0x218   : > { %v2666_v3 = vand.u32 2147483647, %v9508_v4  ;;  %v2669_v9 = vadd.f32 1.0, %v9542_v55  ;;  %v2863_v47 = vadd.f32 %v2862_v36, %v2861_v17  ;;  %v2653_v34 = vmul.f32 0.6931472, %v6708_v33 }
 0x219   : > { %v2500_v2 = vadd.f32 %v2499_v59, %v2498_v0  ;;  %6713 = vpow2.f32 %v2571_v19  ;;  %v2864_v23 = vsel %vm2475_vm0, %v2842_v11, 0.0  ;;  %v2664_v46 = vadd.f32 1.0, %v2663_v14 }
 0x21a   : > { %6715 = vlog2.f32 %v2669_v9  ;;  %v2472_v51 = vmul.f32 %v9540_v56, %v9540_v56  ;;  %v9557_v44 = vpop.eup %6709  ;;  %v2659_v40 = vsel %vm9548_vm3, %v2656_v24, %v2653_v34  ;;  %v2672_v38 = vmul.f32 -0.5, %v9542_v55  ;;  %v10850_v24 = vld [vmem:[#allocation8_spill] sm:$0xff]  ;;  %v6073_v9 = vpop.f32.mrb[128].mxu1 }
 0x21b   : > { %v2573_v7 = vmul.f32 1.442695, %v9540_v56  ;;  %v9563_v12 = vadd.f32 %v5989_v53, %v2356_v26  ;;  %v10840_v0 = vcombine.low %v10830_v37, %v10831_v10  ;;  %v2731_v20 = vsel %vm2539_vm2, %v9360_v43, %v2659_v40  ;;  %v10847_v37 = vld [vmem:[#allocation21_spill] sm:$0xff]  ;;  %v10848_v10 = vld [vmem:[#allocation22_spill] sm:$0xff] }
 0x21c   : > { %vm2540_vm4 = vcmp.gt.f32.partialorder %v9401_v31, 20.0  ;;  %vm9572_vm5 = vcmp.lt.f32.partialorder %v2666_v3, 0.0004427343  ;;  %v2678_v29 = vadd.f32 1.0, %v9557_v44  ;;  %v10843_v53 = vcombine.low %v10833_v32, %v10834_v28  ;;  %v6010_v32 = vpop.f32.mrb[129].mxu0  ;;  %v2803_v28 = vpop.permute.xlu1 %2802 }
 0x21d   : > { %4335 = vmatmul.mubr.bf16.gmra.mrb[240].mxu0 %v10840_v0  ;;  %v10846_v27 = vcombine.high %v10844_v6, %v10845_v57  ;;  %v2865_v58 = vadd.f32 %v2864_v23, %v2863_v47  ;;  %v2843_v48 = vmul.f32 %v2798_v54, %v2731_v20  ;;  %v2501_v49 = vsel %vm2475_vm0, %v2472_v51, 0.0  ;;  %v6012_v3 = vpop.f32.mrb[130].mxu0  ;;  %v6074_v23 = vpop.f32.mrb[129].mxu1 }
 0x21e   : > { %4432 = vmatmul.mubr.bf16.gmra.mrb[240].mxu1 %v10843_v53  ;;  %6717 = vpow2.f32 %v2573_v7  ;;  %v10849_v39 = vcombine.high %v10847_v37, %v10848_v10  ;;  %v2681_v36 = vmul.f32 -0.5, %v9557_v44  ;;  %v2502_v14 = vadd.f32 %v2501_v49, %v2500_v2  ;;  %v6013_v2 = vpop.f32.mrb[131].mxu0  ;;  %v6076_v0 = vpop.f32.mrb[130].mxu1 }
 0x21f   : > { %4342 = vmatprep.mubr.bf16.mxu0 %v10846_v27  ;;  %6719 = vlog2.f32 %v2678_v29  ;;  %v2473_v25 = vmul.f32 %v9563_v12, %v9563_v12  ;;  %v2665_v52 = vmul.f32 %v9508_v4, %v2664_v46  ;;  %vm2541_vm6 = vcmp.gt.f32.partialorder %v9446_v18, 20.0  ;;  %v6712_v59 = vpop.eup %6711  ;;  %v6015_v7 = vpop.f32.mrb[132].mxu0 }
 0x220   : > { %4439 = vmatprep.mubr.bf16.mxu1 %v10849_v39  ;;  %v2673_v11 = vadd.f32 1.0, %v2672_v38  ;;  %v2675_v19 = vand.u32 2147483647, %v9542_v55  ;;  %v2575_v17 = vmul.f32 1.442695, %v9563_v12  ;;  %v2866_v5 = vsel %vm2475_vm0, %v2843_v48, 0.0  ;;  %v2813_v20 = vpop.permute.xlu1 %2812 }
 0x221   : > { %v2684_v26 = vand.u32 2147483647, %v9557_v44  ;;  %v2503_v33 = vsel %vm2475_vm0, %v2473_v25, 0.0  ;;  %v2359_v62 = vadd.f32 %v9514_v60, %v10850_v24  ;;  %v2662_v4 = vmul.f32 0.6931472, %v6712_v59  ;;  %v6016_v29 = vpop.f32.mrb[133].mxu0 }
 0x222   : > { %v9599_v47 = vadd.f32 %v2503_v33, %v2502_v14  ;;  %6721 = vpow2.f32 %v2575_v17  ;;  %v5992_v34 = vadd.f32 %v9457_v21, %v9450_v1  ;;  %v2682_v46 = vadd.f32 1.0, %v2681_v36  ;;  %v6077_v53 = vpop.f32.mrb[131].mxu1  ;;  %v10855_v36 = vld [vmem:[#allocation23_spill] sm:$0xff]  ;;  %v10856_v14 = vld [vmem:[#allocation24_spill] sm:$0xff]  ;;  %v10858_v17 = vld [vmem:[#allocation25_spill] sm:$0xff]  ;;  %v2808_v33 = vpop.permute.xlu0 %2807 }
 0x223   : > { %v6011_v51 = vadd.f32 %v6010_v32, %v6009_v13  ;;  %v9603_v40 = vadd.f32 %v6013_v2, %v6012_v3  ;;  %v6075_v38 = vadd.f32 %v6074_v23, %v6073_v9  ;;  %v9605_v54 = vpop.eup %6713  ;;  %v2668_v60 = vsel %vm9572_vm5, %v2665_v52, %v2662_v4  ;;  %v9632_v25 = vpop.f32.mrb[132].mxu1  ;;  %v10859_v59 = vld [vmem:[#allocation26_spill] sm:$0xff] }
 0x224   : > { %vm9609_vm7 = vcmp.lt.f32.partialorder %v2675_v19, 0.0004427343  ;;  %vm2542_vm8 = vcmp.gt.f32.partialorder %v9485_v15, 20.0  ;;  %v9614_v1 = vadd.f32 %v5992_v34, %v2359_v62  ;;  %v10853_v21 = vcombine.low %v10844_v6, %v10845_v57  ;;  %v6716_v27 = vpop.eup %6715  ;;  %v9630_v57 = vpop.f32.mrb[134].mxu0 }
 0x225   : > { %v2867_v48 = vadd.f32 %v2866_v5, %v2865_v58  ;;  %v2732_v30 = vsel %vm2540_vm4, %v9401_v31, %v2668_v60  ;;  %v2687_v49 = vadd.f32 1.0, %v9605_v54  ;;  %v2690_v39 = vmul.f32 -0.5, %v9605_v54 }
 0x226   : > { %4343 = vmatmul.mubr.bf16.gmra.mrb[244].mxu0 %v10853_v21  ;;  %v10854_v13 = vcombine.low %v10847_v37, %v10848_v10  ;;  %v10857_v6 = vcombine.high %v10855_v36, %v10856_v14  ;;  %v2844_v58 = vmul.f32 %v2803_v28, %v2732_v30  ;;  %v2671_v32 = vmul.f32 0.6931472, %v6716_v27  ;;  %v9640_v37 = vpop.f32.mrb[135].mxu0  ;;  %v9642_v10 = vpop.f32.mrb[133].mxu1 }
 0x227   : > { %v2674_v52 = vmul.f32 %v9542_v55, %v2673_v11  ;;  %v2474_v19 = vmul.f32 %v9614_v1, %v9614_v1  ;;  %v10860_v5 = vcombine.high %v10858_v17, %v10859_v59  ;;  %v2683_v24 = vmul.f32 %v9557_v44, %v2682_v46  ;;  %v9650_v28 = vpop.f32.mrb[136].mxu0  ;;  %v9658_v44 = vpop.f32.mrb[134].mxu1 }
 0x228   : > { %4440 = vmatmul.mubr.bf16.gmra.mrb[244].mxu1 %v10854_v13  ;;  %4350 = vmatprep.mubr.bf16.mxu0 %v10857_v6  ;;  %vm9645_vm9 = vcmp.lt.f32.partialorder %v2684_v26, 0.0004427343  ;;  %6723 = vlog2.f32 %v2687_v49  ;;  %v2693_v55 = vand.u32 2147483647, %v9605_v54  ;;  %v6718_v11 = vpop.eup %6717  ;;  %v2868_v3 = vsel %vm2475_vm0, %v2844_v58, 0.0  ;;  %v9660_v26 = vpop.f32.mrb[137].mxu0 }
 0x229   : > { %4447 = vmatprep.mubr.bf16.mxu1 %v10860_v5  ;;  %v2677_v9 = vsel %vm9609_vm7, %v2674_v52, %v2671_v32  ;;  %v2505_v4 = vsel %vm2475_vm0, %v2474_v19, 0.0  ;;  %v9656_v34 = vadd.f32 %v6075_v38, %v6011_v51  ;;  %v6720_v2 = vpop.eup %6719  ;;  %v2869_v23 = vadd.f32 %v2868_v3, %v2867_v48  ;;  %v6083_v27 = vpop.f32.mrb[135].mxu1 }
 0x22a   : > { %v2733_v46 = vsel %vm2541_vm6, %v9446_v18, %v2677_v9  ;;  %v2691_v60 = vadd.f32 1.0, %v2690_v39  ;;  %v2696_v21 = vadd.f32 1.0, %v6718_v11  ;;  %v6024_v30 = vpop.f32.mrb[138].mxu0  ;;  %v2680_v13 = vmul.f32 0.6931472, %v6720_v2  ;;  %v6085_v38 = vpop.f32.mrb[136].mxu1 }
 0x22b   : > { %v2845_v49 = vmul.f32 %v2808_v33, %v2733_v46  ;;  %v2699_v6 = vmul.f32 -0.5, %v6718_v11  ;;  %v2702_v51 = vand.u32 2147483647, %v6718_v11  ;;  %vm9665_vm10 = vcmp.lt.f32.partialorder %v2693_v55, 0.0004427343  ;;  %v6025_v19 = vpop.f32.mrb[139].mxu0 }
 0x22c   : > { %6725 = vlog2.f32 %v2696_v21  ;;  %v2506_v48 = vadd.f32 %v2505_v4, %v9599_v47  ;;  %v6017_v32 = vadd.f32 %v6016_v29, %v6015_v7  ;;  %v6078_v52 = vadd.f32 %v6077_v53, %v6076_v0  ;;  %v6086_v39 = vpop.f32.mrb[137].mxu1  ;;  %v9670_v5 = vpop.eup %6721  ;;  %v10867_v4 = vld [vmem:[#allocation28_spill] sm:$0xff]  ;;  %v10868_v46 = vld [vmem:[#allocation29_spill] sm:$0xff] }
 0x22d   : > { %v2870_v3 = vsel %vm2475_vm0, %v2845_v49, 0.0  ;;  %v2686_v33 = vsel %vm9645_vm9, %v2683_v24, %v2680_v13  ;;  %vm2543_vm11 = vcmp.gt.f32.partialorder %v9503_v42, 20.0  ;;  %v2700_v55 = vadd.f32 1.0, %v2699_v6  ;;  %v6027_v47 = vpop.f32.mrb[140].mxu0  ;;  %v6088_v7 = vpop.f32.mrb[138].mxu1 }
 0x22e   : > { %v2577_v9 = vmul.f32 1.442695, %v9614_v1  ;;  %v10865_v2 = vcombine.low %v10855_v36, %v10856_v14  ;;  %v2871_v0 = vadd.f32 %v2870_v3, %v2869_v23  ;;  %v2734_v29 = vsel %vm2542_vm8, %v9485_v15, %v2686_v33  ;;  %v6028_v36 = vpop.f32.mrb[141].mxu0  ;;  %v6089_v14 = vpop.f32.mrb[139].mxu1 }
 0x22f   : > { %v2705_v53 = vadd.f32 1.0, %v9670_v5  ;;  %v2708_v24 = vmul.f32 -0.5, %v9670_v5  ;;  %v10866_v62 = vcombine.low %v10858_v17, %v10859_v59  ;;  %v10869_v21 = vcombine.high %v10867_v4, %v10868_v46  ;;  %v6030_v33 = vpop.f32.mrb[142].mxu0 }
 0x230   : > { %4351 = vmatmul.mubr.bf16.gmra.mrb[248].mxu0 %v10865_v2  ;;  %v2846_v49 = vmul.f32 %v2813_v20, %v2734_v29  ;;  %v2692_v23 = vmul.f32 %v9605_v54, %v2691_v60  ;;  %v9692_v13 = vmul.f32 %v6718_v11, %v2700_v55  ;;  %v2507_v6 = vrot.slane %v2506_v48, 4  ;;  %v6091_v2 = vpop.f32.mrb[140].mxu1  ;;  %v6031_v11 = vpop.f32.mrb[143].mxu0 }
 0x231   : > { %4448 = vmatmul.mubr.bf16.gmra.mrb[248].mxu1 %v10866_v62  ;;  %4358 = vmatprep.mubr.bf16.mxu0 %v10869_v21  ;;  %v10870_v3 = vcombine.high %v10836_v45, %v9280_v16  ;;  %vm9697_vm12 = vcmp.lt.f32.partialorder %v2702_v51, 0.0004427343  ;;  %6727 = vlog2.f32 %v2705_v53  ;;  %v2709_v59 = vadd.f32 1.0, %v2708_v24  ;;  %v6092_v60 = vpop.f32.mrb[141].mxu1  ;;  %v6033_v29 = vpop.f32.mrb[144].mxu0 }
 0x232   : > { %v9702_v62 = vadd.f32 %v6078_v52, %v9603_v40  ;;  %v6020_v54 = vadd.f32 %v9640_v37, %v9630_v57  ;;  %v2872_v20 = vsel %vm2475_vm0, %v2846_v49, 0.0  ;;  %vm2544_vm13 = vcmp.gt.f32.partialorder %v9540_v56, 20.0  ;;  %v6094_v21 = vpop.f32.mrb[142].mxu1  ;;  %v6724_v53 = vpop.eup %6723 }
 0x233   : > { %4455 = vmatprep.mubr.bf16.mxu1 %v10870_v3  ;;  %v2508_v51 = vadd.f32 %v2507_v6, %v2506_v48  ;;  %6729 = vpow2.f32 %v2577_v9  ;;  %v2873_v24 = vadd.f32 %v2872_v20, %v2871_v0  ;;  %v9710_v40 = vmul.f32 %v9670_v5, %v2709_v59  ;;  %v6034_v52 = vpop.f32.mrb[145].mxu0  ;;  %v6095_v49 = vpop.f32.mrb[143].mxu1 }
 0x234   : > { %v6081_v57 = vadd.f32 %v9642_v10, %v9632_v25  ;;  %v6023_v37 = vadd.f32 %v9660_v26, %v9650_v28  ;;  %v2689_v3 = vmul.f32 0.6931472, %v6724_v53  ;;  %v6084_v48 = vadd.f32 %v6083_v27, %v9658_v44  ;;  %v6036_v6 = vpop.f32.mrb[146].mxu0  ;;  %v6097_v55 = vpop.f32.mrb[144].mxu1 }
 0x235   : > { %v2509_v35 = vrot.slane %v2508_v51, 2  ;;  %v6026_v9 = vadd.f32 %v6025_v19, %v6024_v30  ;;  %v6087_v0 = vadd.f32 %v6086_v39, %v6085_v38  ;;  %v6029_v59 = vadd.f32 %v6028_v36, %v6027_v47  ;;  %v6037_v41 = vpop.f32.mrb[147].mxu0  ;;  %v6098_v50 = vpop.f32.mrb[145].mxu1 }
 0x236   : > { %v9717_v31 = vadd.f32 %v6081_v57, %v6017_v32  ;;  %v6090_v20 = vadd.f32 %v6089_v14, %v6088_v7  ;;  %v2695_v25 = vsel %vm9665_vm10, %v2692_v23, %v2689_v3  ;;  %v10873_v28 = vcombine.low %v10867_v4, %v10868_v46  ;;  %v6100_v27 = vpop.f32.mrb[146].mxu1  ;;  %v6726_v30 = vpop.eup %6725 }
 0x237   : > { %v2510_v10 = vadd.f32 %v2509_v35, %v2508_v51  ;;  %v9724_v26 = vadd.f32 %v6084_v48, %v6020_v54  ;;  %v6032_v44 = vadd.f32 %v6031_v11, %v6030_v33  ;;  %v2818_v32 = vpop.permute.xlu0 %2817  ;;  %v2735_v38 = vsel %vm2543_vm11, %v9503_v42, %v2695_v25  ;;  %v6101_v47 = vpop.f32.mrb[147].mxu1 }
 0x238   : > { %4359 = vmatmul.mubr.bf16.gmra.mrb[252].mxu0 %v10873_v28  ;;  %v10874_v19 = vcombine.low %v10836_v45, %v9280_v16  ;;  %v9732_v58 = vadd.f32 %v6087_v0, %v6023_v37  ;;  %v9734_v35 = vadd.f32 %v6090_v20, %v6026_v9  ;;  %v6093_v39 = vadd.f32 %v6092_v60, %v6091_v2  ;;  %v2823_v14 = vpop.permute.xlu1 %2822  ;;  %v6039_v51 = vpop.f32.mrb[148].mxu0 }
 0x239   : > { %v2847_v7 = vmul.f32 %v2818_v32, %v2735_v38  ;;  %v2698_v4 = vmul.f32 0.6931472, %v6726_v30  ;;  %v2511_v46 = vrot.slane %v2510_v10, 1  ;;  %v6035_v36 = vadd.f32 %v6034_v52, %v6033_v29  ;;  %v6040_v2 = vpop.f32.mrb[149].mxu0  ;;  %v6103_v57 = vpop.f32.mrb[148].mxu1 }
 0x23a   : > { %4456 = vmatmul.mubr.bf16.gmra.mrb[252].mxu1 %v10874_v19  ;;  %v9736_v23 = vadd.f32 %v6093_v39, %v6029_v59  ;;  %v6096_v33 = vadd.f32 %v6095_v49, %v6094_v21  ;;  %v6038_v54 = vadd.f32 %v6037_v41, %v6036_v6  ;;  %v6099_v11 = vadd.f32 %v6098_v50, %v6097_v55  ;;  %v6042_v41 = vpop.f32.mrb[150].mxu0  ;;  %v6104_v55 = vpop.f32.mrb[149].mxu1 }
 0x23b   : > { %v2874_v16 = vsel %vm2475_vm0, %v2847_v7, 0.0  ;;  %v2704_v45 = vsel %vm9697_vm12, %v9692_v13, %v2698_v4  ;;  %v2512_v53 = vadd.f32 %v2511_v46, %v2510_v10  ;;  %v6102_v60 = vadd.f32 %v6101_v47, %v6100_v27  ;;  %v6728_v37 = vpop.eup %6727  ;;  %v6043_v9 = vpop.f32.mrb[151].mxu0 }
 0x23c   : > { %v2875_v3 = vadd.f32 %v2874_v16, %v2873_v24  ;;  %v2736_v29 = vsel %vm2544_vm13, %v9540_v56, %v2704_v45  ;;  %v9745_v21 = vadd.f32 %v6096_v33, %v6032_v44  ;;  %v9747_v50 = vadd.f32 %v6099_v11, %v6035_v36  ;;  %v6106_v6 = vpop.f32.mrb[150].mxu1  ;;  %v2828_v44 = vpop.permute.xlu0 %2827 }
 0x23d   : > { %v9749_v52 = vpop.eup %6729  ;;  %v2848_v17 = vmul.f32 %v2823_v14, %v2736_v29  ;;  %v2707_v13 = vmul.f32 0.6931472, %v6728_v37  ;;  %v2513_v49 = vmax.f32 %v2512_v53, 1e-24  ;;  %v6041_v48 = vadd.f32 %v6040_v2, %v6039_v51  ;;  %v6107_v20 = vpop.f32.mrb[151].mxu1 }
 0x23e   : > { %vm2545_vm14 = vcmp.gt.f32.partialorder %v9563_v12, 20.0  ;;  %v10875_v24 = vand.u32 2147483647, %v9670_v5  ;;  %v2714_v0 = vadd.f32 1.0, %v9749_v52  ;;  %v9755_v59 = vadd.f32 %v6102_v60, %v6038_v54  ;;  %v6045_v19 = vpop.f32.mrb[152].mxu0  ;;  %v6109_v46 = vpop.f32.mrb[152].mxu1 }
 0x23f   : > { %v2876_v25 = vsel %vm2475_vm0, %v2848_v17, 0.0  ;;  %6731 = vrsqrt.f32 %v2513_v49  ;;  %v6044_v28 = vadd.f32 %v6043_v9, %v6042_v41  ;;  %v6105_v38 = vadd.f32 %v6104_v55, %v6103_v57  ;;  %v6046_v4 = vpop.f32.mrb[153].mxu0  ;;  %v6110_v11 = vpop.f32.mrb[153].mxu1 }
 0x240   : > { %vm2712_vm15 = vcmp.lt.f32.partialorder %v10875_v24, 0.0004427343  ;;  %v2877_v27 = vadd.f32 %v2876_v25, %v2875_v3  ;;  %6733 = vlog2.f32 %v2714_v0  ;;  %v6108_v5 = vadd.f32 %v6107_v20, %v6106_v6  ;;  %v6048_v54 = vpop.f32.mrb[154].mxu0  ;;  %v6112_v45 = vpop.f32.mrb[154].mxu1 }
 0x241   : > { %v2713_v10 = vsel %vm2712_vm15, %v9710_v40, %v2707_v13  ;;  %vm402_vm1 = vcmask 7168   ;;  %v2717_v47 = vmul.f32 -0.5, %v9749_v52  ;;  %v9762_v7 = vadd.f32 %v6105_v38, %v6041_v48  ;;  %v6049_v51 = vpop.f32.mrb[155].mxu0  ;;  %v6113_v2 = vpop.f32.mrb[155].mxu1 }
 0x242   : > { %v2737_v30 = vsel %vm2545_vm14, %v9563_v12, %v2713_v10  ;;  %v9764_v40 = vadd.f32 %v6108_v5, %v6044_v28  ;;  %v6768_v36 = vmov 0.0   ;;  %v6047_v33 = vadd.f32 %v6046_v4, %v6045_v19  ;;  %v6051_v17 = vpop.f32.mrb[156].mxu0 }
 0x243   : > { %v2849_v32 = vmul.f32 %v2828_v44, %v2737_v30  ;;  %404 = vst.msk [vmem:[#allocation2 + $0x8] sm:$0xff] %vm402_vm1, %v6768_v36  ;;  %403 = vst.msk [vmem:[#allocation2] sm:$0xff] %vm402_vm1, %v6768_v36  ;;  %v6111_v16 = vadd.f32 %v6110_v11, %v6109_v46  ;;  %v6050_v53 = vadd.f32 %v6049_v51, %v6048_v54  ;;  %v2718_v60 = vadd.f32 1.0, %v2717_v47  ;;  %v6052_v48 = vpop.f32.mrb[157].mxu0  ;;  %v6115_v9 = vpop.f32.mrb[156].mxu1 }
 0x244   : > { %405 = vst.msk [vmem:[#allocation2 + $0x10] sm:$0xff] %vm402_vm1, %v6768_v36  ;;  %406 = vst.msk [vmem:[#allocation2 + $0x18] sm:$0xff] %vm402_vm1, %v6768_v36  ;;  %v6114_v37 = vadd.f32 %v6113_v2, %v6112_v45  ;;  %v2720_v3 = vand.u32 2147483647, %v9749_v52  ;;  %v6054_v0 = vpop.f32.mrb[158].mxu0  ;;  %v6116_v20 = vpop.f32.mrb[157].mxu1 }
 0x245   : > { %v2878_v39 = vsel %vm2475_vm0, %v2849_v32, 0.0  ;;  %407 = vst.msk [vmem:[#allocation2 + $0x20] sm:$0xff] %vm402_vm1, %v6768_v36  ;;  %408 = vst.msk [vmem:[#allocation2 + $0x28] sm:$0xff] %vm402_vm1, %v6768_v36  ;;  %v9798_v57 = vadd.f32 %v6111_v16, %v6047_v33  ;;  %v2719_v49 = vmul.f32 %v9749_v52, %v2718_v60  ;;  %vm2546_vm3 = vcmp.gt.f32.partialorder %v9614_v1, 20.0  ;;  %v6055_v28 = vpop.f32.mrb[159].mxu0  ;;  %v2833_v44 = vpop.permute.xlu1 %2832 }
 0x246   : > { %409 = vst.msk [vmem:[#allocation2 + $0x30] sm:$0xff] %vm402_vm1, %v6768_v36  ;;  %410 = vst.msk [vmem:[#allocation2 + $0x38] sm:$0xff] %vm402_vm1, %v6768_v36  ;;  %v2879_v14 = vadd.f32 %v2878_v39, %v2877_v27  ;;  %v9803_v41 = vadd.f32 %v6114_v37, %v6050_v53  ;;  %vm2721_vm2 = vcmp.lt.f32.partialorder %v2720_v3, 0.0004427343  ;;  %v6053_v32 = vadd.f32 %v6052_v48, %v6051_v17 }
 0x247   : > { %411 = vst.msk [vmem:[#allocation2 + $0x40] sm:$0xff] %vm402_vm1, %v6768_v36  ;;  %412 = vst.msk [vmem:[#allocation2 + $0x48] sm:$0xff] %vm402_vm1, %v6768_v36  ;;  %v6056_v5 = vadd.f32 %v6055_v28, %v6054_v0  ;;  %v6117_v19 = vadd.f32 %v6116_v20, %v6115_v9 }
 0x248   : > { %413 = vst.msk [vmem:[#allocation2 + $0x50] sm:$0xff] %vm402_vm1, %v6768_v36  ;;  %414 = vst.msk [vmem:[#allocation2 + $0x58] sm:$0xff] %vm402_vm1, %v6768_v36 }
 0x249   : > { %415 = vst.msk [vmem:[#allocation2 + $0x60] sm:$0xff] %vm402_vm1, %v6768_v36  ;;  %416 = vst.msk [vmem:[#allocation2 + $0x68] sm:$0xff] %vm402_vm1, %v6768_v36  ;;  %v9801_v29 = vpop.eup %6731  ;;  %v9833_v47 = vadd.f32 %v6117_v19, %v6053_v32 }
 0x24a   : > { %417 = vst.msk [vmem:[#allocation2 + $0x70] sm:$0xff] %vm402_vm1, %v6768_v36  ;;  %418 = vst.msk [vmem:[#allocation2 + $0x78] sm:$0xff] %vm402_vm1, %v6768_v36  ;;  %v6734_v55 = vpop.eup %6733  ;;  %v9808_v6 = vmul.f32 %v9801_v29, %v9446_v18  ;;  %v9812_v24 = vmul.f32 %v9801_v29, %v9503_v42  ;;  %v9817_v10 = vmul.f32 %v9801_v29, %v9563_v12  ;;  %v6118_v18 = vpop.f32.mrb[158].mxu1 }
 0x24b   : > { %419 = vst.msk [vmem:[#allocation3] sm:$0xff] %vm402_vm1, %v6768_v36  ;;  %420 = vst.msk [vmem:[#allocation3 + $0x8] sm:$0xff] %vm402_vm1, %v6768_v36  ;;  %v2716_v13 = vmul.f32 0.6931472, %v6734_v55  ;;  %v9821_v52 = vmul.f32 %v9801_v29, %v9485_v15  ;;  %v9826_v42 = vmul.f32 %v9801_v29, %v9540_v56  ;;  %v9830_v30 = vmul.f32 %v9801_v29, %v9614_v1  ;;  %v6119_v12 = vpop.f32.mrb[159].mxu1 }
 0x24c   : > { %421 = vst.msk [vmem:[#allocation3 + $0x10] sm:$0xff] %vm402_vm1, %v6768_v36  ;;  %422 = vst.msk [vmem:[#allocation3 + $0x18] sm:$0xff] %vm402_vm1, %v6768_v36  ;;  %v6120_v15 = vadd.f32 %v6119_v12, %v6118_v18  ;;  %v6201_v33 = vpop.f32.mrb[160].mxu1 }
 0x24d   : > { %423 = vst.msk [vmem:[#allocation3 + $0x20] sm:$0xff] %vm402_vm1, %v6768_v36  ;;  %424 = vst.msk [vmem:[#allocation3 + $0x28] sm:$0xff] %vm402_vm1, %v6768_v36  ;;  %v2722_v25 = vsel %vm2721_vm2, %v2719_v49, %v2716_v13  ;;  %v6202_v51 = vpop.f32.mrb[161].mxu1 }
 0x24e   : > { %425 = vst.msk [vmem:[#allocation3 + $0x30] sm:$0xff] %vm402_vm1, %v6768_v36  ;;  %426 = vst.msk [vmem:[#allocation3 + $0x38] sm:$0xff] %vm402_vm1, %v6768_v36  ;;  %v2738_v27 = vsel %vm2546_vm3, %v9614_v1, %v2722_v25  ;;  %v9835_v4 = vadd.f32 %v6120_v15, %v6056_v5  ;;  %v6203_v45 = vadd.f32 %v6202_v51, %v6201_v33  ;;  %v6204_v53 = vpop.f32.mrb[162].mxu1 }
 0x24f   : > { %427 = vst.msk [vmem:[#allocation3 + $0x40] sm:$0xff] %vm402_vm1, %v6768_v36  ;;  %428 = vst.msk [vmem:[#allocation3 + $0x48] sm:$0xff] %vm402_vm1, %v6768_v36  ;;  %v2850_v38 = vmul.f32 %v2833_v44, %v2738_v27  ;;  %v6205_v3 = vpop.f32.mrb[163].mxu1  ;;  %v2889_v27 = vstv %s2888_s12 }
 0x250   : > { %429 = vst.msk [vmem:[#allocation3 + $0x50] sm:$0xff] %vm402_vm1, %v6768_v36  ;;  %430 = vst.msk [vmem:[#allocation3 + $0x58] sm:$0xff] %vm402_vm1, %v6768_v36  ;;  %v6206_v55 = vadd.f32 %v6205_v3, %v6204_v53 }
 0x251   : > { %431 = vst.msk [vmem:[#allocation3 + $0x60] sm:$0xff] %vm402_vm1, %v6768_v36  ;;  %432 = vst.msk [vmem:[#allocation3 + $0x68] sm:$0xff] %vm402_vm1, %v6768_v36  ;;  %v2880_v39 = vsel %vm2475_vm0, %v2850_v38, 0.0 }
 0x252   : > { %433 = vst.msk [vmem:[#allocation3 + $0x70] sm:$0xff] %vm402_vm1, %v6768_v36  ;;  %434 = vst.msk [vmem:[#allocation3 + $0x78] sm:$0xff] %vm402_vm1, %v6768_v36  ;;  %v2881_v46 = vadd.f32 %v2880_v39, %v2879_v14  ;;  %v6137_v36 = vpop.f32.mrb[160].mxu0 }
 0x253   : > { %v6138_v56 = vpop.f32.mrb[161].mxu0  ;;  %v6207_v20 = vpop.f32.mrb[164].mxu1 }
 0x254   : > { %v2882_v54 = vrot.slane %v2881_v46, 4  ;;  %v6139_v11 = vadd.f32 %v6138_v56, %v6137_v36  ;;  %v6140_v1 = vpop.f32.mrb[162].mxu0  ;;  %v6208_v44 = vpop.f32.mrb[165].mxu1 }
 0x255   : > { %v6141_v16 = vpop.f32.mrb[163].mxu0  ;;  %v6209_v32 = vadd.f32 %v6208_v44, %v6207_v20  ;;  %v6210_v12 = vpop.f32.mrb[166].mxu1 }
 0x256   : > { %v2883_v2 = vadd.f32 %v2882_v54, %v2881_v46  ;;  %v3917_v60 = vadd.f32 %v6139_v11, %v9656_v34  ;;  %v6142_v37 = vadd.f32 %v6141_v16, %v6140_v1  ;;  %v6143_v48 = vpop.f32.mrb[164].mxu0  ;;  %v6211_v19 = vpop.f32.mrb[167].mxu1 }
 0x257   : > { %v6144_v0 = vpop.f32.mrb[165].mxu0  ;;  %v6212_v15 = vadd.f32 %v6211_v19, %v6210_v12 }
 0x258   : > { %v2884_v17 = vrot.slane %v2883_v2, 2  ;;  %v3920_v14 = vadd.f32 %v6142_v37, %v9702_v62  ;;  %v9839_v13 = vadd.f32 %v6203_v45, %v3917_v60  ;;  %v6145_v28 = vadd.f32 %v6144_v0, %v6143_v48  ;;  %v6146_v18 = vpop.f32.mrb[166].mxu0 }
 0x259   : > { %v6147_v34 = vpop.f32.mrb[167].mxu0 }
 0x25a   : > { %v2885_v49 = vadd.f32 %v2884_v17, %v2883_v2  ;;  %v9841_v9 = vadd.f32 %v6206_v55, %v3920_v14  ;;  %v3925_v5 = vadd.f32 %v6145_v28, %v9717_v31  ;;  %v6148_v62 = vadd.f32 %v6147_v34, %v6146_v18  ;;  %v6149_v33 = vpop.f32.mrb[168].mxu0 }
 0x25b   : > { %v6150_v11 = vpop.f32.mrb[169].mxu0  ;;  %v6213_v1 = vpop.f32.mrb[168].mxu1 }
 0x25c   : > { %v2886_v25 = vrot.slane %v2885_v49, 1  ;;  %v3928_v46 = vadd.f32 %v6148_v62, %v9724_v26  ;;  %v9847_v36 = vadd.f32 %v6209_v32, %v3925_v5  ;;  %v6151_v51 = vadd.f32 %v6150_v11, %v6149_v33  ;;  %v6152_v16 = vpop.f32.mrb[170].mxu0  ;;  %v6214_v31 = vpop.f32.mrb[169].mxu1 }
 0x25d   : > { %v6153_v45 = vpop.f32.mrb[171].mxu0  ;;  %v6215_v53 = vadd.f32 %v6214_v31, %v6213_v1  ;;  %v6216_v2 = vpop.f32.mrb[170].mxu1 }
 0x25e   : > { %v2887_v38 = vadd.f32 %v2886_v25, %v2885_v49  ;;  %v9850_v54 = vadd.f32 %v6212_v15, %v3928_v46  ;;  %v3933_v60 = vadd.f32 %v6151_v51, %v9732_v58  ;;  %v6154_v37 = vadd.f32 %v6153_v45, %v6152_v16  ;;  %v6217_v26 = vpop.f32.mrb[171].mxu1 }
 0x25f   : > { %v6218_v3 = vadd.f32 %v6217_v26, %v6216_v2 }
 0x260   : > { %v9844_v39 = vadd.f32 %v2889_v27, %v2887_v38  ;;  %v3936_v55 = vadd.f32 %v6154_v37, %v9734_v35  ;;  %v9854_v17 = vadd.f32 %v6215_v53, %v3933_v60 }
 0x262   : > { %v2892_v56 = vmul.f32 1.442695, %v9844_v39  ;;  %v6155_v14 = vpop.f32.mrb[172].mxu0  ;;  %v9856_v49 = vadd.f32 %v6218_v3, %v3936_v55  ;;  %vm2891_vm5 = vcmp.gt.f32.partialorder %v9844_v39, 20.0 }
 0x263   : > { %v6156_v48 = vpop.f32.mrb[173].mxu0  ;;  %v6219_v0 = vpop.f32.mrb[172].mxu1 }
 0x264   : > { %6735 = vpow2.f32 %v2892_v56  ;;  %v6157_v20 = vadd.f32 %v6156_v48, %v6155_v14  ;;  %v6158_v25 = vpop.f32.mrb[174].mxu0  ;;  %v6220_v28 = vpop.f32.mrb[173].mxu1 }
 0x265   : > { %v6159_v18 = vpop.f32.mrb[175].mxu0  ;;  %v6221_v44 = vadd.f32 %v6220_v28, %v6219_v0  ;;  %v6222_v27 = vpop.f32.mrb[174].mxu1  ;;  %v10876_v0 = vld [vmem:[#allocation10_spill] sm:$0xff] }
 0x266   : > { %v3941_v58 = vadd.f32 %v6157_v20, %v9736_v23  ;;  %v6160_v32 = vadd.f32 %v6159_v18, %v6158_v25  ;;  %v6223_v12 = vpop.f32.mrb[175].mxu1  ;;  %v2516_v20 = vmul.f32 %v9801_v29, %v10876_v0  ;;  %v10877_v25 = vld [vmem:[#allocation9_spill] sm:$0xff] }
 0x267   : > { %v6224_v35 = vadd.f32 %v6223_v12, %v6222_v27  ;;  %v2515_v28 = vmul.f32 %v9801_v29, %v10877_v25 }
 0x268   : > { %v3944_v5 = vadd.f32 %v6160_v32, %v9745_v21  ;;  %v9860_v62 = vadd.f32 %v6221_v44, %v3941_v58  ;;  %v2517_v58 = vmul.f32 %v9801_v29, %v9052_v63 }
 0x26a   : > { %v6161_v19 = vpop.f32.mrb[176].mxu0  ;;  %v9862_v15 = vadd.f32 %v6224_v35, %v3944_v5  ;;  %v2521_v35 = vmul.f32 %v9801_v29, %v9235_v22  ;;  %v2518_v5 = vmul.f32 %v9801_v29, %v9063_v61 }
 0x26b   : > { %v6162_v46 = vpop.f32.mrb[177].mxu0  ;;  %v6225_v56 = vpop.f32.mrb[176].mxu1 }
 0x26c   : > { %v6163_v11 = vadd.f32 %v6162_v46, %v6161_v19  ;;  %v6164_v1 = vpop.f32.mrb[178].mxu0  ;;  %v6226_v51 = vpop.f32.mrb[177].mxu1 }
 0x26d   : > { %v6165_v16 = vpop.f32.mrb[179].mxu0  ;;  %v6227_v23 = vadd.f32 %v6226_v51, %v6225_v56  ;;  %v6228_v31 = vpop.f32.mrb[178].mxu1  ;;  %v10878_v51 = vld [vmem:[#allocation27_spill] sm:$0xff] }
 0x26e   : > { %v6736_v34 = vpop.eup %6735  ;;  %v3949_v45 = vadd.f32 %v6163_v11, %v9747_v50  ;;  %v6166_v53 = vadd.f32 %v6165_v16, %v6164_v1  ;;  %v6229_v2 = vpop.f32.mrb[179].mxu1  ;;  %v2519_v50 = vmul.f32 %v9801_v29, %v9133_v8  ;;  %v2523_v1 = vmul.f32 %v9801_v29, %v9360_v43  ;;  %v10880_v43 = vld [vmem:[#allocation32_spill] sm:$0xff] }
 0x26f   : > { %v2894_v38 = vadd.f32 1.0, %v6736_v34  ;;  %v2897_v33 = vmul.f32 -0.5, %v6736_v34  ;;  %v6230_v21 = vadd.f32 %v6229_v2, %v6228_v31  ;;  %v2900_v3 = vand.u32 2147483647, %v6736_v34 }
 0x270   : > { %v3952_v37 = vadd.f32 %v6166_v53, %v9755_v59  ;;  %v9866_v26 = vadd.f32 %v6227_v23, %v3949_v45  ;;  %v2520_v22 = vmul.f32 %v9801_v29, %v10878_v51 }
 0x271   : > { %6737 = vlog2.f32 %v2894_v38  ;;  %v2898_v60 = vadd.f32 1.0, %v2897_v33  ;;  %vm2901_vm4 = vcmp.lt.f32.partialorder %v2900_v3, 0.0004427343 }
 0x272   : > { %v6167_v55 = vpop.f32.mrb[180].mxu0  ;;  %v9868_v14 = vadd.f32 %v6230_v21, %v3952_v37 }
 0x273   : > { %v6168_v18 = vpop.f32.mrb[181].mxu0  ;;  %v6231_v44 = vpop.f32.mrb[180].mxu1  ;;  %v2899_v59 = vmul.f32 %v6736_v34, %v2898_v60 }
 0x274   : > { %v6169_v32 = vadd.f32 %v6168_v18, %v6167_v55  ;;  %v6170_v12 = vpop.f32.mrb[182].mxu0  ;;  %v6232_v38 = vpop.f32.mrb[181].mxu1  ;;  %v2524_v55 = vmul.f32 %v9801_v29, %v10880_v43 }
 0x275   : > { %v6171_v19 = vpop.f32.mrb[183].mxu0  ;;  %v6233_v46 = vadd.f32 %v6232_v38, %v6231_v44  ;;  %v6234_v8 = vpop.f32.mrb[182].mxu1 }
 0x276   : > { %v3957_v34 = vadd.f32 %v6169_v32, %v9762_v7  ;;  %v6172_v33 = vadd.f32 %v6171_v19, %v6170_v12  ;;  %v6235_v63 = vpop.f32.mrb[183].mxu1 }
 0x277   : > { %v6236_v16 = vadd.f32 %v6235_v63, %v6234_v8 }
 0x27b   : > { %v6738_v48 = vpop.eup %6737 }
 0x27c   : > { %v2896_v27 = vmul.f32 0.6931472, %v6738_v48  ;;  %v6173_v48 = vpop.f32.mrb[184].mxu0 }
 0x27d   : > { %v6174_v0 = vpop.f32.mrb[185].mxu0 }
 0x27e   : > { %v2902_v56 = vsel %vm2901_vm4, %v2899_v59, %v2896_v27  ;;  %v6176_v44 = vpop.f32.mrb[186].mxu0 }
 0x27f   : > { %v2903_v11 = vsel %vm2891_vm5, %v9844_v39, %v2902_v56  ;;  %v10879_v39 = vld [vmem:[#allocation30_spill] sm:$0xff] }
 0x280   : > { %v2905_v61 = vmul.f32 %v2903_v11, %v2516_v20  ;;  %v2904_v23 = vmul.f32 %v2903_v11, %v2515_v28  ;;  %v2908_v31 = vmul.f32 %v2903_v11, %v2519_v50  ;;  %v2906_v45 = vmul.f32 %v2903_v11, %v2517_v58  ;;  %v6237_v20 = vpop.f32.mrb[184].mxu1 }
 0x281   : > { %v2910_v53 = vmul.f32 %v2903_v11, %v2521_v35  ;;  %v2907_v2 = vmul.f32 %v2903_v11, %v2518_v5  ;;  %v2912_v21 = vmul.f32 %v2903_v11, %v2523_v1  ;;  %v2909_v60 = vmul.f32 %v2903_v11, %v2520_v22  ;;  %v6238_v27 = vpop.f32.mrb[185].mxu1 }
 0x282   : > { %v4483_v7 = vsel %vm2475_vm0, %v2905_v61, 0.0  ;;  %v4480_v37 = vsel %vm2475_vm0, %v2904_v23, 0.0  ;;  %v2522_v3 = vmul.f32 %v9801_v29, %v10879_v39  ;;  %v2914_v25 = vmul.f32 %v2903_v11, %v9808_v6  ;;  %v6177_v6 = vpop.f32.mrb[187].mxu0  ;;  %v6240_v12 = vpop.f32.mrb[186].mxu1 }
 0x283   : > { %4484 = vadd.xlane.f32.xlu1 %v4483_v7  ;;  %4481 = vadd.xlane.f32.xlu0 %v4480_v37  ;;  %v9897_v50 = vmul.f32 %v2903_v11, %v9812_v24  ;;  %v9899_v18 = vmul.f32 %v2903_v11, %v2524_v55  ;;  %v9902_v59 = vmul.f32 %v2903_v11, %v9817_v10  ;;  %v4492_v24 = vsel %vm2475_vm0, %v2908_v31, 0.0  ;;  %v6241_v35 = vpop.f32.mrb[187].mxu1  ;;  %v6179_v51 = vpop.f32.mrb[188].mxu0 }
 0x284   : > { %v2911_v28 = vmul.f32 %v2903_v11, %v2522_v3  ;;  %v9905_v29 = vmul.f32 %v2903_v11, %v9821_v52  ;;  %v9908_v58 = vmul.f32 %v2903_v11, %v9826_v42  ;;  %v9911_v32 = vmul.f32 %v2903_v11, %v9830_v30 }
 0x285   : > { %v4486_v38 = vsel %vm2475_vm0, %v2906_v45, 0.0  ;;  %v3960_v10 = vadd.f32 %v6172_v33, %v9764_v40  ;;  %v9916_v5 = vadd.f32 %v6233_v46, %v3957_v34  ;;  %v6175_v52 = vadd.f32 %v6174_v0, %v6173_v48  ;;  %v6180_v40 = vpop.f32.mrb[189].mxu0  ;;  %v6243_v46 = vpop.f32.mrb[188].mxu1 }
 0x286   : > { %v6178_v19 = vadd.f32 %v6177_v6, %v6176_v44  ;;  %v4498_v42 = vsel %vm2475_vm0, %v2910_v53, 0.0  ;;  %v6239_v8 = vadd.f32 %v6238_v27, %v6237_v20  ;;  %v6242_v30 = vadd.f32 %v6241_v35, %v6240_v12  ;;  %v6182_v61 = vpop.f32.mrb[190].mxu0  ;;  %v6244_v23 = vpop.f32.mrb[189].mxu1 }
 0x287   : > { %4493 = vadd.xlane.f32.xlu1 %v4492_v24  ;;  %4487 = vadd.xlane.f32.xlu0 %v4486_v38  ;;  %v4489_v56 = vsel %vm2475_vm0, %v2907_v2, 0.0  ;;  %v3965_v63 = vadd.f32 %v6175_v52, %v9798_v57  ;;  %v9921_v11 = vadd.f32 %v6236_v16, %v3960_v10  ;;  %v6181_v33 = vadd.f32 %v6180_v40, %v6179_v51  ;;  %v6183_v31 = vpop.f32.mrb[191].mxu0  ;;  %v6246_v53 = vpop.f32.mrb[190].mxu1 }
 0x288   : > { %v3968_v1 = vadd.f32 %v6178_v19, %v9803_v41  ;;  %v6245_v45 = vadd.f32 %v6244_v23, %v6243_v46  ;;  %v4504_v57 = vsel %vm2475_vm0, %v2912_v21, 0.0  ;;  %v4495_v16 = vsel %vm2475_vm0, %v2909_v60, 0.0  ;;  %v6247_v7 = vpop.f32.mrb[191].mxu1 }
 0x289   : > { %v9924_v34 = vadd.f32 %v6239_v8, %v3965_v63  ;;  %v3973_v41 = vadd.f32 %v6181_v33, %v9833_v47  ;;  %v6184_v2 = vadd.f32 %v6183_v31, %v6182_v61  ;;  %v6248_v37 = vadd.f32 %v6247_v7, %v6246_v53 }
 0x28a   : > { %v9926_v22 = vadd.f32 %v6242_v30, %v3968_v1  ;;  %v4510_v43 = vsel %vm2475_vm0, %v2914_v25, 0.0  ;;  %v4501_v55 = vsel %vm2475_vm0, %v2911_v28, 0.0  ;;  %v6265_v48 = vpop.f32.mrb[192].mxu0  ;;  %v4507_v25 = vsel %vm2475_vm0, %v9899_v18, 0.0 }
 0x28b   : > { %4499 = vadd.xlane.f32.xlu1 %v4498_v42  ;;  %4490 = vadd.xlane.f32.xlu0 %v4489_v56  ;;  %v3976_v39 = vadd.f32 %v6184_v2, %v9835_v4  ;;  %v9932_v3 = vadd.f32 %v6245_v45, %v3973_v41  ;;  %v6266_v21 = vpop.f32.mrb[193].mxu0  ;;  %v6329_v47 = vpop.f32.mrb[192].mxu1  ;;  %v4516_v4 = vsel %vm2475_vm0, %v9897_v50, 0.0  ;;  %v4522_v19 = vsel %vm2475_vm0, %v9902_v59, 0.0 }
 0x28c   : > { %v6267_v60 = vadd.f32 %v6266_v21, %v6265_v48  ;;  %v6268_v20 = vpop.f32.mrb[194].mxu0  ;;  %v6330_v44 = vpop.f32.mrb[193].mxu1  ;;  %v4513_v50 = vsel %vm2475_vm0, %v9905_v29, 0.0  ;;  %v4519_v40 = vsel %vm2475_vm0, %v9908_v58, 0.0  ;;  %v4525_v31 = vsel %vm2475_vm0, %v9911_v32, 0.0 }
 0x28d   : > { %v9936_v0 = vadd.f32 %v6248_v37, %v3976_v39  ;;  %v6269_v27 = vpop.f32.mrb[195].mxu0  ;;  %v6331_v6 = vadd.f32 %v6330_v44, %v6329_v47  ;;  %v6332_v12 = vpop.f32.mrb[194].mxu1 }
 0x28e   : > { %v4111_v28 = vadd.f32 %v6267_v60, %v9839_v13  ;;  %v6270_v24 = vadd.f32 %v6269_v27, %v6268_v20  ;;  %v6333_v38 = vpop.f32.mrb[195].mxu1 }
 0x28f   : > { %4505 = vadd.xlane.f32.xlu1 %v4504_v57  ;;  %4496 = vadd.xlane.f32.xlu0 %v4495_v16  ;;  %v6334_v35 = vadd.f32 %v6333_v38, %v6332_v12 }
 0x290   : > { %v4114_v10 = vadd.f32 %v6270_v24, %v9841_v9  ;;  %v9944_v52 = vadd.f32 %v6331_v6, %v4111_v28 }
 0x292   : > { %v6271_v42 = vpop.f32.mrb[196].mxu0  ;;  %v9950_v8 = vadd.f32 %v6334_v35, %v4114_v10 }
 0x293   : > { %4511 = vadd.xlane.f32.xlu1 %v4510_v43  ;;  %4502 = vadd.xlane.f32.xlu0 %v4501_v55  ;;  %v6272_v13 = vpop.f32.mrb[197].mxu0  ;;  %v6335_v18 = vpop.f32.mrb[196].mxu1 }
 0x294   : > { %v6273_v30 = vadd.f32 %v6272_v13, %v6271_v42  ;;  %v6274_v56 = vpop.f32.mrb[198].mxu0  ;;  %v6336_v63 = vpop.f32.mrb[197].mxu1 }
 0x295   : > { %v6275_v1 = vpop.f32.mrb[199].mxu0  ;;  %v6337_v9 = vadd.f32 %v6336_v63, %v6335_v18  ;;  %v6338_v51 = vpop.f32.mrb[198].mxu1 }
 0x296   : > { %v4119_v59 = vadd.f32 %v6273_v30, %v9847_v36  ;;  %v6276_v46 = vadd.f32 %v6275_v1, %v6274_v56  ;;  %v6339_v29 = vpop.f32.mrb[199].mxu1 }
 0x297   : > { %4517 = vadd.xlane.f32.xlu1 %v4516_v4  ;;  %4508 = vadd.xlane.f32.xlu0 %v4507_v25  ;;  %v6340_v33 = vadd.f32 %v6339_v29, %v6338_v51 }
 0x298   : > { %v4122_v61 = vadd.f32 %v6276_v46, %v9850_v54  ;;  %v9956_v23 = vadd.f32 %v6337_v9, %v4119_v59 }
 0x29a   : > { %v6277_v45 = vpop.f32.mrb[200].mxu0  ;;  %v9960_v53 = vadd.f32 %v6340_v33, %v4122_v61 }
 0x29b   : > { %4523 = vadd.xlane.f32.xlu1 %v4522_v19  ;;  %4514 = vadd.xlane.f32.xlu0 %v4513_v50  ;;  %v6278_v57 = vpop.f32.mrb[201].mxu0  ;;  %v6341_v16 = vpop.f32.mrb[200].mxu1 }
 0x29c   : > { %v6279_v58 = vadd.f32 %v6278_v57, %v6277_v45  ;;  %v6280_v41 = vpop.f32.mrb[202].mxu0  ;;  %v6342_v36 = vpop.f32.mrb[201].mxu1 }
 0x29d   : > { %v6281_v2 = vpop.f32.mrb[203].mxu0  ;;  %v6343_v7 = vadd.f32 %v6342_v36, %v6341_v16  ;;  %v6344_v37 = vpop.f32.mrb[202].mxu1 }
 0x29e   : > { %v4127_v39 = vadd.f32 %v6279_v58, %v9854_v17  ;;  %v6282_v54 = vadd.f32 %v6281_v2, %v6280_v41  ;;  %v6345_v43 = vpop.f32.mrb[203].mxu1 }
 0x29f   : > { %4520 = vadd.xlane.f32.xlu0 %v4519_v40  ;;  %v6346_v55 = vadd.f32 %v6345_v43, %v6344_v37 }
 0x2a0   : > { %v4130_v48 = vadd.f32 %v6282_v54, %v9856_v49  ;;  %v9964_v32 = vadd.f32 %v6343_v7, %v4127_v39 }
 0x2a2   : > { %v6283_v21 = vpop.f32.mrb[204].mxu0  ;;  %v9966_v47 = vadd.f32 %v6346_v55, %v4130_v48 }
 0x2a3   : > { %4526 = vadd.xlane.f32.xlu0 %v4525_v31  ;;  %v6284_v60 = vpop.f32.mrb[205].mxu0  ;;  %v6347_v20 = vpop.f32.mrb[204].mxu1 }
 0x2a4   : > { %v6285_v44 = vadd.f32 %v6284_v60, %v6283_v21  ;;  %v6286_v27 = vpop.f32.mrb[206].mxu0  ;;  %v6348_v6 = vpop.f32.mrb[205].mxu1 }
 0x2a5   : > { %v6287_v12 = vpop.f32.mrb[207].mxu0  ;;  %v6349_v4 = vadd.f32 %v6348_v6, %v6347_v20  ;;  %v6350_v25 = vpop.f32.mrb[206].mxu1 }
 0x2a6   : > { %v4135_v17 = vadd.f32 %v6285_v44, %v9860_v62  ;;  %v6288_v28 = vadd.f32 %v6287_v12, %v6286_v27  ;;  %v6351_v24 = vpop.f32.mrb[207].mxu1 }
 0x2a7   : > { %v6352_v38 = vadd.f32 %v6351_v24, %v6350_v25 }
 0x2a8   : > { %v4138_v49 = vadd.f32 %v6288_v28, %v9862_v15  ;;  %v9970_v35 = vadd.f32 %v6349_v4, %v4135_v17 }
 0x2aa   : > { %v6289_v10 = vpop.f32.mrb[208].mxu0  ;;  %v9972_v19 = vadd.f32 %v6352_v38, %v4138_v49 }
 0x2ab   : > { %v6290_v50 = vpop.f32.mrb[209].mxu0  ;;  %v6353_v42 = vpop.f32.mrb[208].mxu1 }
 0x2ac   : > { %v6291_v13 = vadd.f32 %v6290_v50, %v6289_v10  ;;  %v6292_v18 = vpop.f32.mrb[210].mxu0  ;;  %v6354_v30 = vpop.f32.mrb[209].mxu1 }
 0x2ad   : > { %v6293_v56 = vpop.f32.mrb[211].mxu0  ;;  %v6355_v63 = vadd.f32 %v6354_v30, %v6353_v42  ;;  %v6356_v1 = vpop.f32.mrb[210].mxu1 }
 0x2ae   : > { %v4143_v62 = vadd.f32 %v6291_v13, %v9866_v26  ;;  %v6294_v9 = vadd.f32 %v6293_v56, %v6292_v18  ;;  %v6357_v51 = vpop.f32.mrb[211].mxu1 }
 0x2af   : > { %v6358_v40 = vadd.f32 %v6357_v51, %v6356_v1 }
 0x2b0   : > { %v4146_v15 = vadd.f32 %v6294_v9, %v9868_v14  ;;  %v9976_v59 = vadd.f32 %v6355_v63, %v4143_v62 }
 0x2b2   : > { %v6295_v46 = vpop.f32.mrb[212].mxu0  ;;  %v9978_v29 = vadd.f32 %v6358_v40, %v4146_v15 }
 0x2b3   : > { %v6296_v33 = vpop.f32.mrb[213].mxu0  ;;  %v6359_v61 = vpop.f32.mrb[212].mxu1 }
 0x2b4   : > { %v6297_v31 = vadd.f32 %v6296_v33, %v6295_v46  ;;  %v6298_v45 = vpop.f32.mrb[214].mxu0  ;;  %v6360_v57 = vpop.f32.mrb[213].mxu1 }
 0x2b5   : > { %v6299_v16 = vpop.f32.mrb[215].mxu0  ;;  %v6361_v58 = vadd.f32 %v6360_v57, %v6359_v61  ;;  %v6362_v41 = vpop.f32.mrb[214].mxu1 }
 0x2b6   : > { %v4151_v26 = vadd.f32 %v6297_v31, %v9916_v5  ;;  %v6300_v36 = vadd.f32 %v6299_v16, %v6298_v45  ;;  %v6363_v2 = vpop.f32.mrb[215].mxu1 }
 0x2b7   : > { %v6364_v7 = vadd.f32 %v6363_v2, %v6362_v41 }
 0x2b8   : > { %v4154_v14 = vadd.f32 %v6300_v36, %v9921_v11  ;;  %v9982_v37 = vadd.f32 %v6361_v58, %v4151_v26 }
 0x2ba   : > { %v6301_v39 = vpop.f32.mrb[216].mxu0  ;;  %v9984_v54 = vadd.f32 %v6364_v7, %v4154_v14 }
 0x2bb   : > { %v6302_v43 = vpop.f32.mrb[217].mxu0 }
 0x2bc   : > { %v6365_v55 = vpop.f32.mrb[216].mxu1  ;;  %v6303_v48 = vadd.f32 %v6302_v43, %v6301_v39  ;;  %v6304_v21 = vpop.f32.mrb[218].mxu0 }
 0x2bd   : > { %v6366_v60 = vpop.f32.mrb[217].mxu1  ;;  %v6305_v20 = vpop.f32.mrb[219].mxu0 }
 0x2be   : > { %v6367_v44 = vadd.f32 %v6366_v60, %v6365_v55  ;;  %v6368_v27 = vpop.f32.mrb[218].mxu1  ;;  %v4159_v5 = vadd.f32 %v6303_v48, %v9924_v34  ;;  %v6306_v6 = vadd.f32 %v6305_v20, %v6304_v21 }
 0x2bf   : > { %v6369_v12 = vpop.f32.mrb[219].mxu1 }
 0x2c0   : > { %v6370_v4 = vadd.f32 %v6369_v12, %v6368_v27  ;;  %v4162_v11 = vadd.f32 %v6306_v6, %v9926_v22  ;;  %v9988_v25 = vadd.f32 %v6367_v44, %v4159_v5 }
 0x2c2   : > { %v9990_v28 = vadd.f32 %v6370_v4, %v4162_v11 }
 0x2c3   : > { %v6307_v17 = vpop.f32.mrb[220].mxu0 }
 0x2c4   : > { %v6308_v24 = vpop.f32.mrb[221].mxu0  ;;  %v6371_v38 = vpop.f32.mrb[220].mxu1 }
 0x2c5   : > { %v6309_v49 = vadd.f32 %v6308_v24, %v6307_v17  ;;  %v6310_v10 = vpop.f32.mrb[222].mxu0  ;;  %v6372_v50 = vpop.f32.mrb[221].mxu1 }
 0x2c6   : > { %v6311_v42 = vpop.f32.mrb[223].mxu0  ;;  %v6373_v13 = vadd.f32 %v6372_v50, %v6371_v38  ;;  %v6374_v18 = vpop.f32.mrb[222].mxu1 }
 0x2c7   : > { %v4167_v34 = vadd.f32 %v6309_v49, %v9932_v3  ;;  %v6312_v30 = vadd.f32 %v6311_v42, %v6310_v10  ;;  %v6375_v56 = vpop.f32.mrb[223].mxu1 }
 0x2c8   : > { %v6376_v63 = vadd.f32 %v6375_v56, %v6374_v18 }
 0x2c9   : > { %v4170_v22 = vadd.f32 %v6312_v30, %v9936_v0  ;;  %v9994_v1 = vadd.f32 %v6373_v13, %v4167_v34 }
 0x2cb   : > { %v6393_v62 = vpop.f32.mrb[224].mxu0  ;;  %v9996_v9 = vadd.f32 %v6376_v63, %v4170_v22 }
 0x2cc   : > { %v6394_v51 = vpop.f32.mrb[225].mxu0  ;;  %v6457_v40 = vpop.f32.mrb[224].mxu1 }
 0x2cd   : > { %v6395_v15 = vadd.f32 %v6394_v51, %v6393_v62  ;;  %v6396_v46 = vpop.f32.mrb[226].mxu0  ;;  %v6458_v33 = vpop.f32.mrb[225].mxu1 }
 0x2ce   : > { %v6397_v61 = vpop.f32.mrb[227].mxu0  ;;  %v6459_v31 = vadd.f32 %v6458_v33, %v6457_v40  ;;  %v6460_v45 = vpop.f32.mrb[226].mxu1 }
 0x2cf   : > { %v4305_v3 = vadd.f32 %v6395_v15, %v9944_v52  ;;  %v6398_v57 = vadd.f32 %v6397_v61, %v6396_v46  ;;  %v6461_v16 = vpop.f32.mrb[227].mxu1 }
 0x2d0   : > { %v6462_v58 = vadd.f32 %v6461_v16, %v6460_v45 }
 0x2d1   : > { %v4308_v0 = vadd.f32 %v6398_v57, %v9950_v8  ;;  %v4402_v41 = vadd.f32 %v6459_v31, %v4305_v3 }
 0x2d3   : > { %v4577_v36 = vsel %vm2475_vm0, %v4402_v41, 0.0  ;;  %v4405_v2 = vadd.f32 %v6462_v58, %v4308_v0 }
 0x2d4   : > { %4578 = vadd.xlane.f32.xlu1 %v4577_v36 }
 0x2d5   : > { %v6399_v26 = vpop.f32.mrb[228].mxu0  ;;  %v4580_v48 = vsel %vm2475_vm0, %v4405_v2, 0.0 }
 0x2d6   : > { %v6400_v7 = vpop.f32.mrb[229].mxu0  ;;  %v6463_v14 = vpop.f32.mrb[228].mxu1  ;;  %4581 = vadd.xlane.f32.xlu0 %v4580_v48 }
 0x2d7   : > { %v6401_v39 = vadd.f32 %v6400_v7, %v6399_v26  ;;  %v6402_v43 = vpop.f32.mrb[230].mxu0  ;;  %v6464_v55 = vpop.f32.mrb[229].mxu1 }
 0x2d8   : > { %v6403_v21 = vpop.f32.mrb[231].mxu0  ;;  %v6465_v52 = vadd.f32 %v6464_v55, %v6463_v14  ;;  %v6466_v60 = vpop.f32.mrb[230].mxu1 }
 0x2d9   : > { %v4313_v20 = vadd.f32 %v6401_v39, %v9956_v23  ;;  %v6404_v8 = vadd.f32 %v6403_v21, %v6402_v43  ;;  %v6467_v44 = vpop.f32.mrb[231].mxu1 }
 0x2da   : > { %v6468_v27 = vadd.f32 %v6467_v44, %v6466_v60 }
 0x2db   : > { %v4316_v5 = vadd.f32 %v6404_v8, %v9960_v53  ;;  %v4410_v6 = vadd.f32 %v6465_v52, %v4313_v20 }
 0x2dd   : > { %v4583_v4 = vsel %vm2475_vm0, %v4410_v6, 0.0  ;;  %v4413_v11 = vadd.f32 %v6468_v27, %v4316_v5 }
 0x2de   : > { %v6405_v12 = vpop.f32.mrb[232].mxu0  ;;  %4584 = vadd.xlane.f32.xlu1 %v4583_v4 }
 0x2df   : > { %v6406_v17 = vpop.f32.mrb[233].mxu0  ;;  %v4586_v50 = vsel %vm2475_vm0, %v4413_v11, 0.0 }
 0x2e0   : > { %v6469_v24 = vpop.f32.mrb[232].mxu1  ;;  %v6407_v38 = vadd.f32 %v6406_v17, %v6405_v12  ;;  %v6408_v49 = vpop.f32.mrb[234].mxu0  ;;  %4587 = vadd.xlane.f32.xlu0 %v4586_v50 }
 0x2e1   : > { %v6470_v10 = vpop.f32.mrb[233].mxu1  ;;  %v6409_v42 = vpop.f32.mrb[235].mxu0 }
 0x2e2   : > { %v6471_v23 = vadd.f32 %v6470_v10, %v6469_v24  ;;  %v6472_v13 = vpop.f32.mrb[234].mxu1  ;;  %v4321_v18 = vadd.f32 %v6407_v38, %v9964_v32  ;;  %v6410_v53 = vadd.f32 %v6409_v42, %v6408_v49 }
 0x2e3   : > { %v6473_v34 = vpop.f32.mrb[235].mxu1 }
 0x2e4   : > { %v6474_v30 = vadd.f32 %v6473_v34, %v6472_v13  ;;  %v4324_v56 = vadd.f32 %v6410_v53, %v9966_v47  ;;  %v4418_v63 = vadd.f32 %v6471_v23, %v4321_v18 }
 0x2e6   : > { %v4589_v62 = vsel %vm2475_vm0, %v4418_v63, 0.0  ;;  %v4421_v51 = vadd.f32 %v6474_v30, %v4324_v56 }
 0x2e7   : > { %v6411_v22 = vpop.f32.mrb[236].mxu0  ;;  %4590 = vadd.xlane.f32.xlu1 %v4589_v62 }
 0x2e8   : > { %v6412_v40 = vpop.f32.mrb[237].mxu0  ;;  %v4592_v31 = vsel %vm2475_vm0, %v4421_v51, 0.0 }
 0x2e9   : > { %v6475_v15 = vpop.f32.mrb[236].mxu1  ;;  %v6413_v46 = vadd.f32 %v6412_v40, %v6411_v22  ;;  %v6414_v33 = vpop.f32.mrb[238].mxu0  ;;  %4593 = vadd.xlane.f32.xlu0 %v4592_v31 }
 0x2ea   : > { %v6476_v61 = vpop.f32.mrb[237].mxu1  ;;  %v6415_v45 = vpop.f32.mrb[239].mxu0 }
 0x2eb   : > { %v6477_v32 = vadd.f32 %v6476_v61, %v6475_v15  ;;  %v6478_v3 = vpop.f32.mrb[238].mxu1  ;;  %v4329_v57 = vadd.f32 %v6413_v46, %v9970_v35  ;;  %v6416_v47 = vadd.f32 %v6415_v45, %v6414_v33 }
 0x2ec   : > { %v6479_v16 = vpop.f32.mrb[239].mxu1 }
 0x2ed   : > { %v6480_v58 = vadd.f32 %v6479_v16, %v6478_v3  ;;  %v4332_v0 = vadd.f32 %v6416_v47, %v9972_v19  ;;  %v4426_v41 = vadd.f32 %v6477_v32, %v4329_v57 }
 0x2ef   : > { %v4595_v36 = vsel %vm2475_vm0, %v4426_v41, 0.0  ;;  %v4429_v2 = vadd.f32 %v6480_v58, %v4332_v0 }
 0x2f0   : > { %v6417_v26 = vpop.f32.mrb[240].mxu0  ;;  %4596 = vadd.xlane.f32.xlu1 %v4595_v36 }
 0x2f1   : > { %v6418_v7 = vpop.f32.mrb[241].mxu0  ;;  %v6481_v14 = vpop.f32.mrb[240].mxu1  ;;  %v4598_v48 = vsel %vm2475_vm0, %v4429_v2, 0.0 }
 0x2f2   : > { %v6419_v39 = vadd.f32 %v6418_v7, %v6417_v26  ;;  %v6420_v43 = vpop.f32.mrb[242].mxu0  ;;  %v6482_v55 = vpop.f32.mrb[241].mxu1  ;;  %4599 = vadd.xlane.f32.xlu0 %v4598_v48  ;;  %v4851_v26 = vld [vmem:[%s10458_s7 + $0x40] sm:$0xff] }
 0x2f3   : > { %v6421_v21 = vpop.f32.mrb[243].mxu0  ;;  %v6483_v35 = vadd.f32 %v6482_v55, %v6481_v14  ;;  %v6484_v52 = vpop.f32.mrb[242].mxu1  ;;  %6581 = vmatprep.mubr.f32.mxu1 %v4851_v26  ;;  %v4464_v55 = vld [vmem:[#allocation2] sm:$0xff] }
 0x2f4   : > { %v4337_v60 = vadd.f32 %v6419_v39, %v9976_v59  ;;  %v6422_v19 = vadd.f32 %v6421_v21, %v6420_v43  ;;  %v6485_v20 = vpop.f32.mrb[243].mxu1  ;;  %v4843_v59 = vld [vmem:[%s10458_s7] sm:$0xff]  ;;  %v4465_v43 = vld [vmem:[#allocation2 + $0x8] sm:$0xff] }
 0x2f5   : > { %v6486_v8 = vadd.f32 %v6485_v20, %v6484_v52  ;;  %6569 = vmatprep.mubr.f32.mxu0 %v4843_v59 }
 0x2f6   : > { %v4340_v44 = vadd.f32 %v6422_v19, %v9978_v29  ;;  %v4434_v27 = vadd.f32 %v6483_v35, %v4337_v60 }
 0x2f8   : > { %v4601_v6 = vsel %vm2475_vm0, %v4434_v27, 0.0  ;;  %v4437_v12 = vadd.f32 %v6486_v8, %v4340_v44 }
 0x2f9   : > { %v6423_v5 = vpop.f32.mrb[244].mxu0  ;;  %4602 = vadd.xlane.f32.xlu1 %v4601_v6  ;;  %v4466_v6 = vld [vmem:[#allocation2 + $0x10] sm:$0xff] }
 0x2fa   : > { %v6424_v4 = vpop.f32.mrb[245].mxu0  ;;  %v4604_v49 = vsel %vm2475_vm0, %v4437_v12, 0.0 }
 0x2fb   : > { %v6487_v11 = vpop.f32.mrb[244].mxu1  ;;  %v6425_v17 = vadd.f32 %v6424_v4, %v6423_v5  ;;  %v6426_v24 = vpop.f32.mrb[246].mxu0  ;;  %4605 = vadd.xlane.f32.xlu0 %v4604_v49  ;;  %v4468_v5 = vld [vmem:[#allocation2 + $0x20] sm:$0xff]  ;;  %v4467_v49 = vld [vmem:[#allocation2 + $0x18] sm:$0xff] }
 0x2fc   : > { %v6488_v38 = vpop.f32.mrb[245].mxu1  ;;  %v6427_v10 = vpop.f32.mrb[247].mxu0 }
 0x2fd   : > { %v6489_v50 = vadd.f32 %v6488_v38, %v6487_v11  ;;  %v6490_v29 = vpop.f32.mrb[246].mxu1  ;;  %v4345_v42 = vadd.f32 %v6425_v17, %v9982_v37  ;;  %v6428_v23 = vadd.f32 %v6427_v10, %v6426_v24 }
 0x2fe   : > { %v6491_v13 = vpop.f32.mrb[247].mxu1 }
 0x2ff   : > { %v6492_v18 = vadd.f32 %v6491_v13, %v6490_v29  ;;  %v4348_v53 = vadd.f32 %v6428_v23, %v9984_v54  ;;  %v4442_v34 = vadd.f32 %v6489_v50, %v4345_v42  ;;  %v4472_v42 = vld [vmem:[#allocation2 + $0x40] sm:$0xff]  ;;  %v4469_v23 = vld [vmem:[#allocation2 + $0x28] sm:$0xff] }
 0x301   : > { %v4607_v56 = vsel %vm2475_vm0, %v4442_v34, 0.0  ;;  %v4445_v63 = vadd.f32 %v6492_v18, %v4348_v53 }
 0x302   : > { %4608 = vadd.xlane.f32.xlu1 %v4607_v56 }
 0x303   : > { %v6429_v30 = vpop.f32.mrb[248].mxu0  ;;  %v4610_v46 = vsel %vm2475_vm0, %v4445_v63, 0.0 }
 0x304   : > { %v6430_v22 = vpop.f32.mrb[249].mxu0  ;;  %v6493_v62 = vpop.f32.mrb[248].mxu1  ;;  %4611 = vadd.xlane.f32.xlu0 %v4610_v46 }
 0x305   : > { %v6431_v51 = vadd.f32 %v6430_v22, %v6429_v30  ;;  %v6432_v40 = vpop.f32.mrb[250].mxu0  ;;  %v6494_v15 = vpop.f32.mrb[249].mxu1 }
 0x306   : > { %v6433_v33 = vpop.f32.mrb[251].mxu0  ;;  %v6495_v37 = vadd.f32 %v6494_v15, %v6493_v62  ;;  %v6496_v61 = vpop.f32.mrb[250].mxu1  ;;  %v4474_v62 = vld [vmem:[#allocation2 + $0x50] sm:$0xff]  ;;  %v4471_v15 = vld [vmem:[#allocation2 + $0x38] sm:$0xff] }
 0x307   : > { %v4353_v31 = vadd.f32 %v6431_v51, %v9988_v25  ;;  %v6434_v54 = vadd.f32 %v6433_v33, %v6432_v40  ;;  %v6497_v45 = vpop.f32.mrb[251].mxu1 }
 0x308   : > { %v6498_v32 = vadd.f32 %v6497_v45, %v6496_v61 }
 0x309   : > { %v4356_v3 = vadd.f32 %v6434_v54, %v9990_v28  ;;  %v4450_v57 = vadd.f32 %v6495_v37, %v4353_v31 }
 0x30b   : > { %v6435_v47 = vpop.f32.mrb[252].mxu0  ;;  %v4613_v16 = vsel %vm2475_vm0, %v4450_v57, 0.0  ;;  %v4453_v58 = vadd.f32 %v6498_v32, %v4356_v3  ;;  %v4476_v57 = vld [vmem:[#allocation2 + $0x60] sm:$0xff] }
 0x30c   : > { %v6436_v0 = vpop.f32.mrb[253].mxu0  ;;  %4614 = vadd.xlane.f32.xlu1 %v4613_v16 }
 0x30d   : > { %v6499_v41 = vpop.f32.mrb[252].mxu1  ;;  %v6437_v36 = vadd.f32 %v6436_v0, %v6435_v47  ;;  %v6438_v2 = vpop.f32.mrb[254].mxu0  ;;  %v4616_v7 = vsel %vm2475_vm0, %v4453_v58, 0.0  ;;  %v4473_v58 = vld [vmem:[#allocation2 + $0x48] sm:$0xff] }
 0x30e   : > { %v6500_v25 = vpop.f32.mrb[253].mxu1  ;;  %v6439_v14 = vpop.f32.mrb[255].mxu0  ;;  %4617 = vadd.xlane.f32.xlu0 %v4616_v7 }
 0x30f   : > { %v6501_v28 = vadd.f32 %v6500_v25, %v6499_v41  ;;  %v6502_v39 = vpop.f32.mrb[254].mxu1  ;;  %v4361_v48 = vadd.f32 %v6437_v36, %v9994_v1  ;;  %v6440_v21 = vadd.f32 %v6439_v14, %v6438_v2 }
 0x310   : > { %v6503_v35 = vpop.f32.mrb[255].mxu1  ;;  %v4485_v60 = vpop.xlane.xlu1 %4484 }
 0x311   : > { %v6504_v52 = vadd.f32 %v6503_v35, %v6502_v39  ;;  %v4482_v19 = vpop.xlane.xlu0 %4481  ;;  %v4364_v20 = vadd.f32 %v6440_v21, %v9996_v9  ;;  %v4458_v8 = vadd.f32 %v6501_v28, %v4361_v48  ;;  %v4529_v44 = vadd.f32 %v4485_v60, %v4465_v43  ;;  %v4470_v9 = vld [vmem:[#allocation2 + $0x30] sm:$0xff]  ;;  %v4475_v21 = vld [vmem:[#allocation2 + $0x58] sm:$0xff] }
 0x312   : > { %v4528_v27 = vadd.f32 %v4482_v19, %v4464_v55  ;;  %v4478_v43 = vld [vmem:[#allocation2 + $0x70] sm:$0xff] }
 0x313   : > { %v4619_v12 = vsel %vm2475_vm0, %v4458_v8, 0.0  ;;  %v4461_v4 = vadd.f32 %v6504_v52, %v4364_v20  ;;  %4546 = vst.msk [vmem:[#allocation2 + $0x8] sm:$0xff] %vm402_vm1, %v4529_v44 }
 0x314   : > { %4545 = vst.msk [vmem:[#allocation2] sm:$0xff] %vm402_vm1, %v4528_v27  ;;  %4620 = vadd.xlane.f32.xlu1 %v4619_v12  ;;  %v4494_v1 = vpop.xlane.xlu1 %4493 }
 0x315   : > { %v4488_v11 = vpop.xlane.xlu0 %4487  ;;  %v4622_v17 = vsel %vm2475_vm0, %v4461_v4, 0.0  ;;  %v4532_v24 = vadd.f32 %v4494_v1, %v4468_v5 }
 0x316   : > { %v4530_v38 = vadd.f32 %v4488_v11, %v4466_v6  ;;  %4623 = vadd.xlane.f32.xlu0 %v4622_v17 }
 0x317   : > { %4549 = vst.msk [vmem:[#allocation2 + $0x20] sm:$0xff] %vm402_vm1, %v4532_v24  ;;  %v4477_v24 = vld [vmem:[#allocation2 + $0x68] sm:$0xff] }
 0x318   : > { %4547 = vst.msk [vmem:[#allocation2 + $0x10] sm:$0xff] %vm402_vm1, %v4530_v38  ;;  %v4500_v59 = vpop.xlane.xlu1 %4499 }
 0x319   : > { %v4491_v10 = vpop.xlane.xlu0 %4490  ;;  %v4534_v50 = vadd.f32 %v4500_v59, %v4470_v9 }
 0x31a   : > { %v4531_v29 = vadd.f32 %v4491_v10, %v4467_v49  ;;  %v4741_v18 = vld [vmem:[#allocation2 + $0x8] sm:$0xff] }
 0x31b   : > { %v4740_v13 = vld [vmem:[#allocation2] sm:$0xff]  ;;  %4551 = vst.msk [vmem:[#allocation2 + $0x30] sm:$0xff] %vm402_vm1, %v4534_v50  ;;  %v10044_v34 = vmul.f32 0.015625, %v4741_v18 }
 0x31c   : > { %4548 = vst.msk [vmem:[#allocation2 + $0x18] sm:$0xff] %vm402_vm1, %v4531_v29  ;;  %v10042_v53 = vmul.f32 0.015625, %v4740_v13  ;;  %v4506_v30 = vpop.xlane.xlu1 %4505 }
 0x31d   : > { %v4497_v56 = vpop.xlane.xlu0 %4496  ;;  %v4536_v63 = vadd.f32 %v4506_v30, %v4472_v42  ;;  %v4773_v40 = vmul.f32 %v10044_v34, %v10044_v34 }
 0x31e   : > { %v4533_v22 = vadd.f32 %v4497_v56, %v4469_v23  ;;  %v4772_v51 = vmul.f32 %v10042_v53, %v10042_v53  ;;  %v4744_v33 = vld [vmem:[#allocation2 + $0x20] sm:$0xff] }
 0x31f   : > { %v4742_v46 = vld [vmem:[#allocation2 + $0x10] sm:$0xff]  ;;  %4553 = vst.msk [vmem:[#allocation2 + $0x40] sm:$0xff] %vm402_vm1, %v4536_v63  ;;  %v10054_v54 = vmul.f32 0.015625, %v4744_v33  ;;  %v4789_v16 = vsel %vm402_vm1, %v4773_v40, 0.0  ;;  %v4479_v63 = vld [vmem:[#allocation2 + $0x78] sm:$0xff] }
 0x320   : > { %4550 = vst.msk [vmem:[#allocation2 + $0x28] sm:$0xff] %vm402_vm1, %v4533_v22  ;;  %v10052_v37 = vmul.f32 0.015625, %v4742_v46  ;;  %v4512_v61 = vpop.xlane.xlu1 %4511  ;;  %v4788_v45 = vsel %vm402_vm1, %v4772_v51, 0.0 }
 0x321   : > { %v4503_v31 = vpop.xlane.xlu0 %4502  ;;  %v4538_v32 = vadd.f32 %v4512_v61, %v4474_v62  ;;  %v4776_v7 = vmul.f32 %v10054_v54, %v10054_v54  ;;  %v4790_v14 = vadd.f32 %v4789_v16, %v4788_v45 }
 0x322   : > { %v4535_v3 = vadd.f32 %v4503_v31, %v4471_v15  ;;  %v4774_v47 = vmul.f32 %v10052_v37, %v10052_v37  ;;  %v4746_v41 = vld [vmem:[#allocation2 + $0x30] sm:$0xff] }
 0x323   : > { %v4743_v0 = vld [vmem:[#allocation2 + $0x18] sm:$0xff]  ;;  %4555 = vst.msk [vmem:[#allocation2 + $0x50] sm:$0xff] %vm402_vm1, %v4538_v32  ;;  %v10067_v55 = vmul.f32 0.015625, %v4746_v41  ;;  %v4795_v6 = vsel %vm402_vm1, %v4776_v7, 0.0 }
 0x324   : > { %4552 = vst.msk [vmem:[#allocation2 + $0x38] sm:$0xff] %vm402_vm1, %v4535_v3  ;;  %v10062_v26 = vmul.f32 0.015625, %v4743_v0  ;;  %v4791_v36 = vsel %vm402_vm1, %v4774_v47, 0.0  ;;  %v4518_v2 = vpop.xlane.xlu1 %4517 }
 0x325   : > { %v4509_v25 = vpop.xlane.xlu0 %4508  ;;  %v4540_v28 = vadd.f32 %v4518_v2, %v4476_v57  ;;  %v4792_v60 = vadd.f32 %v4791_v36, %v4790_v14  ;;  %v4778_v11 = vmul.f32 %v10067_v55, %v10067_v55 }
 0x326   : > { %v4537_v39 = vadd.f32 %v4509_v25, %v4473_v58  ;;  %v4775_v48 = vmul.f32 %v10062_v26, %v10062_v26  ;;  %v4748_v52 = vld [vmem:[#allocation2 + $0x40] sm:$0xff] }
 0x327   : > { %v4745_v35 = vld [vmem:[#allocation2 + $0x28] sm:$0xff]  ;;  %4557 = vst.msk [vmem:[#allocation2 + $0x60] sm:$0xff] %vm402_vm1, %v4540_v28  ;;  %v10076_v27 = vmul.f32 0.015625, %v4748_v52  ;;  %v4799_v18 = vsel %vm402_vm1, %v4778_v11, 0.0 }
 0x328   : > { %4554 = vst.msk [vmem:[#allocation2 + $0x48] sm:$0xff] %vm402_vm1, %v4537_v39  ;;  %v10073_v19 = vmul.f32 0.015625, %v4745_v35  ;;  %v4793_v20 = vsel %vm402_vm1, %v4775_v48, 0.0  ;;  %v4524_v8 = vpop.xlane.xlu1 %4523 }
 0x329   : > { %v4515_v44 = vpop.xlane.xlu0 %4514  ;;  %v4794_v5 = vadd.f32 %v4793_v20, %v4792_v60  ;;  %v4542_v12 = vadd.f32 %v4524_v8, %v4478_v43  ;;  %v4780_v50 = vmul.f32 %v10076_v27, %v10076_v27 }
 0x32a   : > { %v4539_v4 = vadd.f32 %v4515_v44, %v4475_v21  ;;  %v4777_v1 = vmul.f32 %v10073_v19, %v10073_v19  ;;  %v4750_v17 = vld [vmem:[#allocation2 + $0x50] sm:$0xff] }
 0x32b   : > { %v4747_v38 = vld [vmem:[#allocation2 + $0x38] sm:$0xff]  ;;  %v4796_v9 = vadd.f32 %v4795_v6, %v4794_v5  ;;  %4559 = vst.msk [vmem:[#allocation2 + $0x70] sm:$0xff] %vm402_vm1, %v4542_v12  ;;  %v10090_v42 = vmul.f32 0.015625, %v4750_v17  ;;  %v4803_v46 = vsel %vm402_vm1, %v4780_v50, 0.0 }
 0x32c   : > { %4556 = vst.msk [vmem:[#allocation2 + $0x58] sm:$0xff] %vm402_vm1, %v4539_v4  ;;  %v10085_v49 = vmul.f32 0.015625, %v4747_v38  ;;  %v4797_v59 = vsel %vm402_vm1, %v4777_v1, 0.0 }
 0x32d   : > { %v4521_v10 = vpop.xlane.xlu0 %4520  ;;  %v4798_v29 = vadd.f32 %v4797_v59, %v4796_v9  ;;  %v4782_v45 = vmul.f32 %v10090_v42, %v10090_v42 }
 0x32e   : > { %v4541_v23 = vadd.f32 %v4521_v10, %v4477_v24  ;;  %v4779_v13 = vmul.f32 %v10085_v49, %v10085_v49  ;;  %v4752_v30 = vld [vmem:[#allocation2 + $0x60] sm:$0xff] }
 0x32f   : > { %v4749_v56 = vld [vmem:[#allocation2 + $0x48] sm:$0xff]  ;;  %v4800_v22 = vadd.f32 %v4799_v18, %v4798_v29  ;;  %v10100_v33 = vmul.f32 0.015625, %v4752_v30  ;;  %v4807_v2 = vsel %vm402_vm1, %v4782_v45, 0.0 }
 0x330   : > { %4558 = vst.msk [vmem:[#allocation2 + $0x68] sm:$0xff] %vm402_vm1, %v4541_v23  ;;  %v10096_v62 = vmul.f32 0.015625, %v4749_v56  ;;  %v4801_v51 = vsel %vm402_vm1, %v4779_v13, 0.0 }
 0x331   : > { %v4527_v40 = vpop.xlane.xlu0 %4526  ;;  %v4802_v15 = vadd.f32 %v4801_v51, %v4800_v22  ;;  %v4784_v0 = vmul.f32 %v10100_v33, %v10100_v33 }
 0x332   : > { %v4543_v61 = vadd.f32 %v4527_v40, %v4479_v63  ;;  %v4781_v31 = vmul.f32 %v10096_v62, %v10096_v62  ;;  %v4754_v32 = vld [vmem:[#allocation2 + $0x70] sm:$0xff]  ;;  %v4562_v40 = vld [vmem:[#allocation3 + $0x8] sm:$0xff] }
 0x333   : > { %v4751_v3 = vld [vmem:[#allocation2 + $0x58] sm:$0xff]  ;;  %v4804_v57 = vadd.f32 %v4803_v46, %v4802_v15  ;;  %v10112_v41 = vmul.f32 0.015625, %v4754_v32  ;;  %v4811_v21 = vsel %vm402_vm1, %v4784_v0, 0.0 }
 0x334   : > { %v10106_v47 = vmul.f32 0.015625, %v4751_v3  ;;  %4560 = vst.msk [vmem:[#allocation2 + $0x78] sm:$0xff] %vm402_vm1, %v4543_v61  ;;  %v4805_v16 = vsel %vm402_vm1, %v4781_v31, 0.0  ;;  %v4564_v3 = vld [vmem:[#allocation3 + $0x18] sm:$0xff] }
 0x335   : > { %v4806_v58 = vadd.f32 %v4805_v16, %v4804_v57  ;;  %v4786_v43 = vmul.f32 %v10112_v41, %v10112_v41  ;;  %v4692_v16 = vld [vmem:[%s10457_s6] sm:$0xff] }
 0x336   : > { %v4783_v36 = vmul.f32 %v10106_v47, %v10106_v47 }
 0x337   : > { %v4753_v25 = vld [vmem:[#allocation2 + $0x68] sm:$0xff]  ;;  %v4808_v7 = vadd.f32 %v4807_v2, %v4806_v58  ;;  %v4815_v44 = vsel %vm402_vm1, %v4786_v43, 0.0 }
 0x338   : > { %v10117_v14 = vmul.f32 0.015625, %v4753_v25  ;;  %v4809_v28 = vsel %vm402_vm1, %v4783_v36, 0.0 }
 0x339   : > { %v4810_v39 = vadd.f32 %v4809_v28, %v4808_v7 }
 0x33a   : > { %v4785_v48 = vmul.f32 %v10117_v14, %v10117_v14 }
 0x33b   : > { %v4755_v35 = vld [vmem:[#allocation2 + $0x78] sm:$0xff]  ;;  %v4812_v52 = vadd.f32 %v4811_v21, %v4810_v39  ;;  %v4565_v39 = vld [vmem:[#allocation3 + $0x20] sm:$0xff] }
 0x33c   : > { %v10125_v60 = vmul.f32 0.015625, %v4755_v35  ;;  %v4813_v20 = vsel %vm402_vm1, %v4785_v48, 0.0  ;;  %v4566_v35 = vld [vmem:[#allocation3 + $0x28] sm:$0xff] }
 0x33d   : > { %v4814_v8 = vadd.f32 %v4813_v20, %v4812_v52 }
 0x33e   : > { %v4787_v5 = vmul.f32 %v10125_v60, %v10125_v60 }
 0x33f   : > { %v4816_v6 = vadd.f32 %v4815_v44, %v4814_v8  ;;  %v4844_v44 = vld [vmem:[%s10458_s7 + $0x8] sm:$0xff] }
 0x340   : > { %v4817_v12 = vsel %vm402_vm1, %v4787_v5, 0.0 }
 0x341   : > { %v4818_v4 = vadd.f32 %v4817_v12, %v4816_v6  ;;  %v4852_v12 = vld [vmem:[%s10458_s7 + $0x48] sm:$0xff] }
 0x343   : > { %v4819_v1 = vrot.slane %v4818_v4, 4 }
 0x345   : > { %v4820_v11 = vadd.f32 %v4819_v1, %v4818_v4  ;;  %v4695_v4 = vld [vmem:[%s10457_s6 + $0x18] sm:$0xff] }
 0x347   : > { %v4821_v17 = vrot.slane %v4820_v11, 2 }
 0x349   : > { %v4822_v24 = vadd.f32 %v4821_v17, %v4820_v11  ;;  %v4845_v11 = vld [vmem:[%s10458_s7 + $0x10] sm:$0xff] }
 0x34a   : > { %v4853_v17 = vld [vmem:[%s10458_s7 + $0x50] sm:$0xff] }
 0x34b   : > { %v4823_v38 = vrot.slane %v4822_v24, 1 }
 0x34d   : > { %v4824_v9 = vadd.f32 %v4823_v38, %v4822_v24 }
 0x34f   : > { %v4825_v59 = vmax.f32 %v4824_v9, 1e-24  ;;  %v4567_v9 = vld [vmem:[#allocation3 + $0x30] sm:$0xff] }
 0x351   : > { %6739 = vrsqrt.f32 %v4825_v59 }
 0x35b   : > { %v6740_v10 = vpop.eup %6739 }
 0x35c   : > { %v4827_v50 = vmul.f32 %v6740_v10, %v10042_v53  ;;  %v4828_v29 = vmul.f32 %v6740_v10, %v10044_v34  ;;  %v4829_v23 = vmul.f32 %v6740_v10, %v10052_v37  ;;  %v4830_v13 = vmul.f32 %v6740_v10, %v10062_v26  ;;  %v4561_v37 = vld [vmem:[#allocation3] sm:$0xff] }
 0x35d   : > { %v4831_v56 = vmul.f32 %v6740_v10, %v10054_v54  ;;  %v4832_v63 = vmul.f32 %v6740_v10, %v10073_v19  ;;  %v4833_v53 = vmul.f32 %v6740_v10, %v10067_v55  ;;  %v4834_v34 = vmul.f32 %v6740_v10, %v10085_v49 }
 0x35e   : > { %v6593_v18 = vpack.c.bf16 %v4828_v29, %v4827_v50  ;;  %v6597_v30 = vpack.c.bf16 %v4830_v13, %v4829_v23  ;;  %v4835_v51 = vmul.f32 %v6740_v10, %v10076_v27  ;;  %v4836_v54 = vmul.f32 %v6740_v10, %v10096_v62  ;;  %v4563_v27 = vld [vmem:[#allocation3 + $0x10] sm:$0xff]  ;;  %v4854_v50 = vld [vmem:[%s10458_s7 + $0x58] sm:$0xff]  ;;  %v4847_v13 = vld [vmem:[%s10458_s7 + $0x20] sm:$0xff] }
 0x35f   : > { %v6601_v22 = vpack.c.bf16 %v4832_v63, %v4831_v56  ;;  %v6605_v26 = vpack.c.bf16 %v4834_v34, %v4833_v53  ;;  %v4837_v49 = vmul.f32 %v6740_v10, %v10090_v42  ;;  %v4838_v61 = vmul.f32 %v6740_v10, %v10106_v47  ;;  %v4568_v23 = vld [vmem:[#allocation3 + $0x38] sm:$0xff]  ;;  %v4696_v56 = vld [vmem:[%s10457_s6 + $0x20] sm:$0xff]  ;;  %v4848_v53 = vld [vmem:[%s10458_s7 + $0x28] sm:$0xff] }
 0x360   : > { %6594 = vmatprep.subr.bf16.mxu0 %v6593_v18  ;;  %6625 = vmatprep.subr.bf16.mxu1 %v6593_v18  ;;  %v6609_v46 = vpack.c.bf16 %v4836_v54, %v4835_v51  ;;  %v4839_v45 = vmul.f32 %v6740_v10, %v10100_v33  ;;  %v4840_v32 = vmul.f32 %v6740_v10, %v10117_v14  ;;  %v4697_v51 = vld [vmem:[%s10457_s6 + $0x28] sm:$0xff] }
 0x361   : > { %6596 = vmatpush3.bf16.msra.mxu0 %v6593_v18  ;;  %6633 = vmatpush3.bf16.msra.mxu1 %v6593_v18  ;;  %v4579_v19 = vpop.xlane.xlu1 %4578  ;;  %v6613_v62 = vpack.c.bf16 %v4838_v61, %v4837_v49  ;;  %v4841_v47 = vmul.f32 %v6740_v10, %v10112_v41  ;;  %v4842_v36 = vmul.f32 %v6740_v10, %v10125_v60  ;;  %v4693_v41 = vld [vmem:[%s10457_s6 + $0x8] sm:$0xff]  ;;  %v4694_v60 = vld [vmem:[%s10457_s6 + $0x10] sm:$0xff]  ;;  %v4846_v10 = vld [vmem:[%s10458_s7 + $0x18] sm:$0xff] }
 0x362   : > { %6598 = vmatprep.subr.bf16.mxu0 %v6597_v30  ;;  %6626 = vmatprep.subr.bf16.mxu1 %v6597_v30  ;;  %v4625_v15 = vadd.f32 %v4579_v19, %v4561_v37  ;;  %v6617_v33 = vpack.c.bf16 %v4840_v32, %v4839_v45  ;;  %v4855_v18 = vld [vmem:[%s10458_s7 + $0x60] sm:$0xff]  ;;  %v4849_v19 = vld [vmem:[%s10458_s7 + $0x30] sm:$0xff]  ;;  %v4850_v61 = vld [vmem:[%s10458_s7 + $0x38] sm:$0xff] }
 0x363   : > { %v4582_v55 = vpop.xlane.xlu0 %4581  ;;  %v6621_v43 = vpack.c.bf16 %v4842_v36, %v4841_v47  ;;  %v4698_v32 = vld [vmem:[%s10457_s6 + $0x30] sm:$0xff] }
 0x364   : > { %4641 = vst.msk [vmem:[#allocation3] sm:$0xff] %vm402_vm1, %v4625_v15  ;;  %v4626_v31 = vadd.f32 %v4582_v55, %v4562_v40  ;;  %v4857_v40 = vld [vmem:[%s10458_s7 + $0x70] sm:$0xff] }
 0x365   : > { %6600 = vmatpush3.bf16.msra.mxu0 %v6597_v30  ;;  %6634 = vmatpush3.bf16.msra.mxu1 %v6597_v30  ;;  %v4571_v36 = vld [vmem:[#allocation3 + $0x50] sm:$0xff] }
 0x366   : > { %6602 = vmatprep.subr.bf16.mxu0 %v6601_v22  ;;  %6627 = vmatprep.subr.bf16.mxu1 %v6601_v22  ;;  %4642 = vst.msk [vmem:[#allocation3 + $0x8] sm:$0xff] %vm402_vm1, %v4626_v31  ;;  %v4858_v31 = vld [vmem:[%s10458_s7 + $0x78] sm:$0xff] }
 0x369   : > { %6604 = vmatpush3.bf16.msra.mxu0 %v6601_v22  ;;  %6635 = vmatpush3.bf16.msra.mxu1 %v6601_v22 }
 0x36a   : > { %6606 = vmatprep.subr.bf16.mxu0 %v6605_v26  ;;  %6628 = vmatprep.subr.bf16.mxu1 %v6605_v26 }
 0x36b   : > { %v4585_v42 = vpop.xlane.xlu1 %4584  ;;  %v4660_v58 = vld [vmem:[#allocation3] sm:$0xff] }
 0x36c   : > { %v4627_v57 = vadd.f32 %v4585_v42, %v4563_v27  ;;  %v4676_v2 = vmul.f32 0.015625, %v4660_v58 }
 0x36d   : > { %6608 = vmatpush3.bf16.msra.mxu0 %v6605_v26  ;;  %6636 = vmatpush3.bf16.msra.mxu1 %v6605_v26  ;;  %v4588_v0 = vpop.xlane.xlu0 %4587  ;;  %v4661_v7 = vld [vmem:[#allocation3 + $0x8] sm:$0xff] }
 0x36e   : > { %6610 = vmatprep.subr.bf16.mxu0 %v6609_v46  ;;  %6629 = vmatprep.subr.bf16.mxu1 %v6609_v46  ;;  %4643 = vst.msk [vmem:[#allocation3 + $0x10] sm:$0xff] %vm402_vm1, %v4627_v57  ;;  %v4628_v25 = vadd.f32 %v4588_v0, %v4564_v3  ;;  %v4708_v14 = vadd.f32 %v4692_v16, %v4676_v2  ;;  %v4677_v28 = vmul.f32 0.015625, %v4661_v7  ;;  %v4856_v26 = vld [vmem:[%s10458_s7 + $0x68] sm:$0xff]  ;;  %v4699_v16 = vld [vmem:[%s10457_s6 + $0x38] sm:$0xff] }
 0x370   : > { %4644 = vst.msk [vmem:[#allocation3 + $0x18] sm:$0xff] %vm402_vm1, %v4628_v25  ;;  %4724 = vst.msk [vmem:[%s10160_s25] sm:$0xff] %vm402_vm1, %v4708_v14  ;;  %v4709_v48 = vadd.f32 %v4693_v41, %v4677_v28  ;;  %v4572_v41 = vld [vmem:[#allocation3 + $0x58] sm:$0xff]  ;;  %v4700_v14 = vld [vmem:[%s10457_s6 + $0x40] sm:$0xff] }
 0x371   : > { %6612 = vmatpush3.bf16.msra.mxu0 %v6609_v46  ;;  %6637 = vmatpush3.bf16.msra.mxu1 %v6609_v46  ;;  %v4569_v46 = vld [vmem:[#allocation3 + $0x40] sm:$0xff] }
 0x372   : > { %6614 = vmatprep.subr.bf16.mxu0 %v6613_v62  ;;  %6630 = vmatprep.subr.bf16.mxu1 %v6613_v62  ;;  %4725 = vst.msk [vmem:[%s10160_s25 + $0x8] sm:$0xff] %vm402_vm1, %v4709_v48 }
 0x374   : > { %v4591_v21 = vpop.xlane.xlu1 %4590 }
 0x375   : > { %6616 = vmatpush3.bf16.msra.mxu0 %v6613_v62  ;;  %6638 = vmatpush3.bf16.msra.mxu1 %v6613_v62  ;;  %v4629_v52 = vadd.f32 %v4591_v21, %v4565_v39  ;;  %v4662_v20 = vld [vmem:[#allocation3 + $0x10] sm:$0xff]  ;;  %v4570_v62 = vld [vmem:[#allocation3 + $0x48] sm:$0xff] }
 0x376   : > { %6618 = vmatprep.subr.bf16.mxu0 %v6617_v33  ;;  %6631 = vmatprep.subr.bf16.mxu1 %v6617_v33  ;;  %v4594_v8 = vpop.xlane.xlu0 %4593  ;;  %v4678_v5 = vmul.f32 0.015625, %v4662_v20  ;;  %v4701_v21 = vld [vmem:[%s10457_s6 + $0x48] sm:$0xff]  ;;  %v4573_v20 = vld [vmem:[#allocation3 + $0x60] sm:$0xff] }
 0x377   : > { %4645 = vst.msk [vmem:[#allocation3 + $0x20] sm:$0xff] %vm402_vm1, %v4629_v52  ;;  %v4630_v6 = vadd.f32 %v4594_v8, %v4566_v35  ;;  %v4663_v1 = vld [vmem:[#allocation3 + $0x18] sm:$0xff] }
 0x378   : > { %v4710_v24 = vadd.f32 %v4694_v60, %v4678_v5  ;;  %v4679_v38 = vmul.f32 0.015625, %v4663_v1  ;;  %v4574_v5 = vld [vmem:[#allocation3 + $0x68] sm:$0xff] }
 0x379   : > { %6620 = vmatpush3.bf16.msra.mxu0 %v6617_v33  ;;  %6639 = vmatpush3.bf16.msra.mxu1 %v6617_v33  ;;  %4646 = vst.msk [vmem:[#allocation3 + $0x28] sm:$0xff] %vm402_vm1, %v4630_v6 }
 0x37a   : > { %6622 = vmatprep.subr.bf16.mxu0 %v6621_v43  ;;  %6632 = vmatprep.subr.bf16.mxu1 %v6621_v43  ;;  %4726 = vst.msk [vmem:[%s10160_s25 + $0x10] sm:$0xff] %vm402_vm1, %v4710_v24  ;;  %v4711_v59 = vadd.f32 %v4695_v4, %v4679_v38  ;;  %v4703_v24 = vld [vmem:[%s10457_s6 + $0x58] sm:$0xff] }
 0x37c   : > { %4727 = vst.msk [vmem:[%s10160_s25 + $0x18] sm:$0xff] %vm402_vm1, %v4711_v59 }
 0x37d   : > { %6624 = vmatpush3.bf16.msra.mxu0 %v6621_v43  ;;  %6640 = vmatpush3.bf16.msra.mxu1 %v6621_v43  ;;  %v4597_v29 = vpop.xlane.xlu1 %4596 }
 0x37e   : > { %v4631_v30 = vadd.f32 %v4597_v29, %v4567_v9  ;;  %v4664_v63 = vld [vmem:[#allocation3 + $0x20] sm:$0xff] }
 0x37f   : > { %v4600_v22 = vpop.xlane.xlu0 %4599  ;;  %v4680_v34 = vmul.f32 0.015625, %v4664_v63 }
 0x380   : > { %6570 = vmatmul.mubr.f32.vlgmr.msra.gmra.mrb[0].mxu0 %v4844_v44  ;;  %6582 = vmatmul.mubr.f32.vlgmr.msra.gmra.mrb[0].mxu1 %v4852_v12  ;;  %4647 = vst.msk [vmem:[#allocation3 + $0x30] sm:$0xff] %vm402_vm1, %v4631_v30  ;;  %v4632_v37 = vadd.f32 %v4600_v22, %v4568_v23  ;;  %v4665_v54 = vld [vmem:[#allocation3 + $0x28] sm:$0xff]  ;;  %v4702_v12 = vld [vmem:[%s10457_s6 + $0x50] sm:$0xff]  ;;  %v4576_v23 = vld [vmem:[#allocation3 + $0x78] sm:$0xff] }
 0x381   : > { %6572 = vmatprep.mubr.f32.mxu0 %v4845_v11  ;;  %6584 = vmatprep.mubr.f32.mxu1 %v4853_v17  ;;  %v4712_v15 = vadd.f32 %v4696_v56, %v4680_v34  ;;  %v4681_v55 = vmul.f32 0.015625, %v4665_v54  ;;  %v4706_v54 = vld [vmem:[%s10457_s6 + $0x70] sm:$0xff] }
 0x382   : > { %4648 = vst.msk [vmem:[#allocation3 + $0x38] sm:$0xff] %vm402_vm1, %v4632_v37 }
 0x383   : > { %4728 = vst.msk [vmem:[%s10160_s25 + $0x20] sm:$0xff] %vm402_vm1, %v4712_v15  ;;  %v4713_v49 = vadd.f32 %v4697_v51, %v4681_v55  ;;  %v4707_v15 = vld [vmem:[%s10457_s6 + $0x78] sm:$0xff] }
 0x384   : > { %6573 = vmatmul.mubr.f32.gmra.mrb[2].mxu0 %v4846_v10  ;;  %6585 = vmatmul.mubr.f32.gmra.mrb[2].mxu1 %v4854_v50  ;;  %v4575_v10 = vld [vmem:[#allocation3 + $0x70] sm:$0xff] }
 0x385   : > { %6575 = vmatprep.mubr.f32.mxu0 %v4847_v13  ;;  %6587 = vmatprep.mubr.f32.mxu1 %v4855_v18  ;;  %4729 = vst.msk [vmem:[%s10160_s25 + $0x28] sm:$0xff] %vm402_vm1, %v4713_v49  ;;  %v4704_v18 = vld [vmem:[%s10457_s6 + $0x60] sm:$0xff] }
 0x386   : > { %v4603_v27 = vpop.xlane.xlu1 %4602 }
 0x387   : > { %v4633_v45 = vadd.f32 %v4603_v27, %v4569_v46  ;;  %v4666_v42 = vld [vmem:[#allocation3 + $0x30] sm:$0xff]  ;;  %v4859_v27 = vld [vmem:[%s10459_s8] sm:$0xff] }
 0x388   : > { %6576 = vmatmul.mubr.f32.gmra.mrb[4].mxu0 %v4848_v53  ;;  %6588 = vmatmul.mubr.f32.gmra.mrb[4].mxu1 %v4856_v26  ;;  %v4606_v3 = vpop.xlane.xlu0 %4605  ;;  %v4682_v57 = vmul.f32 0.015625, %v4666_v42  ;;  %v4705_v53 = vld [vmem:[%s10457_s6 + $0x68] sm:$0xff] }
 0x389   : > { %6578 = vmatprep.mubr.f32.mxu0 %v4849_v19  ;;  %6590 = vmatprep.mubr.f32.mxu1 %v4857_v40  ;;  %4649 = vst.msk [vmem:[#allocation3 + $0x40] sm:$0xff] %vm402_vm1, %v4633_v45  ;;  %v4634_v47 = vadd.f32 %v4606_v3, %v4570_v62  ;;  %v4667_v58 = vld [vmem:[#allocation3 + $0x38] sm:$0xff] }
 0x38a   : > { %v4714_v0 = vadd.f32 %v4698_v32, %v4682_v57  ;;  %v4683_v33 = vmul.f32 0.015625, %v4667_v58  ;;  %v4861_v58 = vld [vmem:[%s10459_s8 + $0x10] sm:$0xff] }
 0x38b   : > { %4650 = vst.msk [vmem:[#allocation3 + $0x48] sm:$0xff] %vm402_vm1, %v4634_v47  ;;  %v4862_v47 = vld [vmem:[%s10459_s8 + $0x18] sm:$0xff] }
 0x38c   : > { %6579 = vmatmul.mubr.f32.gmra.mrb[6].mxu0 %v4850_v61  ;;  %6591 = vmatmul.mubr.f32.gmra.mrb[6].mxu1 %v4858_v31  ;;  %4730 = vst.msk [vmem:[%s10160_s25 + $0x30] sm:$0xff] %vm402_vm1, %v4714_v0  ;;  %v4715_v2 = vadd.f32 %v4699_v16, %v4683_v33  ;;  %v4860_v31 = vld [vmem:[%s10459_s8 + $0x8] sm:$0xff] }
 0x38e   : > { %4731 = vst.msk [vmem:[%s10160_s25 + $0x38] sm:$0xff] %vm402_vm1, %v4715_v2 }
 0x38f   : > { %v4609_v25 = vpop.xlane.xlu1 %4608 }
 0x390   : > { %v4635_v7 = vadd.f32 %v4609_v25, %v4571_v36  ;;  %v4668_v28 = vld [vmem:[#allocation3 + $0x40] sm:$0xff] }
 0x391   : > { %v4612_v39 = vpop.xlane.xlu0 %4611  ;;  %v4684_v43 = vmul.f32 0.015625, %v4668_v28 }
 0x392   : > { %4651 = vst.msk [vmem:[#allocation3 + $0x50] sm:$0xff] %vm402_vm1, %v4635_v7  ;;  %v4636_v48 = vadd.f32 %v4612_v39, %v4572_v41  ;;  %v4669_v35 = vld [vmem:[#allocation3 + $0x48] sm:$0xff] }
 0x393   : > { %v4716_v52 = vadd.f32 %v4700_v14, %v4684_v43  ;;  %v4685_v60 = vmul.f32 0.015625, %v4669_v35  ;;  %v4864_v39 = vld [vmem:[%s10459_s8 + $0x28] sm:$0xff] }
 0x394   : > { %4652 = vst.msk [vmem:[#allocation3 + $0x58] sm:$0xff] %vm402_vm1, %v4636_v48  ;;  %v4863_v48 = vld [vmem:[%s10459_s8 + $0x20] sm:$0xff] }
 0x395   : > { %4732 = vst.msk [vmem:[%s10160_s25 + $0x40] sm:$0xff] %vm402_vm1, %v4716_v52  ;;  %v4717_v8 = vadd.f32 %v4701_v21, %v4685_v60  ;;  %v4867_v60 = vld [vmem:[%s10459_s8 + $0x40] sm:$0xff] }
 0x397   : > { %4733 = vst.msk [vmem:[%s10160_s25 + $0x48] sm:$0xff] %vm402_vm1, %v4717_v8 }
 0x399   : > { %v4615_v44 = vpop.xlane.xlu1 %4614  ;;  %v4670_v4 = vld [vmem:[#allocation3 + $0x50] sm:$0xff] }
 0x39a   : > { %v4637_v6 = vadd.f32 %v4615_v44, %v4573_v20  ;;  %v4686_v11 = vmul.f32 0.015625, %v4670_v4  ;;  %v4866_v4 = vld [vmem:[%s10459_s8 + $0x38] sm:$0xff] }
 0x39b   : > { %v4618_v1 = vpop.xlane.xlu0 %4617  ;;  %v4671_v38 = vld [vmem:[#allocation3 + $0x58] sm:$0xff] }
 0x39c   : > { %4653 = vst.msk [vmem:[#allocation3 + $0x60] sm:$0xff] %vm402_vm1, %v4637_v6  ;;  %v4638_v17 = vadd.f32 %v4618_v1, %v4574_v5  ;;  %v4718_v9 = vadd.f32 %v4702_v12, %v4686_v11  ;;  %v4687_v59 = vmul.f32 0.015625, %v4671_v38  ;;  %v4865_v11 = vld [vmem:[%s10459_s8 + $0x30] sm:$0xff] }
 0x39e   : > { %4654 = vst.msk [vmem:[#allocation3 + $0x68] sm:$0xff] %vm402_vm1, %v4638_v17  ;;  %4734 = vst.msk [vmem:[%s10160_s25 + $0x50] sm:$0xff] %vm402_vm1, %v4718_v9  ;;  %v4719_v50 = vadd.f32 %v4703_v24, %v4687_v59 }
 0x3a0   : > { %4735 = vst.msk [vmem:[%s10160_s25 + $0x58] sm:$0xff] %vm402_vm1, %v4719_v50 }
 0x3a1   : > { %v4621_v29 = vpop.xlane.xlu1 %4620 }
 0x3a2   : > { %v4639_v13 = vadd.f32 %v4621_v29, %v4575_v10  ;;  %v4868_v10 = vld [vmem:[%s10459_s8 + $0x48] sm:$0xff] }
 0x3a3   : > { %v4672_v30 = vld [vmem:[#allocation3 + $0x60] sm:$0xff]  ;;  %v4624_v56 = vpop.xlane.xlu0 %4623 }
 0x3a4   : > { %v4688_v63 = vmul.f32 0.015625, %v4672_v30  ;;  %4655 = vst.msk [vmem:[#allocation3 + $0x70] sm:$0xff] %vm402_vm1, %v4639_v13  ;;  %v4640_v22 = vadd.f32 %v4624_v56, %v4576_v23 }
 0x3a5   : > { %v4673_v34 = vld [vmem:[#allocation3 + $0x68] sm:$0xff] }
 0x3a6   : > { %v4720_v37 = vadd.f32 %v4704_v18, %v4688_v63  ;;  %v4689_v26 = vmul.f32 0.015625, %v4673_v34  ;;  %4656 = vst.msk [vmem:[#allocation3 + $0x78] sm:$0xff] %vm402_vm1, %v4640_v22  ;;  %v4869_v18 = vld [vmem:[%s10459_s8 + $0x50] sm:$0xff] }
 0x3a8   : > { %4736 = vst.msk [vmem:[%s10160_s25 + $0x60] sm:$0xff] %vm402_vm1, %v4720_v37  ;;  %v4721_v51 = vadd.f32 %v4705_v53, %v4689_v26 }
 0x3aa   : > { %4737 = vst.msk [vmem:[%s10160_s25 + $0x68] sm:$0xff] %vm402_vm1, %v4721_v51 }
 0x3ab   : > { %v4674_v19 = vld [vmem:[#allocation3 + $0x70] sm:$0xff] }
 0x3ac   : > { %v4690_v40 = vmul.f32 0.015625, %v4674_v19 }
 0x3ad   : > { %v4675_v55 = vld [vmem:[#allocation3 + $0x78] sm:$0xff] }
 0x3ae   : > { %v4722_v46 = vadd.f32 %v4706_v54, %v4690_v40  ;;  %v4691_v49 = vmul.f32 0.015625, %v4675_v55  ;;  %v4870_v54 = vld [vmem:[%s10459_s8 + $0x58] sm:$0xff] }
 0x3b0   : > { %4738 = vst.msk [vmem:[%s10160_s25 + $0x70] sm:$0xff] %vm402_vm1, %v4722_v46  ;;  %v4723_v61 = vadd.f32 %v4707_v15, %v4691_v49  ;;  %v4871_v15 = vld [vmem:[%s10459_s8 + $0x60] sm:$0xff] }
 0x3b2   : > { %4739 = vst.msk [vmem:[%s10160_s25 + $0x78] sm:$0xff] %vm402_vm1, %v4723_v61 }
 0x453   : > { %v6571_v62 = vpop.f32.mrb[0].mxu0  ;;  %v6583_v45 = vpop.f32.mrb[0].mxu1 }
 0x454   : > { %v10300_v32 = vadd.f32 %v6571_v62, %v4860_v31  ;;  %v4941_v42 = vpop.f32.mrb[1].mxu0  ;;  %v4981_v3 = vpop.f32.mrb[1].mxu1  ;;  %v10360_v53 = vadd.f32 %v6583_v45, %v4868_v10 }
 0x455   : > { %v10302_v57 = vadd.f32 %v4941_v42, %v4859_v27  ;;  %v10344_v17 = vadd.f32 %v4981_v3, %v4867_v60  ;;  %v4872_v3 = vld [vmem:[%s10459_s8 + $0x68] sm:$0xff] }
 0x456   : > { %v5021_v16 = vmul.f32 %v10300_v32, %v10300_v32  ;;  %v5029_v49 = vmul.f32 %v10360_v53, %v10360_v53 }
 0x457   : > { %v5020_v0 = vmul.f32 %v10302_v57, %v10302_v57  ;;  %v6574_v33 = vpop.f32.mrb[2].mxu0  ;;  %v6586_v36 = vpop.f32.mrb[2].mxu1  ;;  %v5028_v34 = vmul.f32 %v10344_v17, %v10344_v17 }
 0x458   : > { %v5037_v2 = vsel %vm402_vm1, %v5021_v16, 0.0  ;;  %v10315_v25 = vadd.f32 %v6574_v33, %v4862_v47  ;;  %v4951_v41 = vpop.f32.mrb[3].mxu0  ;;  %v4991_v7 = vpop.f32.mrb[3].mxu1  ;;  %v4997_v61 = vadd.f32 %v6586_v36, %v4870_v54  ;;  %v4873_v47 = vld [vmem:[%s10459_s8 + $0x70] sm:$0xff]  ;;  %v5053_v16 = vsel %vm402_vm1, %v5029_v49, 0.0 }
 0x459   : > { %v5036_v14 = vsel %vm402_vm1, %v5020_v0, 0.0  ;;  %v10318_v28 = vadd.f32 %v4951_v41, %v4861_v58  ;;  %v4992_v19 = vadd.f32 %v4991_v7, %v4869_v18  ;;  %v5051_v27 = vsel %vm402_vm1, %v5028_v34, 0.0 }
 0x45a   : > { %v5038_v43 = vadd.f32 %v5037_v2, %v5036_v14  ;;  %v5023_v21 = vmul.f32 %v10315_v25, %v10315_v25  ;;  %v5031_v0 = vmul.f32 %v4997_v61, %v4997_v61  ;;  %v4874_v14 = vld [vmem:[%s10459_s8 + $0x78] sm:$0xff] }
 0x45b   : > { %v5022_v35 = vmul.f32 %v10318_v28, %v10318_v28  ;;  %v6577_v52 = vpop.f32.mrb[4].mxu0  ;;  %v6589_v20 = vpop.f32.mrb[4].mxu1  ;;  %v5030_v62 = vmul.f32 %v4992_v19, %v4992_v19 }
 0x45c   : > { %v10333_v8 = vadd.f32 %v6577_v52, %v4864_v39  ;;  %v4961_v44 = vpop.f32.mrb[5].mxu0  ;;  %v5001_v5 = vpop.f32.mrb[5].mxu1  ;;  %v5041_v24 = vsel %vm402_vm1, %v5023_v21, 0.0  ;;  %v5007_v36 = vadd.f32 %v6589_v20, %v4872_v3  ;;  %v5057_v39 = vsel %vm402_vm1, %v5031_v0, 0.0 }
 0x45d   : > { %v5039_v6 = vsel %vm402_vm1, %v5022_v35, 0.0  ;;  %v10336_v12 = vadd.f32 %v4961_v44, %v4863_v48  ;;  %v5002_v45 = vadd.f32 %v5001_v5, %v4871_v15  ;;  %v5055_v33 = vsel %vm402_vm1, %v5030_v62, 0.0 }
 0x45e   : > { %v5040_v1 = vadd.f32 %v5039_v6, %v5038_v43  ;;  %v5025_v38 = vmul.f32 %v10333_v8, %v10333_v8  ;;  %v5033_v48 = vmul.f32 %v5007_v36, %v5007_v36 }
 0x45f   : > { %v5024_v9 = vmul.f32 %v10336_v12, %v10336_v12  ;;  %v6580_v59 = vpop.f32.mrb[6].mxu0  ;;  %v6592_v50 = vpop.f32.mrb[6].mxu1  ;;  %v5032_v2 = vmul.f32 %v5002_v45, %v5002_v45 }
 0x460   : > { %v5042_v29 = vadd.f32 %v5041_v24, %v5040_v1  ;;  %v10354_v23 = vadd.f32 %v6580_v59, %v4866_v4  ;;  %v4971_v13 = vpop.f32.mrb[7].mxu0  ;;  %v5011_v30 = vpop.f32.mrb[7].mxu1  ;;  %v5045_v37 = vsel %vm402_vm1, %v5025_v38, 0.0  ;;  %v5017_v35 = vadd.f32 %v6592_v50, %v4874_v14 }
 0x461   : > { %v5043_v56 = vsel %vm402_vm1, %v5024_v9, 0.0  ;;  %v4972_v63 = vadd.f32 %v4971_v13, %v4865_v11  ;;  %v5012_v41 = vadd.f32 %v5011_v30, %v4873_v47  ;;  %v5059_v21 = vsel %vm402_vm1, %v5032_v2, 0.0 }
 0x462   : > { %v5044_v22 = vadd.f32 %v5043_v56, %v5042_v29  ;;  %v5027_v26 = vmul.f32 %v10354_v23, %v10354_v23  ;;  %v5061_v5 = vsel %vm402_vm1, %v5033_v48, 0.0  ;;  %v5035_v20 = vmul.f32 %v5017_v35, %v5017_v35 }
 0x463   : > { %v5026_v51 = vmul.f32 %v4972_v63, %v4972_v63  ;;  %v5034_v52 = vmul.f32 %v5012_v41, %v5012_v41 }
 0x464   : > { %v5046_v40 = vadd.f32 %v5045_v37, %v5044_v22  ;;  %v5049_v31 = vsel %vm402_vm1, %v5027_v26, 0.0  ;;  %v5065_v11 = vsel %vm402_vm1, %v5035_v20, 0.0 }
 0x465   : > { %v5047_v55 = vsel %vm402_vm1, %v5026_v51, 0.0  ;;  %v5063_v6 = vsel %vm402_vm1, %v5034_v52, 0.0 }
 0x466   : > { %v5048_v46 = vadd.f32 %v5047_v55, %v5046_v40 }
 0x468   : > { %v5050_v42 = vadd.f32 %v5049_v31, %v5048_v46 }
 0x46a   : > { %v5052_v58 = vadd.f32 %v5051_v27, %v5050_v42 }
 0x46c   : > { %v5054_v7 = vadd.f32 %v5053_v16, %v5052_v58 }
 0x46e   : > { %v5056_v43 = vadd.f32 %v5055_v33, %v5054_v7 }
 0x470   : > { %v5058_v60 = vadd.f32 %v5057_v39, %v5056_v43 }
 0x472   : > { %v5060_v44 = vadd.f32 %v5059_v21, %v5058_v60 }
 0x474   : > { %v5062_v4 = vadd.f32 %v5061_v5, %v5060_v44 }
 0x476   : > { %v5064_v1 = vadd.f32 %v5063_v6, %v5062_v4 }
 0x478   : > { %v5066_v24 = vadd.f32 %v5065_v11, %v5064_v1 }
 0x47a   : > { %v5067_v38 = vrot.slane %v5066_v24, 4 }
 0x47c   : > { %v5068_v9 = vadd.f32 %v5067_v38, %v5066_v24 }
 0x47e   : > { %v5069_v59 = vrot.slane %v5068_v9, 2 }
 0x480   : > { %v5070_v10 = vadd.f32 %v5069_v59, %v5068_v9 }
 0x482   : > { %v5071_v29 = vrot.slane %v5070_v10, 1 }
 0x484   : > { %v5072_v50 = vadd.f32 %v5071_v29, %v5070_v10 }
 0x486   : > { %v5073_v13 = vmax.f32 %v5072_v50, 1e-24 }
 0x488   : > { %6741 = vrsqrt.f32 %v5073_v13 }
 0x492   : > { %v6742_v18 = vpop.eup %6741 }
 0x493   : > { %v5075_v30 = vmul.f32 %v6742_v18, %v10302_v57  ;;  %v5076_v56 = vmul.f32 %v6742_v18, %v10300_v32  ;;  %v5077_v22 = vmul.f32 %v6742_v18, %v10318_v28  ;;  %v5078_v34 = vmul.f32 %v6742_v18, %v10315_v25 }
 0x494   : > { %v5079_v37 = vmul.f32 %v6742_v18, %v10336_v12  ;;  %v5080_v26 = vmul.f32 %v6742_v18, %v10333_v8  ;;  %v5081_v51 = vmul.f32 %v6742_v18, %v4972_v63  ;;  %v5082_v54 = vmul.f32 %v6742_v18, %v10354_v23 }
 0x495   : > { %v5083_v40 = vmul.f32 %v6742_v18, %v10344_v17  ;;  %v5084_v32 = vmul.f32 %v6742_v18, %v10360_v53  ;;  %v5085_v57 = vmul.f32 %v6742_v18, %v4992_v19  ;;  %v5086_v25 = vmul.f32 %v6742_v18, %v4997_v61  ;;  %5091 = vst.msk [vmem:[%s10399_s26] sm:$0xff] %vm402_vm1, %v5075_v30 }
 0x496   : > { %5092 = vst.msk [vmem:[%s10399_s26 + $0x8] sm:$0xff] %vm402_vm1, %v5076_v56  ;;  %5093 = vst.msk [vmem:[%s10399_s26 + $0x10] sm:$0xff] %vm402_vm1, %v5077_v22  ;;  %v5087_v28 = vmul.f32 %v6742_v18, %v5002_v45  ;;  %v5088_v8 = vmul.f32 %v6742_v18, %v5007_v36  ;;  %v5089_v12 = vmul.f32 %v6742_v18, %v5012_v41 }
 0x497   : > { %5094 = vst.msk [vmem:[%s10399_s26 + $0x18] sm:$0xff] %vm402_vm1, %v5078_v34  ;;  %v5090_v17 = vmul.f32 %v6742_v18, %v5017_v35  ;;  %5095 = vst.msk [vmem:[%s10399_s26 + $0x20] sm:$0xff] %vm402_vm1, %v5079_v37 }
 0x498   : > { %5096 = vst.msk [vmem:[%s10399_s26 + $0x28] sm:$0xff] %vm402_vm1, %v5080_v26  ;;  %5097 = vst.msk [vmem:[%s10399_s26 + $0x30] sm:$0xff] %vm402_vm1, %v5081_v51 }
 0x499   : > { %5098 = vst.msk [vmem:[%s10399_s26 + $0x38] sm:$0xff] %vm402_vm1, %v5082_v54  ;;  %5099 = vst.msk [vmem:[%s10399_s26 + $0x40] sm:$0xff] %vm402_vm1, %v5083_v40 }
 0x49a   : > { %5100 = vst.msk [vmem:[%s10399_s26 + $0x48] sm:$0xff] %vm402_vm1, %v5084_v32  ;;  %5101 = vst.msk [vmem:[%s10399_s26 + $0x50] sm:$0xff] %vm402_vm1, %v5085_v57 }
 0x49b   : > { %5102 = vst.msk [vmem:[%s10399_s26 + $0x58] sm:$0xff] %vm402_vm1, %v5086_v25  ;;  %5103 = vst.msk [vmem:[%s10399_s26 + $0x60] sm:$0xff] %vm402_vm1, %v5087_v28 }
 0x49c   : > { %5104 = vst.msk [vmem:[%s10399_s26 + $0x68] sm:$0xff] %vm402_vm1, %v5088_v8  ;;  %5105 = vst.msk [vmem:[%s10399_s26 + $0x70] sm:$0xff] %vm402_vm1, %v5089_v12 }
 0x49d   : > { %5106 = vst.msk [vmem:[%s10399_s26 + $0x78] sm:$0xff] %vm402_vm1, %v5090_v17 }
 0x49e PF: > { %s22_s17 = sadd.s32 1, %s6765_s17   ;;  %s10881_s15 = smov %s6761_s16 }
 0x49f   : > { %p19_p5 = scmp.ge.s32.totalorder %s22_s17, 4   ;;  %s10882_s16 = smov %s10884_s4 }
 0x4a1   :  { %21 = sbr.rel (!%p19_p5) target bundleno = 2 (0x2), region = 106 }

</bundles_post_ra>
